<compile_context>
chip_gen: v7x
topology: tpu7x:2x2x1
jax: 0.10.0
libtpu: 0.0.40
codegen_flags: <defaults>
</compile_context>

<pallas_src>
import jax
import jax.numpy as jnp
import numpy as np
from jax.experimental import pallas as pl
from jax.experimental.pallas import tpu as pltpu

# ---- static model config (module defaults: num_layers=3, num_row=2) ----
D = 32            # input_dim / hidden
NUM_ROW = 2       # num_row
NUM_LAYERS = 3    # num_layers
B = 1024          # total batch (gridded)
BM = 512          # batch tile per grid step (fills the MXU M dimension)
OUT_LANES = 128   # lane-dense padded output width (sliced to 1 outside)


def qnn_kernel(x_ref, w_ref, b_ref, alpha_ref, fcw_ref, fcb_ref, out_ref):
    """Whole-network forward for one (BM, D) batch tile.

    x_ref     : (BM, D)                f32, VMEM   activation tile
    w_ref     : (L, D, D)              f32, VMEM   per-layer folded W_sum (resident)
    b_ref     : (L, 1, D)              f32, VMEM   per-layer folded bias   (resident)
    alpha_ref : (L,)                   f32, SMEM   PReLU slope per layer
    fcw_ref   : (1, D)                 f32, VMEM   final Linear weight row
    fcb_ref   : (1,)                   f32, SMEM   final Linear bias
    out_ref   : (BM, OUT_LANES)        f32, VMEM   lane-broadcast logit
    """
    x = x_ref[...]  # (BM, D)
    for l in range(NUM_LAYERS):  # static unroll: 3 serially dependent layers
        residual = x
        # Folded quadratic layer: einsum('bd,brd->bd', x, h) == x * (x @ W_sum + b_sum)
        s = jnp.dot(x, w_ref[l], preferred_element_type=jnp.float32) + b_ref[l]
        q = x * s
        # PReLU with a single shared parameter per layer.
        a = alpha_ref[l]
        q = jnp.where(q >= 0, q, a * q)
        # residual connection
        x = q + residual
    # Final Linear(D, 1) as VPU multiply + lane reduction; broadcast to 128 lanes
    # so the store is unmasked (lane-dense output).
    logit = jnp.sum(x * fcw_ref[...], axis=-1, keepdims=True) + fcb_ref[0]  # (BM, 1)
    out_ref[...] = jnp.broadcast_to(logit, out_ref.shape)


def qnn_forward(x, w_sum, b_sum, alpha, fcw_row, fcb):
    b_total, d = x.shape
    nb = pl.cdiv(b_total, BM)
    out = pl.pallas_call(
        qnn_kernel,
        out_shape=jax.ShapeDtypeStruct((b_total, OUT_LANES), jnp.float32),
        grid=(nb,),
        in_specs=[
            pl.BlockSpec((BM, d), lambda i: (i, 0)),                      # x tile
            pl.BlockSpec((NUM_LAYERS, d, d), lambda i: (0, 0, 0)),        # W_sum (resident)
            pl.BlockSpec((NUM_LAYERS, 1, d), lambda i: (0, 0, 0)),        # b_sum (resident)
            pl.BlockSpec(memory_space=pltpu.MemorySpace.SMEM),            # alpha
            pl.BlockSpec((1, d), lambda i: (0, 0)),                       # fc weight row
            pl.BlockSpec(memory_space=pltpu.MemorySpace.SMEM),            # fc bias
        ],
        out_specs=pl.BlockSpec((BM, OUT_LANES), lambda i: (i, 0)),
        compiler_params=pltpu.CompilerParams(
            dimension_semantics=("parallel",)),                           # megacore on v7x
    )(x, w_sum, b_sum, alpha, fcw_row, fcb)
    return out[:, :1]


def reference_forward(x, wt, bias, alpha, fc_w, fc_b):
    """Pure-JAX reference of the UNFUSED forward pass (original num_row layout)."""
    for l in range(NUM_LAYERS):
        residual = x
        h = x @ wt[l] + bias[l]                                 # (B, NUM_ROW*D)
        s = h.reshape(-1, NUM_ROW, D).sum(axis=1)               # (B, D)
        q = x * s
        q = jnp.where(q >= 0, q, alpha[l] * q)
        x = q + residual
    return x @ fc_w + fc_b                                      # (B, 1)


if __name__ == "__main__":
    key = jax.random.PRNGKey(0)
    k_x, k_w, k_b, k_fw, k_fb = jax.random.split(key, 5)

    # Deterministic synthetic parameters (shapes match the PyTorch module).
    # Per-layer Linear(D, NUM_ROW*D): PyTorch weight is (NUM_ROW*D, D); store W^T.
    wt = jax.random.normal(k_w, (NUM_LAYERS, D, NUM_ROW * D), jnp.float32) / np.sqrt(D)
    bias = jax.random.normal(k_b, (NUM_LAYERS, NUM_ROW * D), jnp.float32) * 0.05
    # nn.PReLU() default init value is 0.25 (one shared parameter per layer).
    alpha = jnp.full((NUM_LAYERS,), 0.25, jnp.float32)
    # Final Linear(D, 1): PyTorch weight (1, D); store its transpose (D, 1).
    fc_w = jax.random.normal(k_fw, (D, 1), jnp.float32) / np.sqrt(D)
    fc_b = jax.random.normal(k_fb, (1,), jnp.float32) * 0.05

    # Input
    x = jax.random.normal(k_x, (B, D), jnp.float32)

    # ---- wrapper-side algebraic fold of the NUM_ROW reduction (exact) ----
    # einsum('bd,brd->bd', x, h) = x * sum_r h[:, r, :] = x * (x @ sum_r W_r^T + sum_r b_r)
    w_sum = wt.reshape(NUM_LAYERS, D, NUM_ROW, D).sum(axis=2)                   # (L, D, D)
    b_sum = bias.reshape(NUM_LAYERS, NUM_ROW, D).sum(axis=1)[:, None, :]        # (L, 1, D)
    fcw_row = fc_w.T                                                            # (1, D)

    out = qnn_forward(x, w_sum, b_sum, alpha, fcw_row, fc_b)
    out = jax.block_until_ready(out)

    ref = reference_forward(x, wt, bias, alpha, fc_w, fc_b)
    np.testing.assert_allclose(np.asarray(out), np.asarray(ref), rtol=1e-4, atol=1e-5)

    print("KERNEL_OK")
</pallas_src>

<mosaic_0001>
module attributes {stable_mosaic.version = 11 : i64} {
  func.func @qnn_kernel(%arg0: i32, %arg1: memref<512x32xf32, #tpu.memory_space<vmem>>, %arg2: memref<3x32x32xf32, #tpu.memory_space<vmem>>, %arg3: memref<3x1x32xf32, #tpu.memory_space<vmem>>, %arg4: memref<3xf32, #tpu.memory_space<smem>>, %arg5: memref<1x32xf32, #tpu.memory_space<vmem>>, %arg6: memref<1xf32, #tpu.memory_space<smem>>, %arg7: memref<512x128xf32, #tpu.memory_space<vmem>>) attributes {dimension_semantics = [#tpu.dimension_semantics<parallel>], iteration_bounds = array<i64: 2>, scalar_prefetch = 0 : i64, scratch_operands = 0 : i64, tpu.core_type = #tpu.core_type<tc>, window_params = [{transform_indices = @transform_0, window_bounds = array<i64: 512, 32>}, {pipeline_mode = #tpu.pipeline_mode<synchronous>, transform_indices = @transform_1, window_bounds = array<i64: 3, 32, 32>}, {pipeline_mode = #tpu.pipeline_mode<synchronous>, transform_indices = @transform_2, window_bounds = array<i64: 3, 1, 32>}, {transform_indices = @transform_3, window_bounds = array<i64: 3>}, {pipeline_mode = #tpu.pipeline_mode<synchronous>, transform_indices = @transform_4, window_bounds = array<i64: 1, 32>}, {transform_indices = @transform_5, window_bounds = array<i64: 1>}, {transform_indices = @transform_6, window_bounds = array<i64: 512, 128>}]} {
    %c0 = arith.constant 0 : index
    %c0_0 = arith.constant 0 : index
    %0 = vector.load %arg1[%c0, %c0_0] : memref<512x32xf32, #tpu.memory_space<vmem>>, vector<512x32xf32>
    %c0_1 = arith.constant 0 : index
    %c0_2 = arith.constant 0 : index
    %c0_3 = arith.constant 0 : index
    %1 = vector.load %arg2[%c0_1, %c0_2, %c0_3] : memref<3x32x32xf32, #tpu.memory_space<vmem>>, vector<1x32x32xf32>
    %2 = vector.shape_cast %1 : vector<1x32x32xf32> to vector<32x32xf32>
    %cst = arith.constant dense<0.000000e+00> : vector<512x32xf32>
    %3 = tpu.matmul %0, %2, %cst {dimension_numbers = #tpu.dot_dimension_numbers<[1], [0], [0], [1], [0, 0, 1, 1], [], []>} : vector<512x32xf32>, vector<32x32xf32>, vector<512x32xf32> -> vector<512x32xf32>
    %c0_4 = arith.constant 0 : index
    %c0_5 = arith.constant 0 : index
    %c0_6 = arith.constant 0 : index
    %4 = vector.load %arg3[%c0_4, %c0_5, %c0_6] : memref<3x1x32xf32, #tpu.memory_space<vmem>>, vector<1x1x32xf32>
    %5 = vector.shape_cast %4 : vector<1x1x32xf32> to vector<1x32xf32>
    %6 = vector.broadcast %5 : vector<1x32xf32> to vector<512x32xf32>
    %7 = arith.addf %3, %6 : vector<512x32xf32>
    %8 = arith.mulf %0, %7 : vector<512x32xf32>
    %c0_7 = arith.constant 0 : index
    %9 = memref.load %arg4[%c0_7] : memref<3xf32, #tpu.memory_space<smem>>
    %cst_8 = arith.constant 0.000000e+00 : f32
    %10 = vector.broadcast %cst_8 : f32 to vector<512x32xf32>
    %11 = arith.cmpf oge, %8, %10 : vector<512x32xf32>
    %12 = vector.broadcast %9 : f32 to vector<512x32xf32>
    %13 = arith.mulf %12, %8 : vector<512x32xf32>
    %14 = arith.select %11, %8, %13 : vector<512x32xi1>, vector<512x32xf32>
    %15 = arith.addf %14, %0 : vector<512x32xf32>
    %c1 = arith.constant 1 : index
    %c0_9 = arith.constant 0 : index
    %c0_10 = arith.constant 0 : index
    %16 = vector.load %arg2[%c1, %c0_9, %c0_10] : memref<3x32x32xf32, #tpu.memory_space<vmem>>, vector<1x32x32xf32>
    %17 = vector.shape_cast %16 : vector<1x32x32xf32> to vector<32x32xf32>
    %cst_11 = arith.constant dense<0.000000e+00> : vector<512x32xf32>
    %18 = tpu.matmul %15, %17, %cst_11 {dimension_numbers = #tpu.dot_dimension_numbers<[1], [0], [0], [1], [0, 0, 1, 1], [], []>} : vector<512x32xf32>, vector<32x32xf32>, vector<512x32xf32> -> vector<512x32xf32>
    %c1_12 = arith.constant 1 : index
    %c0_13 = arith.constant 0 : index
    %c0_14 = arith.constant 0 : index
    %19 = vector.load %arg3[%c1_12, %c0_13, %c0_14] : memref<3x1x32xf32, #tpu.memory_space<vmem>>, vector<1x1x32xf32>
    %20 = vector.shape_cast %19 : vector<1x1x32xf32> to vector<1x32xf32>
    %21 = vector.broadcast %20 : vector<1x32xf32> to vector<512x32xf32>
    %22 = arith.addf %18, %21 : vector<512x32xf32>
    %23 = arith.mulf %15, %22 : vector<512x32xf32>
    %c1_15 = arith.constant 1 : index
    %24 = memref.load %arg4[%c1_15] : memref<3xf32, #tpu.memory_space<smem>>
    %cst_16 = arith.constant 0.000000e+00 : f32
    %25 = vector.broadcast %cst_16 : f32 to vector<512x32xf32>
    %26 = arith.cmpf oge, %23, %25 : vector<512x32xf32>
    %27 = vector.broadcast %24 : f32 to vector<512x32xf32>
    %28 = arith.mulf %27, %23 : vector<512x32xf32>
    %29 = arith.select %26, %23, %28 : vector<512x32xi1>, vector<512x32xf32>
    %30 = arith.addf %29, %15 : vector<512x32xf32>
    %c2 = arith.constant 2 : index
    %c0_17 = arith.constant 0 : index
    %c0_18 = arith.constant 0 : index
    %31 = vector.load %arg2[%c2, %c0_17, %c0_18] : memref<3x32x32xf32, #tpu.memory_space<vmem>>, vector<1x32x32xf32>
    %32 = vector.shape_cast %31 : vector<1x32x32xf32> to vector<32x32xf32>
    %cst_19 = arith.constant dense<0.000000e+00> : vector<512x32xf32>
    %33 = tpu.matmul %30, %32, %cst_19 {dimension_numbers = #tpu.dot_dimension_numbers<[1], [0], [0], [1], [0, 0, 1, 1], [], []>} : vector<512x32xf32>, vector<32x32xf32>, vector<512x32xf32> -> vector<512x32xf32>
    %c2_20 = arith.constant 2 : index
    %c0_21 = arith.constant 0 : index
    %c0_22 = arith.constant 0 : index
    %34 = vector.load %arg3[%c2_20, %c0_21, %c0_22] : memref<3x1x32xf32, #tpu.memory_space<vmem>>, vector<1x1x32xf32>
    %35 = vector.shape_cast %34 : vector<1x1x32xf32> to vector<1x32xf32>
    %36 = vector.broadcast %35 : vector<1x32xf32> to vector<512x32xf32>
    %37 = arith.addf %33, %36 : vector<512x32xf32>
    %38 = arith.mulf %30, %37 : vector<512x32xf32>
    %c2_23 = arith.constant 2 : index
    %39 = memref.load %arg4[%c2_23] : memref<3xf32, #tpu.memory_space<smem>>
    %cst_24 = arith.constant 0.000000e+00 : f32
    %40 = vector.broadcast %cst_24 : f32 to vector<512x32xf32>
    %41 = arith.cmpf oge, %38, %40 : vector<512x32xf32>
    %42 = vector.broadcast %39 : f32 to vector<512x32xf32>
    %43 = arith.mulf %42, %38 : vector<512x32xf32>
    %44 = arith.select %41, %38, %43 : vector<512x32xi1>, vector<512x32xf32>
    %45 = arith.addf %44, %30 : vector<512x32xf32>
    %c0_25 = arith.constant 0 : index
    %c0_26 = arith.constant 0 : index
    %46 = vector.load %arg5[%c0_25, %c0_26] : memref<1x32xf32, #tpu.memory_space<vmem>>, vector<1x32xf32>
    %47 = vector.broadcast %46 : vector<1x32xf32> to vector<512x32xf32>
    %48 = arith.mulf %45, %47 : vector<512x32xf32>
    %cst_27 = arith.constant dense<0.000000e+00> : vector<512xf32>
    %49 = vector.multi_reduction <add>, %48, %cst_27 [1] : vector<512x32xf32> to vector<512xf32>
    %50 = vector.shape_cast %49 : vector<512xf32> to vector<512x1xf32>
    %c0_28 = arith.constant 0 : index
    %51 = memref.load %arg6[%c0_28] : memref<1xf32, #tpu.memory_space<smem>>
    %52 = vector.broadcast %51 : f32 to vector<512x1xf32>
    %53 = arith.addf %50, %52 : vector<512x1xf32>
    %54 = vector.shape_cast %53 : vector<512x1xf32> to vector<512x1xf32>
    %55 = vector.broadcast %54 : vector<512x1xf32> to vector<512x128xf32>
    %c0_29 = arith.constant 0 : index
    %c0_30 = arith.constant 0 : index
    %56 = vector.load %arg7[%c0_29, %c0_30] : memref<512x128xf32, #tpu.memory_space<vmem>>, vector<512x128xf32>
    tpu.vector_store %arg7[%c0_29, %c0_30], %55 {strides = array<i32>} : memref<512x128xf32, #tpu.memory_space<vmem>>, vector<512x128xf32>,
    return
  }
  func.func @transform_0(%arg0: i32) -> (i32, i32) {
    %c0_i32 = arith.constant 0 : i32
    %c0_i32_0 = arith.constant 0 : i32
    return %arg0, %c0_i32 : i32, i32
  }
  func.func @transform_1(%arg0: i32) -> (i32, i32, i32) {
    %c0_i32 = arith.constant 0 : i32
    %c0_i32_0 = arith.constant 0 : i32
    %c0_i32_1 = arith.constant 0 : i32
    %c0_i32_2 = arith.constant 0 : i32
    return %c0_i32, %c0_i32_0, %c0_i32_1 : i32, i32, i32
  }
  func.func @transform_2(%arg0: i32) -> (i32, i32, i32) {
    %c0_i32 = arith.constant 0 : i32
    %c0_i32_0 = arith.constant 0 : i32
    %c0_i32_1 = arith.constant 0 : i32
    %c0_i32_2 = arith.constant 0 : i32
    return %c0_i32, %c0_i32_0, %c0_i32_1 : i32, i32, i32
  }
  func.func @transform_3(%arg0: i32) -> i32 {
    %c0_i32 = arith.constant 0 : i32
    %c0_i32_0 = arith.constant 0 : i32
    return %c0_i32 : i32
  }
  func.func @transform_4(%arg0: i32) -> (i32, i32) {
    %c0_i32 = arith.constant 0 : i32
    %c0_i32_0 = arith.constant 0 : i32
    %c0_i32_1 = arith.constant 0 : i32
    return %c0_i32, %c0_i32_0 : i32, i32
  }
  func.func @transform_5(%arg0: i32) -> i32 {
    %c0_i32 = arith.constant 0 : i32
    %c0_i32_0 = arith.constant 0 : i32
    return %c0_i32 : i32
  }
  func.func @transform_6(%arg0: i32) -> (i32, i32) {
    %c0_i32 = arith.constant 0 : i32
    %c0_i32_0 = arith.constant 0 : i32
    return %arg0, %c0_i32 : i32, i32
  }
}

</mosaic_0001>

<bundles_post_ra>
// kernel: tpu_custom_call.1
= control target key start
LH: loop header
LB: loop body
LE: loop exit
PB: predicated region body
PF: predicated region fallthrough
CT: control target
= control target key end

     0   :  { %s6696_s0 = inlined_call_operand.vmem [shape: f32[1024,32], index: 0, kind: input, shape index: {}]   ;;  %s6697_s1 = inlined_call_operand.vmem [shape: f32[3,32,32], index: 1, kind: input, shape index: {}]   ;;  %s6698_s2 = inlined_call_operand.vmem [shape: f32[3,1,32], index: 2, kind: input, shape index: {}]   ;;  %s6699_s3 = inlined_call_operand.vmem [shape: f32[3], index: 3, kind: input, shape index: {}]   ;;  %s6700_s4 = inlined_call_operand.vmem [shape: f32[1,32], index: 4, kind: input, shape index: {}]   ;;  %s6701_s5 = inlined_call_operand.<no memory space> [shape: f32[1], index: 5, kind: input, shape index: {}]   ;;  %s6702_s6 = inlined_call_operand.hbm [shape: f32[1024,128], index: 6, kind: output, shape index: {}]  }
   0x1   :  { %11 = sst [smem:[#allocation2]] %s6701_s5 }
   0x2   :  { %12 = vsyncpa [#allocation5], 0 }
   0x3   :  { %13 = vsyncpa [#allocation4], 0 }
   0x4   :  { %15 = vsyncpa [#allocation4 + $0x1], 0  ;;  %s4503_s23 = smov 0   ;;  %s4505_s24 = smov 0  }
   0x5   :  { %s4507_s25 = smov 0   ;;  %s4509_s26 = smov 0  }
   0x6 LB: > { %s4524_s5 = sadd.s32 4294967295, %s4459_s26   ;;  %s3548_s27 = sadd.s32 4294967294, %s4459_s26   ;;  %s4459_s26 = sphi %s4509_s26, %s6996_s26   ;;  %s4455_s25 = sphi %s4507_s25, %s6995_s25   ;;  %s4451_s24 = sphi %s4505_s24, %s6994_s24   ;;  %s4447_s23 = sphi %s4503_s23, %s6993_s23  }
   0x7   : > { %s4528_s28 = sadd.s32 1, %s4459_s26   ;;  %s159_s29 = sadd.s32 1, %s4455_s25 }
   0x8   : > { %s156_s30 = ssub.s32 %s4459_s26, %s4528_s28  ;;  %p169_p0 = scmp.ne.s32.totalorder %s4455_s25, %s4451_s24 }
   0x9   : > { %p157_p1 = scmp.eq.s32.totalorder %s156_s30, 0  ;;  %p170_p2 = scmp.eq.s32.totalorder %s4524_s5, 1 }
   0xa   : > { %p175_p3 = scmp.ne.s32.totalorder %s4451_s24, %s4447_s23  ;;  %p176_p4 = scmp.eq.s32.totalorder %s3548_s27, 1 }
   0xb   : > { %s4539_s7 = scalar_select %p157_p1, %s4455_s25, %s159_s29  }
   0xc   : > { %p4541_p5 = por %p170_p2, %p169_p0  ;;  %p4545_p6 = por %p176_p4, %p175_p3 }
   0xd   : > { %p3549_p7 = scmp.ge.s32.totalorder %s4459_s26, 1  ;;  %p183_p8 = scmp.lt.s32.totalorder %s4459_s26, 3 }
   0xe   : > { %p4329_p9 = scmp.eq.s32.totalorder %s4524_s5, 0  ;;  %s202_s13 = sshll.u32 %s6699_s3, 4  ;;  %s203_s13 = int_to_ptr.vmem [resolvable:$true] %s202_s13 }
   0xf   : > { %p4552_p10 = pnand %p3549_p7, %p183_p8  ;;  %s4378_s14 = scalar_lea.vmem %s203_s13, 16 }
  0x10   : > { %p4379_p13 = scmp.ne.s32.totalorder %s203_s13, %s4378_s14  ;;  %p4386_p3 = scmp.lt.s32.totalorder %s203_s13, %s203_s13 }
  0x11   : > { %p4321_p11 = pneg %p4552_p10  ;;  %p4387_p4 = scmp.lt.s32.totalorder %s4378_s14, %s4378_s14 }
  0x13   : > { %p4322_p12 = pnand %p4329_p9, %p4321_p11  ;;  %p4388_p7 = por %p4387_p4, %p4386_p3 }
  0x15   : > { %p4380_p0 = pneg %p4322_p12 }
  0x17   : > { %p4381_p1 = pnand %p4380_p0, %p4379_p13 }
  0x19   : > { %p4382_p2 = pneg %p4381_p1 }
  0x1b   : > { %p4389_p8 = pnand %p4388_p7, %p4382_p2 }
  0x1d   : > { %4392 = shalt.err (!%p4389_p8)
}
  0x1e   : > { %s4461_s15 = smov [#allocation3]   ;;  %230 = sbr.rel (%p4552_p10) target bundleno = 1008 (0x3f0), region = 44 }
  0x1f   : > { %4324 = dma.vmem_to_smem (!%p4322_p12), %s203_s13, 16, %s4461_s15, [#allocation5]  }
  0x25   : > { %4438 = dma.done.wait (%p4329_p9), [#allocation5], 16  }
  0x26   : > { %4440 = vsyncadd (%p4329_p9), [#allocation5], 4294967280 }
  0x27   : > { %236 = sfence }
  0x28   : > { %v332_v0 = vld [vmem:[%s6697_s1] sm:$0xff]  ;;  %v333_v1 = vld [vmem:[%s6697_s1 + $0x8] sm:$0xff]  ;;  %v334_v2 = vld [vmem:[%s6697_s1 + $0x10] sm:$0xff]  ;;  %s3555_s22 = sshll.u32 %s4524_s5, 6  ;;  %vm343_vm0 = vcmask 261120   ;;  %s985_s21 = sld [smem:[#allocation3]] }
  0x29   : > { %v4287_v3 = vpack.c.bf16 %v333_v1, %v332_v0  ;;  %v335_v4 = vld [vmem:[%s6697_s1 + $0x18] sm:$0xff]  ;;  %p262_p9 = scmp.lt.s32.totalorder %s3555_s22, 127  ;;  %v3622_v6 = vld [vmem:[%s6697_s1 + $0x20] sm:$0xff]  ;;  %v3623_v7 = vld [vmem:[%s6697_s1 + $0x28] sm:$0xff]  ;;  %s3692_s17 = sld [smem:[#allocation3 + $0x1]] }
  0x2a   : > { %v4291_v5 = vpack.c.bf16 %v335_v4, %v334_v2  ;;  %v4295_v8 = vpack.c.bf16 %v3623_v7, %v3622_v6  ;;  %v3624_v14 = vld [vmem:[%s6697_s1 + $0x30] sm:$0xff]  ;;  %v3625_v15 = vld [vmem:[%s6697_s1 + $0x38] sm:$0xff]  ;;  %s3330_s12 = sld [smem:[#allocation2]] }
  0x2b   : > { %4288 = vmatprep.subr.bf16.mxu0 %v4287_v3  ;;  %s6998_s22 = smov (!%p262_p9, %s3555_s22), 127  ;;  %4311 = vmatprep.subr.bf16.mxu1 %v4287_v3  ;;  %v4299_v21 = vpack.c.bf16 %v3625_v15, %v3624_v14 }
  0x2c   : > { %4290 = vmatpush3.bf16.msra.mxu0 %v4287_v3  ;;  %4313 = vmatpush3.bf16.msra.mxu1 %v4287_v3  ;;  %s3556_s13 = sshll.u32 %s6998_s22, 3  ;;  %s4462_s22 = smov [#allocation6]  }
  0x2d   : > { %4292 = vmatprep.subr.bf16.mxu0 %v4291_v5  ;;  %4312 = vmatprep.subr.bf16.mxu1 %v4291_v5  ;;  %s4591_s16 = scalar_lea.vmem %s6696_s0, %s3556_s13  ;;  %s258_s13 = sand.u32 1, %s4451_s24  }
  0x2e   : > { %v4594_v9 = vld [vmem:[%s4591_s16] sm:$0xff]  ;;  %v4599_v10 = vld [vmem:[%s4591_s16 + $0x8] sm:$0xff]  ;;  %v4602_v11 = vld [vmem:[%s4591_s16 + $0x10] sm:$0xff]  ;;  %s3554_s14 = sshll.u32 %s258_s13, 9  ;;  %s4397_s27 = sshll.u32 %s4462_s22, 4  ;;  %s4398_s27 = int_to_ptr.vmem [resolvable:$false] %s4397_s27 }
  0x2f   : > { %3983 = vmatprep.mubr.msk.f32.mxu0 %vm343_vm0, %v4594_v9  ;;  %v4609_v12 = vld [vmem:[%s4591_s16 + $0x18] sm:$0xff]  ;;  %v4612_v13 = vld [vmem:[%s4591_s16 + $0x20] sm:$0xff]  ;;  %v4625_v16 = vld [vmem:[%s4591_s16 + $0x28] sm:$0xff]  ;;  %s6515_s15 = scalar_lea.vmem [#allocation6], %s3554_s14  ;;  %s4399_s29 = scalar_lea.vmem %s4398_s27, 16384 }
  0x30   : > { %4294 = vmatpush3.bf16.msra.mxu0 %v4291_v5  ;;  %4314 = vmatpush3.bf16.msra.mxu1 %v4291_v5  ;;  %v4628_v17 = vld [vmem:[%s4591_s16 + $0x30] sm:$0xff]  ;;  %v4631_v18 = vld [vmem:[%s4591_s16 + $0x100] sm:$0xff]  ;;  %v4636_v19 = vld [vmem:[%s4591_s16 + $0x108] sm:$0xff]  ;;  %s3474_s18 = sshll.u32 %s6515_s15, 4  ;;  %s6648_s18 = int_to_ptr.vmem [resolvable:$true] %s3474_s18 }
  0x31   : > { %4296 = vmatprep.subr.bf16.mxu1 %v4295_v8  ;;  %4031 = vmatprep.mubr.msk.f32.mxu1 %vm343_vm0, %v4631_v18  ;;  %v4639_v20 = vld [vmem:[%s4591_s16 + $0x110] sm:$0xff]  ;;  %v4648_v22 = vld [vmem:[%s4591_s16 + $0x38] sm:$0xff]  ;;  %v4656_v24 = vld [vmem:[%s4591_s16 + $0x40] sm:$0xff]  ;;  %p4400_p13 = scmp.lt.s32.totalorder %s6648_s18, %s4398_s27 }
  0x32   : > { %v4653_v23 = vld [vmem:[%s4591_s16 + $0x118] sm:$0xff]  ;;  %v4659_v25 = vld [vmem:[%s4591_s16 + $0x120] sm:$0xff]  ;;  %v4668_v26 = vld [vmem:[%s4591_s16 + $0x48] sm:$0xff] }
  0x33   : > { %3984 = vmatmul.mubr.msk.f32.vlgmr.msra.gmra.mrb[0].mxu0 %vm343_vm0, %v4599_v10  ;;  %4032 = vmatmul.mubr.msk.f32.vlgmr.msra.gmra.mrb[0].mxu1 %vm343_vm0, %v4636_v19  ;;  %v4673_v27 = vld [vmem:[%s4591_s16 + $0x128] sm:$0xff]  ;;  %v4676_v28 = vld [vmem:[%s4591_s16 + $0x50] sm:$0xff]  ;;  %v4688_v30 = vld [vmem:[%s4591_s16 + $0x58] sm:$0xff] }
  0x34   : > { %3986 = vmatprep.mubr.msk.f32.mxu0 %vm343_vm0, %v4602_v11  ;;  %4034 = vmatprep.mubr.msk.f32.mxu1 %vm343_vm0, %v4639_v20  ;;  %v4679_v29 = vld [vmem:[%s4591_s16 + $0x130] sm:$0xff]  ;;  %v4693_v31 = vld [vmem:[%s4591_s16 + $0x138] sm:$0xff]  ;;  %v4696_v32 = vld [vmem:[%s4591_s16 + $0x60] sm:$0xff] }
  0x35   : > { %4298 = vmatpush3.bf16.msra.mxu1 %v4295_v8  ;;  %v4699_v33 = vld [vmem:[%s4591_s16 + $0x140] sm:$0xff]  ;;  %v4708_v34 = vld [vmem:[%s4591_s16 + $0x68] sm:$0xff]  ;;  %v4716_v36 = vld [vmem:[%s4591_s16 + $0x70] sm:$0xff] }
  0x36   : > { %4300 = vmatprep.subr.bf16.mxu1 %v4299_v21  ;;  %v4713_v35 = vld [vmem:[%s4591_s16 + $0x148] sm:$0xff]  ;;  %v4719_v37 = vld [vmem:[%s4591_s16 + $0x150] sm:$0xff]  ;;  %v4728_v38 = vld [vmem:[%s4591_s16 + $0x78] sm:$0xff] }
  0x37   : > { %3987 = vmatmul.mubr.msk.f32.gmra.mrb[2].mxu0 %vm343_vm0, %v4609_v12  ;;  %4035 = vmatmul.mubr.msk.f32.gmra.mrb[2].mxu1 %vm343_vm0, %v4653_v23  ;;  %v4733_v39 = vld [vmem:[%s4591_s16 + $0x158] sm:$0xff]  ;;  %v4736_v40 = vld [vmem:[%s4591_s16 + $0x80] sm:$0xff]  ;;  %v4748_v42 = vld [vmem:[%s4591_s16 + $0x88] sm:$0xff] }
  0x38   : > { %3989 = vmatprep.mubr.msk.f32.mxu0 %vm343_vm0, %v4612_v13  ;;  %4037 = vmatprep.mubr.msk.f32.mxu1 %vm343_vm0, %v4659_v25  ;;  %6845 = vst [vmem:[#allocation9_spill] sm:$0xff] %v4733_v39  ;;  %v4739_v41 = vld [vmem:[%s4591_s16 + $0x160] sm:$0xff]  ;;  %v4753_v43 = vld [vmem:[%s4591_s16 + $0x168] sm:$0xff]  ;;  %v4756_v44 = vld [vmem:[%s4591_s16 + $0x90] sm:$0xff] }
  0x39   : > { %4302 = vmatpush3.bf16.msra.mxu1 %v4299_v21  ;;  %6846 = vst [vmem:[#allocation10_spill] sm:$0xff] %v4739_v41  ;;  %6847 = vst [vmem:[#allocation11_spill] sm:$0xff] %v4753_v43  ;;  %v4759_v45 = vld [vmem:[%s4591_s16 + $0x170] sm:$0xff]  ;;  %v4768_v46 = vld [vmem:[%s4591_s16 + $0x98] sm:$0xff] }
  0x3a   : > { %6848 = vst [vmem:[#allocation12_spill] sm:$0xff] %v4759_v45  ;;  %v4773_v47 = vld [vmem:[%s4591_s16 + $0x178] sm:$0xff]  ;;  %v4776_v48 = vld [vmem:[%s4591_s16 + $0xa0] sm:$0xff]  ;;  %v4788_v50 = vld [vmem:[%s4591_s16 + $0xa8] sm:$0xff] }
  0x3b   : > { %3990 = vmatmul.mubr.msk.f32.gmra.mrb[4].mxu0 %vm343_vm0, %v4625_v16  ;;  %4038 = vmatmul.mubr.msk.f32.gmra.mrb[4].mxu1 %vm343_vm0, %v4673_v27  ;;  %6849 = vst [vmem:[#allocation13_spill] sm:$0xff] %v4773_v47  ;;  %v4779_v49 = vld [vmem:[%s4591_s16 + $0x180] sm:$0xff]  ;;  %v4793_v51 = vld [vmem:[%s4591_s16 + $0x188] sm:$0xff]  ;;  %v4796_v52 = vld [vmem:[%s4591_s16 + $0xb0] sm:$0xff] }
  0x3c   : > { %3992 = vmatprep.mubr.msk.f32.mxu0 %vm343_vm0, %v4628_v17  ;;  %4040 = vmatprep.mubr.msk.f32.mxu1 %vm343_vm0, %v4679_v29  ;;  %6850 = vst [vmem:[#allocation14_spill] sm:$0xff] %v4779_v49  ;;  %6851 = vst [vmem:[#allocation15_spill] sm:$0xff] %v4793_v51  ;;  %v4799_v53 = vld [vmem:[%s4591_s16 + $0x190] sm:$0xff]  ;;  %v4808_v54 = vld [vmem:[%s4591_s16 + $0xb8] sm:$0xff] }
  0x3d   : > { %6852 = vst [vmem:[#allocation16_spill] sm:$0xff] %v4799_v53  ;;  %v4813_v55 = vld [vmem:[%s4591_s16 + $0x198] sm:$0xff]  ;;  %v4816_v56 = vld [vmem:[%s4591_s16 + $0xc0] sm:$0xff]  ;;  %v4828_v58 = vld [vmem:[%s4591_s16 + $0xc8] sm:$0xff] }
  0x3e   : > { %6853 = vst [vmem:[#allocation17_spill] sm:$0xff] %v4813_v55  ;;  %v4819_v57 = vld [vmem:[%s4591_s16 + $0x1a0] sm:$0xff]  ;;  %v4833_v59 = vld [vmem:[%s4591_s16 + $0x1a8] sm:$0xff]  ;;  %v4836_v60 = vld [vmem:[%s4591_s16 + $0xd0] sm:$0xff] }
  0x3f   : > { %3993 = vmatmul.mubr.msk.f32.gmra.mrb[6].mxu0 %vm343_vm0, %v4648_v22  ;;  %4041 = vmatmul.mubr.msk.f32.gmra.mrb[6].mxu1 %vm343_vm0, %v4693_v31  ;;  %6854 = vst [vmem:[#allocation18_spill] sm:$0xff] %v4819_v57  ;;  %6855 = vst [vmem:[#allocation19_spill] sm:$0xff] %v4833_v59  ;;  %v4839_v61 = vld [vmem:[%s4591_s16 + $0x1b0] sm:$0xff]  ;;  %v4848_v62 = vld [vmem:[%s4591_s16 + $0xd8] sm:$0xff] }
  0x40   : > { %3995 = vmatprep.mubr.msk.f32.mxu0 %vm343_vm0, %v4656_v24  ;;  %4043 = vmatprep.mubr.msk.f32.mxu1 %vm343_vm0, %v4699_v33  ;;  %6856 = vst [vmem:[#allocation20_spill] sm:$0xff] %v4839_v61  ;;  %v4853_v63 = vld [vmem:[%s4591_s16 + $0x1b8] sm:$0xff]  ;;  %v4856_v0 = vld [vmem:[%s4591_s16 + $0xe0] sm:$0xff]  ;;  %v4868_v2 = vld [vmem:[%s4591_s16 + $0xe8] sm:$0xff] }
  0x41   : > { %6857 = vst [vmem:[#allocation21_spill] sm:$0xff] %v4853_v63  ;;  %v4859_v1 = vld [vmem:[%s4591_s16 + $0x1c0] sm:$0xff]  ;;  %v4873_v3 = vld [vmem:[%s4591_s16 + $0x1c8] sm:$0xff]  ;;  %v4876_v4 = vld [vmem:[%s4591_s16 + $0xf0] sm:$0xff] }
  0x42   : > { %6858 = vst [vmem:[#allocation22_spill] sm:$0xff] %v4859_v1  ;;  %6859 = vst [vmem:[#allocation23_spill] sm:$0xff] %v4873_v3  ;;  %v4879_v5 = vld [vmem:[%s4591_s16 + $0x1d0] sm:$0xff]  ;;  %v4888_v6 = vld [vmem:[%s4591_s16 + $0xf8] sm:$0xff] }
  0x43   : > { %3996 = vmatmul.mubr.msk.f32.gmra.mrb[8].mxu0 %vm343_vm0, %v4668_v26  ;;  %4044 = vmatmul.mubr.msk.f32.gmra.mrb[8].mxu1 %vm343_vm0, %v4713_v35  ;;  %6860 = vst [vmem:[#allocation24_spill] sm:$0xff] %v4879_v5  ;;  %v4893_v7 = vld [vmem:[%s4591_s16 + $0x1d8] sm:$0xff]  ;;  %v4896_v8 = vld [vmem:[%s4591_s16 + $0x1e0] sm:$0xff]  ;;  %v4905_v14 = vld [vmem:[%s4591_s16 + $0x1e8] sm:$0xff] }
  0x44   : > { %3998 = vmatprep.mubr.msk.f32.mxu0 %vm343_vm0, %v4676_v28  ;;  %4046 = vmatprep.mubr.msk.f32.mxu1 %vm343_vm0, %v4719_v37  ;;  %6861 = vst [vmem:[#allocation25_spill] sm:$0xff] %v4893_v7  ;;  %6862 = vst [vmem:[#allocation26_spill] sm:$0xff] %v4896_v8  ;;  %v4908_v15 = vld [vmem:[%s4591_s16 + $0x1f0] sm:$0xff]  ;;  %v4915_v21 = vld [vmem:[%s4591_s16 + $0x1f8] sm:$0xff] }
  0x45   : > { %6863 = vst [vmem:[#allocation27_spill] sm:$0xff] %v4905_v14  ;;  %6864 = vst [vmem:[#allocation28_spill] sm:$0xff] %v4908_v15 }
  0x46   : > { %6865 = vst [vmem:[#allocation29_spill] sm:$0xff] %v4915_v21 }
  0x47   : > { %3999 = vmatmul.mubr.msk.f32.gmra.mrb[10].mxu0 %vm343_vm0, %v4688_v30  ;;  %4047 = vmatmul.mubr.msk.f32.gmra.mrb[10].mxu1 %vm343_vm0, %v4733_v39 }
  0x48   : > { %4001 = vmatprep.mubr.msk.f32.mxu0 %vm343_vm0, %v4696_v32  ;;  %4049 = vmatprep.mubr.msk.f32.mxu1 %vm343_vm0, %v4739_v41 }
  0x4b   : > { %4002 = vmatmul.mubr.msk.f32.gmra.mrb[12].mxu0 %vm343_vm0, %v4708_v34  ;;  %4050 = vmatmul.mubr.msk.f32.gmra.mrb[12].mxu1 %vm343_vm0, %v4753_v43 }
  0x4c   : > { %4004 = vmatprep.mubr.msk.f32.mxu0 %vm343_vm0, %v4716_v36  ;;  %4052 = vmatprep.mubr.msk.f32.mxu1 %vm343_vm0, %v4759_v45 }
  0x4f   : > { %4005 = vmatmul.mubr.msk.f32.gmra.mrb[14].mxu0 %vm343_vm0, %v4728_v38  ;;  %4053 = vmatmul.mubr.msk.f32.gmra.mrb[14].mxu1 %vm343_vm0, %v4773_v47  ;;  %v3693_v47 = vld [vmem:[%s6697_s1 + $0x40] sm:$0xff] }
  0x50   : > { %4007 = vmatprep.mubr.msk.f32.mxu0 %vm343_vm0, %v4736_v40  ;;  %4055 = vmatprep.mubr.msk.f32.mxu1 %vm343_vm0, %v4779_v49 }
  0x53   : > { %4008 = vmatmul.mubr.msk.f32.gmra.mrb[16].mxu0 %vm343_vm0, %v4748_v42  ;;  %4056 = vmatmul.mubr.msk.f32.gmra.mrb[16].mxu1 %vm343_vm0, %v4793_v51 }
  0x54   : > { %4010 = vmatprep.mubr.msk.f32.mxu0 %vm343_vm0, %v4756_v44  ;;  %4058 = vmatprep.mubr.msk.f32.mxu1 %vm343_vm0, %v4799_v53 }
  0x57   : > { %4011 = vmatmul.mubr.msk.f32.gmra.mrb[18].mxu0 %vm343_vm0, %v4768_v46  ;;  %4059 = vmatmul.mubr.msk.f32.gmra.mrb[18].mxu1 %vm343_vm0, %v4813_v55 }
  0x58   : > { %4013 = vmatprep.mubr.msk.f32.mxu0 %vm343_vm0, %v4776_v48  ;;  %4061 = vmatprep.mubr.msk.f32.mxu1 %vm343_vm0, %v4819_v57 }
  0x5b   : > { %4014 = vmatmul.mubr.msk.f32.gmra.mrb[20].mxu0 %vm343_vm0, %v4788_v50  ;;  %4062 = vmatmul.mubr.msk.f32.gmra.mrb[20].mxu1 %vm343_vm0, %v4833_v59 }
  0x5c   : > { %4016 = vmatprep.mubr.msk.f32.mxu0 %vm343_vm0, %v4796_v52  ;;  %4064 = vmatprep.mubr.msk.f32.mxu1 %vm343_vm0, %v4839_v61 }
  0x5f   : > { %4017 = vmatmul.mubr.msk.f32.gmra.mrb[22].mxu0 %vm343_vm0, %v4808_v54  ;;  %4065 = vmatmul.mubr.msk.f32.gmra.mrb[22].mxu1 %vm343_vm0, %v4853_v63 }
  0x60   : > { %4019 = vmatprep.mubr.msk.f32.mxu0 %vm343_vm0, %v4816_v56  ;;  %4067 = vmatprep.mubr.msk.f32.mxu1 %vm343_vm0, %v4859_v1  ;;  %v4925_v1 = vstv %s985_s21  ;;  %s4393_s21 = scalar_lea.vmem %s6648_s18, 8192 }
  0x61   : > { %p4394_p10 = scmp.ne.s32.totalorder %s6648_s18, %s4393_s21  ;;  %p4401_p0 = scmp.lt.s32.totalorder %s4399_s29, %s4393_s21 }
  0x63   : > { %4020 = vmatmul.mubr.msk.f32.gmra.mrb[24].mxu0 %vm343_vm0, %v4828_v58  ;;  %4068 = vmatmul.mubr.msk.f32.gmra.mrb[24].mxu1 %vm343_vm0, %v4873_v3  ;;  %p4395_p11 = pnand %p4394_p10, %p4541_p5  ;;  %p4402_p1 = por %p4401_p0, %p4400_p13 }
  0x64   : > { %4022 = vmatprep.mubr.msk.f32.mxu0 %vm343_vm0, %v4836_v60  ;;  %4070 = vmatprep.mubr.msk.f32.mxu1 %vm343_vm0, %v4879_v5 }
  0x65   : > { %p4396_p12 = pneg %p4395_p11 }
  0x67   : > { %4023 = vmatmul.mubr.msk.f32.gmra.mrb[26].mxu0 %vm343_vm0, %v4848_v62  ;;  %4071 = vmatmul.mubr.msk.f32.gmra.mrb[26].mxu1 %vm343_vm0, %v4893_v7  ;;  %p4403_p2 = pnand %p4402_p1, %p4396_p12 }
  0x68   : > { %4025 = vmatprep.mubr.msk.f32.mxu0 %vm343_vm0, %v4856_v0  ;;  %4073 = vmatprep.mubr.msk.f32.mxu1 %vm343_vm0, %v4896_v8  ;;  %v4922_v8 = vld [vmem:[%s6698_s2] ss:$0 sm:$0xff] }
  0x6b   : > { %4026 = vmatmul.mubr.msk.f32.gmra.mrb[28].mxu0 %vm343_vm0, %v4868_v2  ;;  %4074 = vmatmul.mubr.msk.f32.gmra.mrb[28].mxu1 %vm343_vm0, %v4905_v14 }
  0x6c   : > { %4028 = vmatprep.mubr.msk.f32.mxu0 %vm343_vm0, %v4876_v4  ;;  %4076 = vmatprep.mubr.msk.f32.mxu1 %vm343_vm0, %v4908_v15 }
  0x6f   : > { %4029 = vmatmul.mubr.msk.f32.gmra.mrb[30].mxu0 %vm343_vm0, %v4888_v6  ;;  %4077 = vmatmul.mubr.msk.f32.gmra.mrb[30].mxu1 %vm343_vm0, %v4915_v21 }
 0x106   : > { %v3985_v7 = vpop.f32.mrb[0].mxu0 }
 0x107   : > { %v608_v5 = vadd.f32 %v3985_v7, %v4922_v8  ;;  %v602_v3 = vpop.f32.mrb[1].mxu0 }
 0x108   : > { %v603_v14 = vadd.f32 %v4922_v8, %v602_v3 }
 0x109   : > { %v922_v15 = vmul.f32 %v608_v5, %v4599_v10 }
 0x10a   : > { %v921_v63 = vmul.f32 %v603_v14, %v4594_v9  ;;  %v3988_v61 = vpop.f32.mrb[2].mxu0  ;;  %v4936_v14 = vpop.f32.mrb[0].mxu1 }
 0x10b   : > { %vm987_vm1 = vcmp.ge.f32.partialorder %v922_v15, 0.0  ;;  %v1052_v21 = vmul.f32 %v4925_v1, %v922_v15  ;;  %v618_v59 = vadd.f32 %v3988_v61, %v4922_v8  ;;  %v612_v57 = vpop.f32.mrb[3].mxu0  ;;  %v3694_v61 = vld [vmem:[%s6697_s1 + $0x48] sm:$0xff] }
 0x10c   : > { %vm986_vm2 = vcmp.ge.f32.partialorder %v921_v63, 0.0  ;;  %v1051_v55 = vmul.f32 %v4925_v1, %v921_v63  ;;  %v613_v7 = vadd.f32 %v4922_v8, %v612_v57 }
 0x10d   : > { %v1116_v53 = vsel %vm987_vm1, %v922_v15, %v1052_v21  ;;  %v924_v51 = vmul.f32 %v618_v59, %v4609_v12 }
 0x10e   : > { %v1115_v3 = vsel %vm986_vm2, %v921_v63, %v1051_v55  ;;  %v923_v5 = vmul.f32 %v613_v7, %v4602_v11  ;;  %v3991_v49 = vpop.f32.mrb[4].mxu0  ;;  %v4949_v63 = vpop.f32.mrb[1].mxu1  ;;  %v4952_v21 = vadd.f32 %v1116_v53, %v4599_v10 }
 0x10f   : > { %vm989_vm3 = vcmp.ge.f32.partialorder %v924_v51, 0.0  ;;  %v1054_v57 = vmul.f32 %v4925_v1, %v924_v51  ;;  %v628_v15 = vadd.f32 %v3991_v49, %v4922_v8  ;;  %v622_v59 = vpop.f32.mrb[5].mxu0  ;;  %v4947_v55 = vadd.f32 %v1115_v3, %v4594_v9  ;;  %v4962_v10 = vpop.f32.mrb[2].mxu1 }
 0x110   : > { %vm988_vm4 = vcmp.ge.f32.partialorder %v923_v5, 0.0  ;;  %v1053_v7 = vmul.f32 %v4925_v1, %v923_v5  ;;  %v623_v45 = vadd.f32 %v4922_v8, %v622_v59  ;;  %v4303_v49 = vpack.c.bf16 %v3694_v61, %v3693_v47  ;;  %v4969_v59 = vpop.f32.mrb[3].mxu1 }
 0x111   : > { %6866 = vst [vmem:[#allocation30_spill] sm:$0xff] %v4947_v55  ;;  %v1118_v43 = vsel %vm989_vm3, %v924_v51, %v1054_v57  ;;  %v926_v41 = vmul.f32 %v628_v15, %v4625_v16  ;;  %4087 = vmatprep.mubr.msk.f32.mxu1 %vm343_vm0, %v4947_v55 }
 0x112   : > { %v1117_v39 = vsel %vm988_vm4, %v923_v5, %v1053_v7  ;;  %v925_v9 = vmul.f32 %v623_v45, %v4612_v13  ;;  %v3994_v3 = vpop.f32.mrb[6].mxu0  ;;  %4088 = vmatmul.mubr.msk.f32.vlgmr.msra.gmra.mrb[32].mxu1 %vm343_vm0, %v4952_v21  ;;  %4304 = vmatprep.subr.bf16.mxu0 %v4303_v49  ;;  %v4974_v5 = vadd.f32 %v1118_v43, %v4609_v12 }
 0x113   : > { %vm991_vm5 = vcmp.ge.f32.partialorder %v926_v41, 0.0  ;;  %v1056_v53 = vmul.f32 %v4925_v1, %v926_v41  ;;  %v638_v51 = vadd.f32 %v3994_v3, %v4922_v8  ;;  %v632_v57 = vpop.f32.mrb[7].mxu0  ;;  %v4967_v15 = vadd.f32 %v1117_v39, %v4602_v11  ;;  %4306 = vmatpush3.bf16.msra.mxu0 %v4303_v49 }
 0x114   : > { %vm990_vm6 = vcmp.ge.f32.partialorder %v925_v9, 0.0  ;;  %v1055_v45 = vmul.f32 %v4925_v1, %v925_v9  ;;  %v633_v47 = vadd.f32 %v4922_v8, %v632_v57  ;;  %6868 = vst [vmem:[#allocation32_spill] sm:$0xff] %v4974_v5  ;;  %v4985_v57 = vpop.f32.mrb[4].mxu1 }
 0x115   : > { %6867 = vst [vmem:[#allocation31_spill] sm:$0xff] %v4967_v15  ;;  %v1120_v61 = vsel %vm991_vm5, %v926_v41, %v1056_v53  ;;  %v928_v7 = vmul.f32 %v638_v51, %v4648_v22  ;;  %4090 = vmatprep.mubr.msk.f32.mxu1 %vm343_vm0, %v4967_v15 }
 0x116   : > { %v1119_v11 = vsel %vm990_vm6, %v925_v9, %v1055_v45  ;;  %v927_v39 = vmul.f32 %v633_v47, %v4628_v17  ;;  %v3997_v3 = vpop.f32.mrb[8].mxu0  ;;  %4091 = vmatmul.mubr.msk.f32.gmra.mrb[34].mxu1 %vm343_vm0, %v4974_v5  ;;  %v4983_v55 = vadd.f32 %v1120_v61, %v4625_v16  ;;  %v4992_v9 = vpop.f32.mrb[5].mxu1 }
 0x117   : > { %vm993_vm7 = vcmp.ge.f32.partialorder %v928_v7, 0.0  ;;  %v1058_v12 = vmul.f32 %v4925_v1, %v928_v7  ;;  %v648_v41 = vadd.f32 %v3997_v3, %v4922_v8  ;;  %v642_v43 = vpop.f32.mrb[9].mxu0  ;;  %v4990_v49 = vadd.f32 %v1119_v11, %v4612_v13  ;;  %v5005_v11 = vpop.f32.mrb[6].mxu1 }
 0x118   : > { %6869 = vst [vmem:[#allocation33_spill] sm:$0xff] %v4983_v55  ;;  %vm992_vm8 = vcmp.ge.f32.partialorder %v927_v39, 0.0  ;;  %v1057_v53 = vmul.f32 %v4925_v1, %v927_v39  ;;  %v643_v51 = vadd.f32 %v4922_v8, %v642_v43 }
 0x119   : > { %6870 = vst [vmem:[#allocation34_spill] sm:$0xff] %v4990_v49  ;;  %v1122_v16 = vsel %vm993_vm7, %v928_v7, %v1058_v12  ;;  %v930_v45 = vmul.f32 %v648_v41, %v4668_v26  ;;  %4093 = vmatprep.mubr.msk.f32.mxu1 %vm343_vm0, %v4990_v49 }
 0x11a   : > { %v1121_v47 = vsel %vm992_vm8, %v927_v39, %v1057_v53  ;;  %v929_v61 = vmul.f32 %v643_v51, %v4656_v24  ;;  %v4000_v3 = vpop.f32.mrb[10].mxu0  ;;  %4094 = vmatmul.mubr.msk.f32.gmra.mrb[36].mxu1 %vm343_vm0, %v4983_v55  ;;  %v5003_v13 = vadd.f32 %v1122_v16, %v4648_v22  ;;  %v5012_v39 = vpop.f32.mrb[7].mxu1 }
 0x11b   : > { %vm995_vm9 = vcmp.ge.f32.partialorder %v930_v45, 0.0  ;;  %v1060_v7 = vmul.f32 %v4925_v1, %v930_v45  ;;  %v658_v12 = vadd.f32 %v4000_v3, %v4922_v8  ;;  %v652_v41 = vpop.f32.mrb[11].mxu0  ;;  %v5010_v43 = vadd.f32 %v1121_v47, %v4628_v17  ;;  %v5025_v47 = vpop.f32.mrb[8].mxu1 }
 0x11c   : > { %6871 = vst [vmem:[#allocation35_spill] sm:$0xff] %v5003_v13  ;;  %vm994_vm10 = vcmp.ge.f32.partialorder %v929_v61, 0.0  ;;  %v1059_v53 = vmul.f32 %v4925_v1, %v929_v61  ;;  %v653_v51 = vadd.f32 %v4922_v8, %v652_v41 }
 0x11d   : > { %6872 = vst [vmem:[#allocation36_spill] sm:$0xff] %v5010_v43  ;;  %v1124_v22 = vsel %vm995_vm9, %v930_v45, %v1060_v7  ;;  %v932_v16 = vmul.f32 %v658_v12, %v4688_v30  ;;  %4096 = vmatprep.mubr.msk.f32.mxu1 %vm343_vm0, %v5010_v43 }
 0x11e   : > { %v1123_v49 = vsel %vm994_vm10, %v929_v61, %v1059_v53  ;;  %v931_v3 = vmul.f32 %v653_v51, %v4676_v28  ;;  %v4003_v55 = vpop.f32.mrb[12].mxu0  ;;  %4097 = vmatmul.mubr.msk.f32.gmra.mrb[38].mxu1 %vm343_vm0, %v5003_v13  ;;  %v5023_v17 = vadd.f32 %v1124_v22, %v4668_v26  ;;  %v5032_v61 = vpop.f32.mrb[9].mxu1 }
 0x11f   : > { %vm997_vm11 = vcmp.ge.f32.partialorder %v932_v16, 0.0  ;;  %v1062_v45 = vmul.f32 %v4925_v1, %v932_v16  ;;  %v668_v7 = vadd.f32 %v4003_v55, %v4922_v8  ;;  %v662_v12 = vpop.f32.mrb[13].mxu0  ;;  %v5030_v41 = vadd.f32 %v1123_v49, %v4656_v24  ;;  %v5045_v49 = vpop.f32.mrb[10].mxu1 }
 0x120   : > { %6873 = vst [vmem:[#allocation37_spill] sm:$0xff] %v5023_v17  ;;  %vm996_vm12 = vcmp.ge.f32.partialorder %v931_v3, 0.0  ;;  %v1061_v53 = vmul.f32 %v4925_v1, %v931_v3  ;;  %v663_v51 = vadd.f32 %v4922_v8, %v662_v12 }
 0x121   : > { %6874 = vst [vmem:[#allocation38_spill] sm:$0xff] %v5030_v41  ;;  %v1126_v26 = vsel %vm997_vm11, %v932_v16, %v1062_v45  ;;  %v934_v22 = vmul.f32 %v668_v7, %v4708_v34  ;;  %4099 = vmatprep.mubr.msk.f32.mxu1 %vm343_vm0, %v5030_v41 }
 0x122   : > { %v1125_v43 = vsel %vm996_vm12, %v931_v3, %v1061_v53  ;;  %v933_v55 = vmul.f32 %v663_v51, %v4696_v32  ;;  %v4006_v13 = vpop.f32.mrb[14].mxu0  ;;  %4100 = vmatmul.mubr.msk.f32.gmra.mrb[40].mxu1 %vm343_vm0, %v5023_v17  ;;  %v5043_v24 = vadd.f32 %v1126_v26, %v4688_v30  ;;  %v5052_v3 = vpop.f32.mrb[11].mxu1 }
 0x123   : > { %vm999_vm13 = vcmp.ge.f32.partialorder %v934_v22, 0.0  ;;  %v1064_v16 = vmul.f32 %v4925_v1, %v934_v22  ;;  %v678_v45 = vadd.f32 %v4006_v13, %v4922_v8  ;;  %v672_v7 = vpop.f32.mrb[15].mxu0  ;;  %v5050_v12 = vadd.f32 %v1125_v43, %v4676_v28  ;;  %v5065_v43 = vpop.f32.mrb[12].mxu1 }
 0x124   : > { %6875 = vst [vmem:[#allocation39_spill] sm:$0xff] %v5043_v24  ;;  %vm998_vm14 = vcmp.ge.f32.partialorder %v933_v55, 0.0  ;;  %v1063_v53 = vmul.f32 %v4925_v1, %v933_v55  ;;  %v673_v51 = vadd.f32 %v4922_v8, %v672_v7 }
 0x125   : > { %6876 = vst [vmem:[#allocation40_spill] sm:$0xff] %v5050_v12  ;;  %v1128_v30 = vsel %vm999_vm13, %v934_v22, %v1064_v16  ;;  %v936_v26 = vmul.f32 %v678_v45, %v4728_v38  ;;  %4102 = vmatprep.mubr.msk.f32.mxu1 %vm343_vm0, %v5050_v12 }
 0x126   : > { %v1127_v41 = vsel %vm998_vm14, %v933_v55, %v1063_v53  ;;  %v935_v13 = vmul.f32 %v673_v51, %v4716_v36  ;;  %v4009_v17 = vpop.f32.mrb[16].mxu0  ;;  %4103 = vmatmul.mubr.msk.f32.gmra.mrb[42].mxu1 %vm343_vm0, %v5043_v24  ;;  %v5063_v28 = vadd.f32 %v1128_v30, %v4708_v34  ;;  %v5072_v55 = vpop.f32.mrb[13].mxu1 }
 0x127   : > { %vm1001_vm15 = vcmp.ge.f32.partialorder %v936_v26, 0.0  ;;  %v1066_v22 = vmul.f32 %v4925_v1, %v936_v26  ;;  %v688_v16 = vadd.f32 %v4009_v17, %v4922_v8  ;;  %v682_v45 = vpop.f32.mrb[17].mxu0  ;;  %v5070_v7 = vadd.f32 %v1127_v41, %v4696_v32  ;;  %v5085_v41 = vpop.f32.mrb[14].mxu1 }
 0x128   : > { %6877 = vst [vmem:[#allocation41_spill] sm:$0xff] %v5063_v28  ;;  %vm1000_vm1 = vcmp.ge.f32.partialorder %v935_v13, 0.0  ;;  %v1065_v53 = vmul.f32 %v4925_v1, %v935_v13  ;;  %v683_v51 = vadd.f32 %v4922_v8, %v682_v45 }
 0x129   : > { %6878 = vst [vmem:[#allocation42_spill] sm:$0xff] %v5070_v7  ;;  %v1130_v34 = vsel %vm1001_vm15, %v936_v26, %v1066_v22  ;;  %v938_v30 = vmul.f32 %v688_v16, %v4748_v42  ;;  %4105 = vmatprep.mubr.msk.f32.mxu1 %vm343_vm0, %v5070_v7 }
 0x12a   : > { %v1129_v12 = vsel %vm1000_vm1, %v935_v13, %v1065_v53  ;;  %v937_v17 = vmul.f32 %v683_v51, %v4736_v40  ;;  %v4012_v24 = vpop.f32.mrb[18].mxu0  ;;  %4106 = vmatmul.mubr.msk.f32.gmra.mrb[44].mxu1 %vm343_vm0, %v5063_v28  ;;  %v5083_v32 = vadd.f32 %v1130_v34, %v4728_v38  ;;  %v5092_v13 = vpop.f32.mrb[15].mxu1 }
 0x12b   : > { %vm1003_vm2 = vcmp.ge.f32.partialorder %v938_v30, 0.0  ;;  %v1068_v26 = vmul.f32 %v4925_v1, %v938_v30  ;;  %v698_v22 = vadd.f32 %v4012_v24, %v4922_v8  ;;  %v692_v16 = vpop.f32.mrb[19].mxu0  ;;  %v5090_v45 = vadd.f32 %v1129_v12, %v4716_v36  ;;  %v5105_v12 = vpop.f32.mrb[16].mxu1 }
 0x12c   : > { %6879 = vst [vmem:[#allocation43_spill] sm:$0xff] %v5083_v32  ;;  %vm1002_vm3 = vcmp.ge.f32.partialorder %v937_v17, 0.0  ;;  %v1067_v53 = vmul.f32 %v4925_v1, %v937_v17  ;;  %v693_v51 = vadd.f32 %v4922_v8, %v692_v16 }
 0x12d   : > { %6880 = vst [vmem:[#allocation44_spill] sm:$0xff] %v5090_v45  ;;  %v1132_v38 = vsel %vm1003_vm2, %v938_v30, %v1068_v26  ;;  %v940_v34 = vmul.f32 %v698_v22, %v4768_v46  ;;  %4108 = vmatprep.mubr.msk.f32.mxu1 %vm343_vm0, %v5090_v45 }
 0x12e   : > { %v1131_v7 = vsel %vm1002_vm3, %v937_v17, %v1067_v53  ;;  %v939_v24 = vmul.f32 %v693_v51, %v4756_v44  ;;  %v4015_v28 = vpop.f32.mrb[20].mxu0  ;;  %4109 = vmatmul.mubr.msk.f32.gmra.mrb[46].mxu1 %vm343_vm0, %v5083_v32  ;;  %v5103_v36 = vadd.f32 %v1132_v38, %v4748_v42  ;;  %v5112_v17 = vpop.f32.mrb[17].mxu1 }
 0x12f   : > { %vm1005_vm4 = vcmp.ge.f32.partialorder %v940_v34, 0.0  ;;  %v1070_v30 = vmul.f32 %v4925_v1, %v940_v34  ;;  %v708_v26 = vadd.f32 %v4015_v28, %v4922_v8  ;;  %v702_v22 = vpop.f32.mrb[21].mxu0  ;;  %v5110_v16 = vadd.f32 %v1131_v7, %v4736_v40  ;;  %v5125_v7 = vpop.f32.mrb[18].mxu1 }
 0x130   : > { %6881 = vst [vmem:[#allocation45_spill] sm:$0xff] %v5103_v36  ;;  %vm1004_vm5 = vcmp.ge.f32.partialorder %v939_v24, 0.0  ;;  %v1069_v53 = vmul.f32 %v4925_v1, %v939_v24  ;;  %v703_v51 = vadd.f32 %v4922_v8, %v702_v22 }
 0x131   : > { %6882 = vst [vmem:[#allocation46_spill] sm:$0xff] %v5110_v16  ;;  %v1134_v42 = vsel %vm1005_vm4, %v940_v34, %v1070_v30  ;;  %v942_v38 = vmul.f32 %v708_v26, %v4788_v50  ;;  %4111 = vmatprep.mubr.msk.f32.mxu1 %vm343_vm0, %v5110_v16 }
 0x132   : > { %v1133_v45 = vsel %vm1004_vm5, %v939_v24, %v1069_v53  ;;  %v941_v28 = vmul.f32 %v703_v51, %v4776_v48  ;;  %v4018_v32 = vpop.f32.mrb[22].mxu0  ;;  %4112 = vmatmul.mubr.msk.f32.gmra.mrb[48].mxu1 %vm343_vm0, %v5103_v36  ;;  %v5123_v40 = vadd.f32 %v1134_v42, %v4768_v46  ;;  %v5132_v24 = vpop.f32.mrb[19].mxu1 }
 0x133   : > { %vm1007_vm6 = vcmp.ge.f32.partialorder %v942_v38, 0.0  ;;  %v1072_v34 = vmul.f32 %v4925_v1, %v942_v38  ;;  %v718_v30 = vadd.f32 %v4018_v32, %v4922_v8  ;;  %v712_v26 = vpop.f32.mrb[23].mxu0  ;;  %v5130_v22 = vadd.f32 %v1133_v45, %v4756_v44 }
 0x134   : > { %6883 = vst [vmem:[#allocation47_spill] sm:$0xff] %v5123_v40  ;;  %vm1006_vm7 = vcmp.ge.f32.partialorder %v941_v28, 0.0  ;;  %v1071_v53 = vmul.f32 %v4925_v1, %v941_v28  ;;  %v713_v51 = vadd.f32 %v4922_v8, %v712_v26  ;;  %v768_v32 = vadd.f32 %v4936_v14, %v4922_v8  ;;  %v5147_v26 = vpop.f32.mrb[20].mxu1 }
 0x135   : > { %6884 = vst [vmem:[#allocation48_spill] sm:$0xff] %v5130_v22  ;;  %v1136_v46 = vsel %vm1007_vm6, %v942_v38, %v1072_v34  ;;  %v944_v42 = vmul.f32 %v718_v30, %v4808_v54  ;;  %4114 = vmatprep.mubr.msk.f32.mxu1 %vm343_vm0, %v5130_v22 }
 0x136   : > { %v1135_v16 = vsel %vm1006_vm7, %v941_v28, %v1071_v53  ;;  %v943_v44 = vmul.f32 %v713_v51, %v4796_v52  ;;  %v4021_v45 = vpop.f32.mrb[24].mxu0  ;;  %4115 = vmatmul.mubr.msk.f32.gmra.mrb[50].mxu1 %vm343_vm0, %v5123_v40  ;;  %v5145_v36 = vadd.f32 %v1136_v46, %v4788_v50  ;;  %v5154_v28 = vpop.f32.mrb[21].mxu1  ;;  %v5162_v22 = vmul.f32 %v768_v32, %v4636_v19 }
 0x137   : > { %vm1009_vm8 = vcmp.ge.f32.partialorder %v944_v42, 0.0  ;;  %v1074_v38 = vmul.f32 %v4925_v1, %v944_v42  ;;  %v728_v34 = vadd.f32 %v4021_v45, %v4922_v8  ;;  %v722_v30 = vpop.f32.mrb[25].mxu0  ;;  %v5152_v14 = vadd.f32 %v1135_v16, %v4776_v48 }
 0x138   : > { %6885 = vst [vmem:[#allocation49_spill] sm:$0xff] %v5145_v36  ;;  %vm1008_vm9 = vcmp.ge.f32.partialorder %v943_v44, 0.0  ;;  %v1073_v53 = vmul.f32 %v4925_v1, %v943_v44  ;;  %v723_v51 = vadd.f32 %v4922_v8, %v722_v30  ;;  %v763_v48 = vadd.f32 %v4922_v8, %v4949_v63 }
 0x139   : > { %6886 = vst [vmem:[#allocation50_spill] sm:$0xff] %v5152_v14  ;;  %v1138_v50 = vsel %vm1009_vm8, %v944_v42, %v1074_v38  ;;  %v946_v46 = vmul.f32 %v728_v34, %v4828_v58  ;;  %4117 = vmatprep.mubr.msk.f32.mxu1 %vm343_vm0, %v5152_v14  ;;  %v5172_v38 = vpop.f32.mrb[22].mxu1  ;;  %vm1019_vm12 = vcmp.ge.f32.partialorder %v5162_v22, 0.0 }
 0x13a   : > { %v1137_v16 = vsel %vm1008_vm9, %v943_v44, %v1073_v53  ;;  %v945_v45 = vmul.f32 %v723_v51, %v4816_v56  ;;  %v4024_v40 = vpop.f32.mrb[26].mxu0  ;;  %4118 = vmatmul.mubr.msk.f32.gmra.mrb[52].mxu1 %vm343_vm0, %v5145_v36  ;;  %v5170_v42 = vadd.f32 %v1138_v50, %v4808_v54  ;;  %v5179_v44 = vpop.f32.mrb[23].mxu1 }
 0x13b   : > { %vm1011_vm10 = vcmp.ge.f32.partialorder %v946_v46, 0.0  ;;  %v1076_v34 = vmul.f32 %v4925_v1, %v946_v46  ;;  %v738_v32 = vadd.f32 %v4024_v40, %v4922_v8  ;;  %v732_v30 = vpop.f32.mrb[27].mxu0  ;;  %v5177_v63 = vadd.f32 %v1137_v16, %v4796_v52 }
 0x13c   : > { %6887 = vst [vmem:[#allocation51_spill] sm:$0xff] %v5170_v42  ;;  %vm1010_vm11 = vcmp.ge.f32.partialorder %v945_v45, 0.0  ;;  %v1075_v53 = vmul.f32 %v4925_v1, %v945_v45  ;;  %v733_v51 = vadd.f32 %v4922_v8, %v732_v30  ;;  %v5188_v40 = vmul.f32 %v4925_v1, %v5162_v22 }
 0x13d   : > { %6888 = vst [vmem:[#allocation52_spill] sm:$0xff] %v5177_v63  ;;  %v1140_v54 = vsel %vm1011_vm10, %v946_v46, %v1076_v34  ;;  %v948_v50 = vmul.f32 %v738_v32, %v4848_v62  ;;  %4120 = vmatprep.mubr.msk.f32.mxu1 %vm343_vm0, %v5177_v63  ;;  %v953_v52 = vmul.f32 %v763_v48, %v4631_v18  ;;  %v5200_v32 = vpop.f32.mrb[24].mxu1 }
 0x13e   : > { %v1139_v16 = vsel %vm1010_vm11, %v945_v45, %v1075_v53  ;;  %v947_v14 = vmul.f32 %v733_v51, %v4836_v60  ;;  %v4027_v36 = vpop.f32.mrb[28].mxu0  ;;  %4121 = vmatmul.mubr.msk.f32.gmra.mrb[54].mxu1 %vm343_vm0, %v5170_v42  ;;  %v5195_v46 = vadd.f32 %v1140_v54, %v4828_v58  ;;  %v773_v34 = vadd.f32 %v4922_v8, %v4969_v59  ;;  %v5207_v51 = vpop.f32.mrb[25].mxu1 }
 0x13f   : > { %vm1013_vm13 = vcmp.ge.f32.partialorder %v948_v50, 0.0  ;;  %v1078_v48 = vmul.f32 %v4925_v1, %v948_v50  ;;  %v748_v45 = vadd.f32 %v4027_v36, %v4922_v8  ;;  %v742_v30 = vpop.f32.mrb[29].mxu0  ;;  %v5205_v53 = vadd.f32 %v1139_v16, %v4816_v56 }
 0x140   : > { %6889 = vst [vmem:[#allocation53_spill] sm:$0xff] %v5195_v46  ;;  %vm1012_vm14 = vcmp.ge.f32.partialorder %v947_v14, 0.0  ;;  %v1077_v58 = vmul.f32 %v4925_v1, %v947_v14  ;;  %v743_v54 = vadd.f32 %v4922_v8, %v742_v30  ;;  %v778_v59 = vadd.f32 %v4962_v10, %v4922_v8 }
 0x141   : > { %6890 = vst [vmem:[#allocation54_spill] sm:$0xff] %v5205_v53  ;;  %v1142_v63 = vsel %vm1013_vm13, %v948_v50, %v1078_v48  ;;  %v950_v42 = vmul.f32 %v748_v45, %v4868_v2  ;;  %4123 = vmatprep.mubr.msk.f32.mxu1 %vm343_vm0, %v5205_v53  ;;  %vm1018_vm15 = vcmp.ge.f32.partialorder %v953_v52, 0.0  ;;  %v1083_v56 = vmul.f32 %v4925_v1, %v953_v52  ;;  %v5224_v50 = vpop.f32.mrb[26].mxu1 }
 0x142   : > { %v1141_v36 = vsel %vm1012_vm14, %v947_v14, %v1077_v58  ;;  %v949_v16 = vmul.f32 %v743_v54, %v4856_v0  ;;  %v4030_v15 = vpop.f32.mrb[30].mxu0  ;;  %4124 = vmatmul.mubr.msk.f32.gmra.mrb[56].mxu1 %vm343_vm0, %v5195_v46  ;;  %v5221_v30 = vadd.f32 %v1142_v63, %v4848_v62  ;;  %v955_v10 = vmul.f32 %v773_v34, %v4639_v20  ;;  %v5231_v58 = vpop.f32.mrb[27].mxu1 }
 0x143   : > { %vm1015_vm1 = vcmp.ge.f32.partialorder %v950_v42, 0.0  ;;  %v1080_v48 = vmul.f32 %v4925_v1, %v950_v42  ;;  %v758_v45 = vadd.f32 %v4030_v15, %v4922_v8  ;;  %v752_v53 = vpop.f32.mrb[31].mxu0  ;;  %v5229_v14 = vadd.f32 %v1141_v36, %v4836_v60 }
 0x144   : > { %vm1014_vm2 = vcmp.ge.f32.partialorder %v949_v16, 0.0  ;;  %v1079_v54 = vmul.f32 %v4925_v1, %v949_v16  ;;  %v753_v62 = vadd.f32 %v4922_v8, %v752_v53  ;;  %v783_v63 = vadd.f32 %v4922_v8, %v4992_v9 }
 0x145   : > { %v1144_v34 = vsel %vm1015_vm1, %v950_v42, %v1080_v48  ;;  %v952_v46 = vmul.f32 %v758_v45, %v4888_v6  ;;  %4126 = vmatprep.mubr.msk.f32.mxu1 %vm343_vm0, %v5229_v14  ;;  %v1147_v15 = vsel %vm1018_vm15, %v953_v52, %v1083_v56  ;;  %v956_v60 = vmul.f32 %v778_v59, %v4653_v23  ;;  %v5250_v42 = vpop.f32.mrb[28].mxu1 }
 0x146   : > { %v1143_v36 = vsel %vm1014_vm2, %v949_v16, %v1079_v54  ;;  %v951_v5 = vmul.f32 %v753_v62, %v4876_v4  ;;  %4127 = vmatmul.mubr.msk.f32.gmra.mrb[58].mxu1 %vm343_vm0, %v5221_v30  ;;  %v5246_v53 = vadd.f32 %v1144_v34, %v4868_v2  ;;  %v788_v9 = vadd.f32 %v4985_v57, %v4922_v8  ;;  %v5257_v56 = vpop.f32.mrb[29].mxu1 }
 0x147   : > { %vm1017_vm3 = vcmp.ge.f32.partialorder %v952_v46, 0.0  ;;  %v1082_v48 = vmul.f32 %v4925_v1, %v952_v46  ;;  %v5254_v52 = vadd.f32 %v1143_v36, %v4856_v0  ;;  %v1085_v59 = vmul.f32 %v4925_v1, %v955_v10 }
 0x148   : > { %vm1016_vm4 = vcmp.ge.f32.partialorder %v951_v5, 0.0  ;;  %v1081_v16 = vmul.f32 %v4925_v1, %v951_v5  ;;  %v957_v2 = vmul.f32 %v783_v63, %v4659_v25  ;;  %v793_v57 = vadd.f32 %v4922_v8, %v5012_v39 }
 0x149   : > { %v1146_v45 = vsel %vm1017_vm3, %v952_v46, %v1082_v48  ;;  %v1148_v54 = vsel %vm1019_vm12, %v5162_v22, %v5188_v40  ;;  %4129 = vmatprep.mubr.msk.f32.mxu1 %vm343_vm0, %v5254_v52  ;;  %vm1020_vm5 = vcmp.ge.f32.partialorder %v955_v10, 0.0  ;;  %vm1021_vm6 = vcmp.ge.f32.partialorder %v956_v60, 0.0  ;;  %v5276_v46 = vpop.f32.mrb[30].mxu1 }
 0x14a   : > { %v1145_v0 = vsel %vm1016_vm4, %v951_v5, %v1081_v16  ;;  %4130 = vmatmul.mubr.msk.f32.gmra.mrb[60].mxu1 %vm343_vm0, %v5246_v53  ;;  %v5272_v62 = vadd.f32 %v1146_v45, %v4888_v6  ;;  %v798_v39 = vadd.f32 %v5005_v11, %v4922_v8  ;;  %v1086_v63 = vmul.f32 %v4925_v1, %v956_v60  ;;  %v5286_v34 = vpop.f32.mrb[31].mxu1 }
 0x14b   : > { %v5280_v22 = vadd.f32 %v1145_v0, %v4876_v4  ;;  %v958_v40 = vmul.f32 %v788_v9, %v4673_v27  ;;  %v5284_v5 = vadd.f32 %v1147_v15, %v4631_v18  ;;  %v1149_v36 = vsel %vm1020_vm5, %v955_v10, %v1085_v59 }
 0x14c   : > { %v1087_v6 = vmul.f32 %v4925_v1, %v957_v2  ;;  %v959_v48 = vmul.f32 %v793_v57, %v4679_v29  ;;  %v803_v11 = vadd.f32 %v4922_v8, %v5032_v61  ;;  %vm1022_vm7 = vcmp.ge.f32.partialorder %v957_v2, 0.0 }
 0x14d   : > { %4132 = vmatprep.mubr.msk.f32.mxu1 %vm343_vm0, %v5280_v22  ;;  %v960_v18 = vmul.f32 %v798_v39, %v4693_v31  ;;  %v5298_v4 = vadd.f32 %v1148_v54, %v4636_v19  ;;  %v808_v10 = vadd.f32 %v5025_v47, %v4922_v8  ;;  %v1150_v15 = vsel %vm1021_vm6, %v956_v60, %v1086_v63 }
 0x14e   : > { %4133 = vmatmul.mubr.msk.f32.gmra.mrb[62].mxu1 %vm343_vm0, %v5272_v62  ;;  %vm1023_vm8 = vcmp.ge.f32.partialorder %v958_v40, 0.0  ;;  %v1088_v61 = vmul.f32 %v4925_v1, %v958_v40  ;;  %v5307_v9 = vadd.f32 %v1149_v36, %v4639_v20  ;;  %v1151_v59 = vsel %vm1022_vm7, %v957_v2, %v1087_v6 }
 0x14f   : > { %4135 = vmatprep.mubr.msk.f32.mxu1 %vm343_vm0, %v5284_v5  ;;  %v1089_v16 = vmul.f32 %v4925_v1, %v959_v48  ;;  %v961_v19 = vmul.f32 %v803_v11, %v4699_v33  ;;  %v813_v57 = vadd.f32 %v4922_v8, %v5052_v3  ;;  %vm1024_vm9 = vcmp.ge.f32.partialorder %v959_v48, 0.0 }
 0x150   : > { %v1090_v47 = vmul.f32 %v4925_v1, %v960_v18  ;;  %v962_v60 = vmul.f32 %v808_v10, %v4713_v35  ;;  %v5318_v45 = vadd.f32 %v1150_v15, %v4653_v23  ;;  %v1152_v20 = vsel %vm1023_vm8, %v958_v40, %v1088_v61 }
 0x151   : > { %vm1025_vm10 = vcmp.ge.f32.partialorder %v960_v18, 0.0  ;;  %v5323_v2 = vadd.f32 %v1151_v59, %v4659_v25  ;;  %v818_v3 = vadd.f32 %v5045_v49, %v4922_v8  ;;  %v1153_v54 = vsel %vm1024_vm9, %v959_v48, %v1089_v16  ;;  %v6891_v49 = vld [vmem:[#allocation9_spill] sm:$0xff]  ;;  %v6893_v59 = vld [vmem:[#allocation11_spill] sm:$0xff] }
 0x152   : > { %4136 = vmatmul.mubr.msk.f32.gmra.mrb[64].mxu1 %vm343_vm0, %v5298_v4  ;;  %v1091_v0 = vmul.f32 %v4925_v1, %v961_v19  ;;  %v963_v39 = vmul.f32 %v813_v57, %v4719_v37  ;;  %v823_v23 = vadd.f32 %v4922_v8, %v5072_v55  ;;  %vm1026_vm11 = vcmp.ge.f32.partialorder %v961_v19, 0.0 }
 0x153   : > { %4138 = vmatprep.mubr.msk.f32.mxu1 %vm343_vm0, %v5307_v9  ;;  %v1154_v63 = vsel %vm1025_vm10, %v960_v18, %v1090_v47  ;;  %v1092_v40 = vmul.f32 %v4925_v1, %v962_v60  ;;  %v5335_v25 = vadd.f32 %v1152_v20, %v4673_v27  ;;  %vm1027_vm12 = vcmp.ge.f32.partialorder %v962_v60, 0.0  ;;  %v6892_v18 = vld [vmem:[#allocation10_spill] sm:$0xff]  ;;  %v6894_v47 = vld [vmem:[#allocation12_spill] sm:$0xff] }
 0x154   : > { %v964_v36 = vmul.f32 %v818_v3, %v6891_v49  ;;  %v5341_v6 = vadd.f32 %v1153_v54, %v4679_v29  ;;  %v828_v55 = vadd.f32 %v5065_v43, %v4922_v8  ;;  %v1155_v48 = vsel %vm1026_vm11, %v961_v19, %v1091_v0 }
 0x155   : > { %v1093_v11 = vmul.f32 %v4925_v1, %v963_v39  ;;  %v965_v10 = vmul.f32 %v823_v23, %v6892_v18  ;;  %v833_v27 = vadd.f32 %v4922_v8, %v5092_v13  ;;  %vm1028_vm13 = vcmp.ge.f32.partialorder %v963_v39, 0.0 }
 0x156   : > { %4139 = vmatmul.mubr.msk.f32.gmra.mrb[66].mxu1 %vm343_vm0, %v5318_v45  ;;  %v1156_v15 = vsel %vm1027_vm12, %v962_v60, %v1092_v40  ;;  %v5352_v61 = vadd.f32 %v1154_v63, %v4693_v31  ;;  %v838_v29 = vadd.f32 %v5085_v41, %v4922_v8  ;;  %vm1029_vm14 = vcmp.ge.f32.partialorder %v964_v36, 0.0  ;;  %v6895_v41 = vld [vmem:[#allocation13_spill] sm:$0xff]  ;;  %v6896_v63 = vld [vmem:[#allocation14_spill] sm:$0xff] }
 0x157   : > { %4141 = vmatprep.mubr.msk.f32.mxu1 %vm343_vm0, %v5323_v2  ;;  %v1094_v43 = vmul.f32 %v4925_v1, %v964_v36  ;;  %v966_v16 = vmul.f32 %v828_v55, %v6893_v59  ;;  %v5361_v13 = vadd.f32 %v1155_v48, %v4699_v33  ;;  %v1157_v19 = vsel %vm1028_vm13, %v963_v39, %v1093_v11 }
 0x158   : > { %v1095_v57 = vmul.f32 %v4925_v1, %v965_v10  ;;  %v967_v31 = vmul.f32 %v833_v27, %v6894_v47  ;;  %v843_v60 = vadd.f32 %v4922_v8, %v5112_v17  ;;  %vm1030_vm15 = vcmp.ge.f32.partialorder %v965_v10, 0.0 }
 0x159   : > { %v968_v20 = vmul.f32 %v838_v29, %v6895_v41  ;;  %v5371_v3 = vadd.f32 %v1156_v15, %v4713_v35  ;;  %v848_v33 = vadd.f32 %v5105_v12, %v4922_v8  ;;  %v1158_v54 = vsel %vm1029_vm14, %v964_v36, %v1094_v43  ;;  %v6897_v36 = vld [vmem:[#allocation15_spill] sm:$0xff]  ;;  %v6898_v15 = vld [vmem:[#allocation16_spill] sm:$0xff] }
 0x15a   : > { %4142 = vmatmul.mubr.msk.f32.gmra.mrb[68].mxu1 %vm343_vm0, %v5335_v25  ;;  %vm1031_vm1 = vcmp.ge.f32.partialorder %v966_v16, 0.0  ;;  %v1096_v0 = vmul.f32 %v4925_v1, %v966_v16  ;;  %v5379_v17 = vadd.f32 %v1157_v19, %v4719_v37  ;;  %v1159_v39 = vsel %vm1030_vm15, %v965_v10, %v1095_v57  ;;  %v3695_v43 = vld [vmem:[%s6697_s1 + $0x50] sm:$0xff] }
 0x15b   : > { %4144 = vmatprep.mubr.msk.f32.mxu1 %vm343_vm0, %v5341_v6  ;;  %v1097_v23 = vmul.f32 %v4925_v1, %v967_v31  ;;  %v969_v40 = vmul.f32 %v843_v60, %v6896_v63  ;;  %v853_v35 = vadd.f32 %v4922_v8, %v5132_v24  ;;  %vm1032_vm2 = vcmp.ge.f32.partialorder %v967_v31, 0.0 }
 0x15c   : > { %v1098_v12 = vmul.f32 %v4925_v1, %v968_v20  ;;  %v970_v55 = vmul.f32 %v848_v33, %v6897_v36  ;;  %v5390_v48 = vadd.f32 %v1158_v54, %v6891_v49  ;;  %v1160_v37 = vsel %vm1031_vm1, %v966_v16, %v1096_v0  ;;  %v6900_v0 = vld [vmem:[#allocation18_spill] sm:$0xff] }
 0x15d   : > { %vm1033_vm3 = vcmp.ge.f32.partialorder %v968_v20, 0.0  ;;  %v5395_v11 = vadd.f32 %v1159_v39, %v6892_v18  ;;  %v858_v24 = vadd.f32 %v5125_v7, %v4922_v8  ;;  %v1161_v10 = vsel %vm1032_vm2, %v967_v31, %v1097_v23  ;;  %v3696_v18 = vld [vmem:[%s6697_s1 + $0x58] sm:$0xff] }
 0x15e   : > { %4145 = vmatmul.mubr.msk.f32.gmra.mrb[70].mxu1 %vm343_vm0, %v5352_v61  ;;  %v1099_v27 = vmul.f32 %v4925_v1, %v969_v40  ;;  %v971_v29 = vmul.f32 %v853_v35, %v6898_v15  ;;  %v863_v49 = vadd.f32 %v4922_v8, %v5154_v28  ;;  %vm1034_vm4 = vcmp.ge.f32.partialorder %v969_v40, 0.0  ;;  %v6899_v28 = vld [vmem:[#allocation17_spill] sm:$0xff] }
 0x15f   : > { %4147 = vmatprep.mubr.msk.f32.mxu1 %vm343_vm0, %v5361_v13  ;;  %v1162_v16 = vsel %vm1033_vm3, %v968_v20, %v1098_v12  ;;  %vm1035_vm5 = vcmp.ge.f32.partialorder %v970_v55, 0.0  ;;  %v1100_v7 = vmul.f32 %v4925_v1, %v970_v55  ;;  %v5413_v19 = vadd.f32 %v1160_v37, %v6893_v59 }
 0x160   : > { %v972_v57 = vmul.f32 %v858_v24, %v6899_v28  ;;  %v5419_v31 = vadd.f32 %v1161_v10, %v6894_v47  ;;  %v868_v60 = vadd.f32 %v5147_v26, %v4922_v8  ;;  %v4307_v20 = vpack.c.bf16 %v3696_v18, %v3695_v43  ;;  %v6903_v10 = vld [vmem:[#allocation21_spill] sm:$0xff] }
 0x161   : > { %v1163_v33 = vsel %vm1034_vm4, %v969_v40, %v1099_v27  ;;  %v1101_v54 = vmul.f32 %v4925_v1, %v971_v29  ;;  %v973_v39 = vmul.f32 %v863_v49, %v6900_v0  ;;  %v873_v59 = vadd.f32 %v4922_v8, %v5179_v44  ;;  %v6901_v44 = vld [vmem:[#allocation19_spill] sm:$0xff] }
 0x162   : > { %4148 = vmatmul.mubr.msk.f32.gmra.mrb[72].mxu1 %vm343_vm0, %v5371_v3  ;;  %vm1036_vm6 = vcmp.ge.f32.partialorder %v971_v29, 0.0  ;;  %4308 = vmatprep.subr.bf16.mxu0 %v4307_v20  ;;  %v1164_v23 = vsel %vm1035_vm5, %v970_v55, %v1100_v7  ;;  %v5430_v47 = vadd.f32 %v1162_v16, %v6895_v41  ;;  %v878_v26 = vadd.f32 %v5172_v38, %v4922_v8  ;;  %v6902_v41 = vld [vmem:[#allocation20_spill] sm:$0xff]  ;;  %v6904_v7 = vld [vmem:[#allocation22_spill] sm:$0xff] }
 0x163   : > { %4150 = vmatprep.mubr.msk.f32.mxu1 %vm343_vm0, %v5379_v17  ;;  %4310 = vmatpush3.bf16.msra.mxu0 %v4307_v20  ;;  %vm1037_vm7 = vcmp.ge.f32.partialorder %v972_v57, 0.0  ;;  %v1102_v40 = vmul.f32 %v4925_v1, %v972_v57  ;;  %v974_v35 = vmul.f32 %v868_v60, %v6901_v44  ;;  %v5439_v12 = vadd.f32 %v1163_v33, %v6896_v63 }
 0x164   : > { %v1165_v55 = vsel %vm1036_vm6, %v971_v29, %v1101_v54  ;;  %v1103_v37 = vmul.f32 %v4925_v1, %v973_v39  ;;  %v975_v24 = vmul.f32 %v873_v59, %v6902_v41  ;;  %v883_v38 = vadd.f32 %v4922_v8, %v5207_v51 }
 0x165   : > { %vm1038_vm8 = vcmp.ge.f32.partialorder %v973_v39, 0.0  ;;  %v976_v27 = vmul.f32 %v878_v26, %v6903_v10  ;;  %v5449_v49 = vadd.f32 %v1164_v23, %v6897_v36  ;;  %v888_v63 = vadd.f32 %v5200_v32, %v4922_v8  ;;  %v6906_v23 = vld [vmem:[#allocation24_spill] sm:$0xff]  ;;  %v6908_v10 = vld [vmem:[#allocation26_spill] sm:$0xff] }
 0x166   : > { %4151 = vmatmul.mubr.msk.f32.gmra.mrb[74].mxu1 %vm343_vm0, %v5390_v48  ;;  %v1166_v29 = vsel %vm1037_vm7, %v972_v57, %v1102_v40  ;;  %vm1039_vm9 = vcmp.ge.f32.partialorder %v974_v35, 0.0  ;;  %v1104_v43 = vmul.f32 %v4925_v1, %v974_v35  ;;  %v5457_v51 = vadd.f32 %v1165_v55, %v6898_v15  ;;  %v6905_v57 = vld [vmem:[#allocation23_spill] sm:$0xff] }
 0x167   : > { %4153 = vmatprep.mubr.msk.f32.mxu1 %vm343_vm0, %v5395_v11  ;;  %v1167_v18 = vsel %vm1038_vm8, %v973_v39, %v1103_v37  ;;  %v1105_v16 = vmul.f32 %v4925_v1, %v975_v24  ;;  %v977_v60 = vmul.f32 %v883_v38, %v6904_v7  ;;  %v893_v36 = vadd.f32 %v4922_v8, %v5231_v58 }
 0x168   : > { %vm1040_vm10 = vcmp.ge.f32.partialorder %v975_v24, 0.0  ;;  %v1106_v32 = vmul.f32 %v4925_v1, %v976_v27  ;;  %v978_v20 = vmul.f32 %v888_v63, %v6905_v57  ;;  %v5468_v33 = vadd.f32 %v1166_v29, %v6899_v28  ;;  %v4367_v29 = vld [vmem:[%s4591_s16 + $0x1b8] sm:$0xff] }
 0x169   : > { %v1168_v15 = vsel %vm1039_vm9, %v974_v35, %v1104_v43  ;;  %vm1041_vm11 = vcmp.ge.f32.partialorder %v976_v27, 0.0  ;;  %v5473_v54 = vadd.f32 %v1167_v18, %v6900_v0  ;;  %v898_v58 = vadd.f32 %v5224_v50, %v4922_v8  ;;  %v6907_v50 = vld [vmem:[#allocation25_spill] sm:$0xff] }
 0x16a   : > { %4154 = vmatmul.mubr.msk.f32.gmra.mrb[76].mxu1 %vm343_vm0, %v5413_v19  ;;  %v1169_v39 = vsel %vm1040_vm10, %v975_v24, %v1105_v16  ;;  %v1107_v59 = vmul.f32 %v4925_v1, %v977_v60  ;;  %v979_v26 = vmul.f32 %v893_v36, %v6906_v23  ;;  %v903_v28 = vadd.f32 %v4922_v8, %v5257_v56  ;;  %v4368_v16 = vld [vmem:[%s4591_s16 + $0x1c0] sm:$0xff] }
 0x16b   : > { %4156 = vmatprep.mubr.msk.f32.mxu1 %vm343_vm0, %v5419_v31  ;;  %vm1042_vm12 = vcmp.ge.f32.partialorder %v977_v60, 0.0  ;;  %v1170_v40 = vsel %vm1041_vm11, %v976_v27, %v1106_v32  ;;  %v1108_v35 = vmul.f32 %v4925_v1, %v978_v20  ;;  %v5485_v0 = vadd.f32 %v1168_v15, %v6901_v44  ;;  %v6910_v32 = vld [vmem:[#allocation28_spill] sm:$0xff] }
 0x16c   : > { %vm1043_vm13 = vcmp.ge.f32.partialorder %v978_v20, 0.0  ;;  %v980_v55 = vmul.f32 %v898_v58, %v6907_v50  ;;  %v5491_v56 = vadd.f32 %v1169_v39, %v6902_v41  ;;  %v908_v37 = vadd.f32 %v5250_v42, %v4922_v8  ;;  %v6909_v42 = vld [vmem:[#allocation27_spill] sm:$0xff] }
 0x16d   : > { %v1171_v24 = vsel %vm1042_vm12, %v977_v60, %v1107_v59  ;;  %v1109_v38 = vmul.f32 %v4925_v1, %v979_v26  ;;  %v981_v27 = vmul.f32 %v903_v28, %v6908_v10  ;;  %v913_v44 = vadd.f32 %v4922_v8, %v5286_v34  ;;  %v4370_v59 = vld [vmem:[%s4591_s16 + $0x1d0] sm:$0xff]  ;;  %v4373_v10 = vld [vmem:[%s4591_s16 + $0x1e8] sm:$0xff] }
 0x16e   : > { %4157 = vmatmul.mubr.msk.f32.gmra.mrb[78].mxu1 %vm343_vm0, %v5430_v47  ;;  %vm1044_vm14 = vcmp.ge.f32.partialorder %v979_v26, 0.0  ;;  %v1172_v63 = vsel %vm1043_vm13, %v978_v20, %v1108_v35  ;;  %v5502_v41 = vadd.f32 %v4367_v29, %v1170_v40  ;;  %v1110_v43 = vmul.f32 %v4925_v1, %v980_v55  ;;  %v4369_v20 = vld [vmem:[%s4591_s16 + $0x1c8] sm:$0xff]  ;;  %v4371_v40 = vld [vmem:[%s4591_s16 + $0x1d8] sm:$0xff] }
 0x16f   : > { %4159 = vmatprep.mubr.msk.f32.mxu1 %vm343_vm0, %v5439_v12  ;;  %v982_v18 = vmul.f32 %v908_v37, %v6909_v42  ;;  %v5509_v7 = vadd.f32 %v4368_v16, %v1171_v24  ;;  %v918_v34 = vadd.f32 %v5276_v46, %v4922_v8  ;;  %vm1045_vm15 = vcmp.ge.f32.partialorder %v980_v55, 0.0  ;;  %v6911_v8 = vld [vmem:[#allocation29_spill] sm:$0xff]  ;;  %v4375_v29 = vld [vmem:[%s4591_s16 + $0x1f8] sm:$0xff] }
 0x170   : > { %v1173_v60 = vsel %vm1044_vm14, %v979_v26, %v1109_v38  ;;  %v1111_v36 = vmul.f32 %v4925_v1, %v981_v27  ;;  %v983_v57 = vmul.f32 %v913_v44, %v6910_v32  ;;  %vm1046_vm1 = vcmp.ge.f32.partialorder %v981_v27, 0.0  ;;  %v4372_v37 = vld [vmem:[%s4591_s16 + $0x1e0] sm:$0xff] }
 0x171   : > { %v5518_v15 = vadd.f32 %v4369_v20, %v1172_v63  ;;  %v1174_v58 = vsel %vm1045_vm15, %v980_v55, %v1110_v43  ;;  %v1112_v39 = vmul.f32 %v4925_v1, %v982_v18  ;;  %v984_v46 = vmul.f32 %v918_v34, %v6911_v8  ;;  %v4374_v63 = vld [vmem:[%s4591_s16 + $0x1f0] sm:$0xff]  ;;  %v5561_v42 = vld [vmem:[%s6698_s2 + $0x1] ss:$0 sm:$0xff]  ;;  %s3763_s16 = sld [smem:[#allocation3 + $0x2]] }
 0x172   : > { %4160 = vmatmul.mubr.msk.f32.gmra.mrb[80].mxu1 %vm343_vm0, %v5449_v49  ;;  %v5525_v23 = vadd.f32 %v4370_v59, %v1173_v60  ;;  %vm1047_vm2 = vcmp.ge.f32.partialorder %v982_v18, 0.0  ;;  %v1175_v26 = vsel %vm1046_vm1, %v981_v27, %v1111_v36  ;;  %v1113_v28 = vmul.f32 %v4925_v1, %v983_v57 }
 0x173   : > { %4162 = vmatprep.mubr.msk.f32.mxu1 %vm343_vm0, %v5457_v51  ;;  %vm1048_vm3 = vcmp.ge.f32.partialorder %v983_v57, 0.0  ;;  %v5531_v35 = vadd.f32 %v4371_v40, %v1174_v58  ;;  %v1176_v50 = vsel %vm1047_vm2, %v982_v18, %v1112_v39  ;;  %v1114_v55 = vmul.f32 %v4925_v1, %v984_v46  ;;  %v6913_v40 = vld [vmem:[#allocation32_spill] sm:$0xff] }
 0x174   : > { %v5537_v24 = vadd.f32 %v4372_v37, %v1175_v26  ;;  %vm1049_vm4 = vcmp.ge.f32.partialorder %v984_v46, 0.0  ;;  %v1177_v38 = vsel %vm1048_vm3, %v983_v57, %v1113_v28  ;;  %v5542_v27 = vadd.f32 %v4373_v10, %v1176_v50  ;;  %v6912_v57 = vld [vmem:[#allocation30_spill] sm:$0xff]  ;;  %v6914_v37 = vld [vmem:[#allocation31_spill] sm:$0xff] }
 0x175   : > { %v1178_v44 = vsel %vm1049_vm4, %v984_v46, %v1114_v55  ;;  %v5547_v1 = vadd.f32 %v4374_v63, %v1177_v38  ;;  %v5564_v60 = vstv %s3692_s17  ;;  %s3770_s17 = sshll.u32 %s4524_s5, 13  ;;  %s6655_s5 = scalar_lea.sflag [#allocation4], %s258_s13 }
 0x176   : > { %4163 = vmatmul.mubr.msk.f32.gmra.mrb[82].mxu1 %vm343_vm0, %v5468_v33  ;;  %v5552_v43 = vadd.f32 %v4375_v29, %v1178_v44  ;;  %s6646_s20 = scalar_lea.hbm %s6702_s6, %s3770_s17 }
 0x177   : > { %4165 = vmatprep.mubr.msk.f32.mxu1 %vm343_vm0, %v5473_v54 }
 0x17a   : > { %4166 = vmatmul.mubr.msk.f32.gmra.mrb[84].mxu1 %vm343_vm0, %v5485_v0 }
 0x17b   : > { %4168 = vmatprep.mubr.msk.f32.mxu1 %vm343_vm0, %v5491_v56 }
 0x17e   : > { %4169 = vmatmul.mubr.msk.f32.gmra.mrb[86].mxu1 %vm343_vm0, %v5502_v41 }
 0x17f   : > { %4171 = vmatprep.mubr.msk.f32.mxu1 %vm343_vm0, %v5509_v7 }
 0x182   : > { %4172 = vmatmul.mubr.msk.f32.gmra.mrb[88].mxu1 %vm343_vm0, %v5518_v15 }
 0x183   : > { %4174 = vmatprep.mubr.msk.f32.mxu1 %vm343_vm0, %v5525_v23 }
 0x186   : > { %4175 = vmatmul.mubr.msk.f32.gmra.mrb[90].mxu1 %vm343_vm0, %v5531_v35 }
 0x187   : > { %4177 = vmatprep.mubr.msk.f32.mxu1 %vm343_vm0, %v5537_v24 }
 0x18a   : > { %4178 = vmatmul.mubr.msk.f32.gmra.mrb[92].mxu1 %vm343_vm0, %v5542_v27 }
 0x18b   : > { %4180 = vmatprep.mubr.msk.f32.mxu1 %vm343_vm0, %v5547_v1 }
 0x18e   : > { %4181 = vmatmul.mubr.msk.f32.gmra.mrb[94].mxu1 %vm343_vm0, %v5552_v43 }
 0x1e5   : > { %v4089_v18 = vpop.f32.mrb[32].mxu1 }
 0x1e6   : > { %v1520_v16 = vadd.f32 %v4089_v18, %v5561_v42  ;;  %v1514_v34 = vpop.f32.mrb[33].mxu1 }
 0x1e7   : > { %v1515_v36 = vadd.f32 %v5561_v42, %v1514_v34 }
 0x1e8   : > { %v1834_v32 = vmul.f32 %v1520_v16, %v4952_v21 }
 0x1e9   : > { %v1833_v20 = vmul.f32 %v1515_v36, %v6912_v57  ;;  %v4092_v58 = vpop.f32.mrb[34].mxu1 }
 0x1ea   : > { %vm1899_vm5 = vcmp.ge.f32.partialorder %v1834_v32, 0.0  ;;  %v1964_v39 = vmul.f32 %v5564_v60, %v1834_v32  ;;  %v1530_v8 = vadd.f32 %v4092_v58, %v5561_v42  ;;  %v1524_v46 = vpop.f32.mrb[35].mxu1 }
 0x1eb   : > { %vm1898_vm6 = vcmp.ge.f32.partialorder %v1833_v20, 0.0  ;;  %v1963_v59 = vmul.f32 %v5564_v60, %v1833_v20  ;;  %v1525_v26 = vadd.f32 %v5561_v42, %v1524_v46 }
 0x1ec   : > { %v2028_v28 = vsel %vm1899_vm5, %v1834_v32, %v1964_v39  ;;  %v1836_v50 = vmul.f32 %v1530_v8, %v6913_v40  ;;  %v6916_v8 = vld [vmem:[#allocation34_spill] sm:$0xff] }
 0x1ed   : > { %v2027_v55 = vsel %vm1898_vm6, %v1833_v20, %v1963_v59  ;;  %v1835_v38 = vmul.f32 %v1525_v26, %v6914_v37  ;;  %v4095_v10 = vpop.f32.mrb[36].mxu1  ;;  %v5581_v16 = vadd.f32 %v2028_v28, %v4952_v21  ;;  %v6915_v20 = vld [vmem:[#allocation33_spill] sm:$0xff] }
 0x1ee   : > { %vm1901_vm7 = vcmp.ge.f32.partialorder %v1836_v50, 0.0  ;;  %v1966_v44 = vmul.f32 %v5564_v60, %v1836_v50  ;;  %v1540_v63 = vadd.f32 %v4095_v10, %v5561_v42  ;;  %v1534_v29 = vpop.f32.mrb[37].mxu1  ;;  %v5578_v18 = vadd.f32 %v2027_v55, %v6912_v57 }
 0x1ef   : > { %vm1900_vm8 = vcmp.ge.f32.partialorder %v1835_v38, 0.0  ;;  %v1965_v34 = vmul.f32 %v5564_v60, %v1835_v38  ;;  %v1535_v36 = vadd.f32 %v5561_v42, %v1534_v29 }
 0x1f0   : > { %v2030_v32 = vsel %vm1901_vm7, %v1836_v50, %v1966_v44  ;;  %v1838_v58 = vmul.f32 %v1540_v63, %v6915_v20  ;;  %4191 = vmatprep.mubr.msk.f32.mxu0 %vm343_vm0, %v5578_v18  ;;  %v6919_v44 = vld [vmem:[#allocation35_spill] sm:$0xff] }
 0x1f1   : > { %v2029_v39 = vsel %vm1900_vm8, %v1835_v38, %v1965_v34  ;;  %v1837_v46 = vmul.f32 %v1535_v36, %v6916_v8  ;;  %v4098_v59 = vpop.f32.mrb[38].mxu1  ;;  %4192 = vmatmul.mubr.msk.f32.vlgmr.msra.gmra.mrb[32].mxu0 %vm343_vm0, %v5581_v16  ;;  %v5599_v38 = vadd.f32 %v2030_v32, %v6913_v40  ;;  %v6920_v34 = vld [vmem:[#allocation36_spill] sm:$0xff] }
 0x1f2   : > { %vm1903_vm9 = vcmp.ge.f32.partialorder %v1838_v58, 0.0  ;;  %v1968_v21 = vmul.f32 %v5564_v60, %v1838_v58  ;;  %v1550_v57 = vadd.f32 %v4098_v59, %v5561_v42  ;;  %v1544_v26 = vpop.f32.mrb[39].mxu1  ;;  %v5594_v28 = vadd.f32 %v2029_v39, %v6914_v37 }
 0x1f3   : > { %vm1902_vm10 = vcmp.ge.f32.partialorder %v1837_v46, 0.0  ;;  %v1967_v50 = vmul.f32 %v5564_v60, %v1837_v46  ;;  %v1545_v55 = vadd.f32 %v5561_v42, %v1544_v26  ;;  %6918 = vst [vmem:[#allocation10_spill] sm:$0xff] %v5599_v38  ;;  %v6923_v26 = vld [vmem:[#allocation37_spill] sm:$0xff] }
 0x1f4   : > { %6917 = vst [vmem:[#allocation9_spill] sm:$0xff] %v5594_v28  ;;  %v2032_v10 = vsel %vm1903_vm9, %v1838_v58, %v1968_v21  ;;  %v1840_v63 = vmul.f32 %v1550_v57, %v6919_v44  ;;  %4194 = vmatprep.mubr.msk.f32.mxu0 %vm343_vm0, %v5594_v28 }
 0x1f5   : > { %v2031_v29 = vsel %vm1902_vm10, %v1837_v46, %v1967_v50  ;;  %v1839_v36 = vmul.f32 %v1545_v55, %v6920_v34  ;;  %v4101_v59 = vpop.f32.mrb[40].mxu1  ;;  %4195 = vmatmul.mubr.msk.f32.gmra.mrb[34].mxu0 %vm343_vm0, %v5599_v38  ;;  %v5615_v21 = vadd.f32 %v2032_v10, %v6915_v20 }
 0x1f6   : > { %vm1905_vm11 = vcmp.ge.f32.partialorder %v1840_v63, 0.0  ;;  %v1970_v37 = vmul.f32 %v5564_v60, %v1840_v63  ;;  %v1560_v39 = vadd.f32 %v4101_v59, %v5561_v42  ;;  %v1554_v40 = vpop.f32.mrb[41].mxu1  ;;  %v5610_v32 = vadd.f32 %v2031_v29, %v6916_v8  ;;  %v6924_v59 = vld [vmem:[#allocation38_spill] sm:$0xff] }
 0x1f7   : > { %vm1904_vm12 = vcmp.ge.f32.partialorder %v1839_v36, 0.0  ;;  %v1969_v58 = vmul.f32 %v5564_v60, %v1839_v36  ;;  %v1555_v46 = vadd.f32 %v5561_v42, %v1554_v40  ;;  %6922 = vst [vmem:[#allocation12_spill] sm:$0xff] %v5615_v21  ;;  %v6927_v40 = vld [vmem:[#allocation39_spill] sm:$0xff] }
 0x1f8   : > { %6921 = vst [vmem:[#allocation11_spill] sm:$0xff] %v5610_v32  ;;  %v2034_v57 = vsel %vm1905_vm11, %v1840_v63, %v1970_v37  ;;  %v1842_v50 = vmul.f32 %v1560_v39, %v6923_v26  ;;  %4197 = vmatprep.mubr.msk.f32.mxu0 %vm343_vm0, %v5610_v32 }
 0x1f9   : > { %v2033_v55 = vsel %vm1904_vm12, %v1839_v36, %v1969_v58  ;;  %v1841_v28 = vmul.f32 %v1555_v46, %v6924_v59  ;;  %v4104_v38 = vpop.f32.mrb[42].mxu1  ;;  %4198 = vmatmul.mubr.msk.f32.gmra.mrb[36].mxu0 %vm343_vm0, %v5615_v21  ;;  %v5631_v37 = vadd.f32 %v2034_v57, %v6919_v44 }
 0x1fa   : > { %vm1907_vm13 = vcmp.ge.f32.partialorder %v1842_v50, 0.0  ;;  %v1972_v8 = vmul.f32 %v5564_v60, %v1842_v50  ;;  %v1570_v29 = vadd.f32 %v4104_v38, %v5561_v42  ;;  %v1564_v20 = vpop.f32.mrb[43].mxu1  ;;  %v5626_v10 = vadd.f32 %v2033_v55, %v6920_v34  ;;  %v6928_v38 = vld [vmem:[#allocation40_spill] sm:$0xff] }
 0x1fb   : > { %vm1906_vm14 = vcmp.ge.f32.partialorder %v1841_v28, 0.0  ;;  %v1971_v63 = vmul.f32 %v5564_v60, %v1841_v28  ;;  %v1565_v36 = vadd.f32 %v5561_v42, %v1564_v20  ;;  %6926 = vst [vmem:[#allocation14_spill] sm:$0xff] %v5631_v37  ;;  %v6931_v20 = vld [vmem:[#allocation41_spill] sm:$0xff] }
 0x1fc   : > { %6925 = vst [vmem:[#allocation13_spill] sm:$0xff] %v5626_v10  ;;  %v2036_v39 = vsel %vm1907_vm13, %v1842_v50, %v1972_v8  ;;  %v1844_v58 = vmul.f32 %v1570_v29, %v6927_v40  ;;  %4200 = vmatprep.mubr.msk.f32.mxu0 %vm343_vm0, %v5626_v10 }
 0x1fd   : > { %v2035_v46 = vsel %vm1906_vm14, %v1841_v28, %v1971_v63  ;;  %v1843_v32 = vmul.f32 %v1565_v36, %v6928_v38  ;;  %v4107_v21 = vpop.f32.mrb[44].mxu1  ;;  %4201 = vmatmul.mubr.msk.f32.gmra.mrb[38].mxu0 %vm343_vm0, %v5631_v37  ;;  %v5647_v8 = vadd.f32 %v2036_v39, %v6923_v26 }
 0x1fe   : > { %vm1909_vm15 = vcmp.ge.f32.partialorder %v1844_v58, 0.0  ;;  %v1974_v34 = vmul.f32 %v5564_v60, %v1844_v58  ;;  %v1580_v55 = vadd.f32 %v4107_v21, %v5561_v42  ;;  %v1574_v44 = vpop.f32.mrb[45].mxu1  ;;  %v5642_v57 = vadd.f32 %v2035_v46, %v6924_v59  ;;  %v6932_v21 = vld [vmem:[#allocation42_spill] sm:$0xff] }
 0x1ff   : > { %vm1908_vm1 = vcmp.ge.f32.partialorder %v1843_v32, 0.0  ;;  %v1973_v50 = vmul.f32 %v5564_v60, %v1843_v32  ;;  %v1575_v28 = vadd.f32 %v5561_v42, %v1574_v44  ;;  %6930 = vst [vmem:[#allocation16_spill] sm:$0xff] %v5647_v8  ;;  %v6935_v44 = vld [vmem:[#allocation43_spill] sm:$0xff] }
 0x200   : > { %6929 = vst [vmem:[#allocation15_spill] sm:$0xff] %v5642_v57  ;;  %v2038_v29 = vsel %vm1909_vm15, %v1844_v58, %v1974_v34  ;;  %v1846_v63 = vmul.f32 %v1580_v55, %v6931_v20  ;;  %4203 = vmatprep.mubr.msk.f32.mxu0 %vm343_vm0, %v5642_v57 }
 0x201   : > { %v2037_v36 = vsel %vm1908_vm1, %v1843_v32, %v1973_v50  ;;  %v1845_v10 = vmul.f32 %v1575_v28, %v6932_v21  ;;  %v4110_v37 = vpop.f32.mrb[46].mxu1  ;;  %4204 = vmatmul.mubr.msk.f32.gmra.mrb[40].mxu0 %vm343_vm0, %v5647_v8  ;;  %v5663_v34 = vadd.f32 %v2038_v29, %v6927_v40 }
 0x202   : > { %vm1911_vm2 = vcmp.ge.f32.partialorder %v1846_v63, 0.0  ;;  %v1976_v59 = vmul.f32 %v5564_v60, %v1846_v63  ;;  %v1590_v46 = vadd.f32 %v4110_v37, %v5561_v42  ;;  %v1584_v26 = vpop.f32.mrb[47].mxu1  ;;  %v5658_v39 = vadd.f32 %v2037_v36, %v6928_v38  ;;  %v6936_v37 = vld [vmem:[#allocation44_spill] sm:$0xff] }
 0x203   : > { %vm1910_vm3 = vcmp.ge.f32.partialorder %v1845_v10, 0.0  ;;  %v1975_v58 = vmul.f32 %v5564_v60, %v1845_v10  ;;  %v1585_v32 = vadd.f32 %v5561_v42, %v1584_v26  ;;  %6934 = vst [vmem:[#allocation18_spill] sm:$0xff] %v5663_v34  ;;  %v6939_v26 = vld [vmem:[#allocation45_spill] sm:$0xff] }
 0x204   : > { %6933 = vst [vmem:[#allocation17_spill] sm:$0xff] %v5658_v39  ;;  %v2040_v55 = vsel %vm1911_vm2, %v1846_v63, %v1976_v59  ;;  %v1848_v50 = vmul.f32 %v1590_v46, %v6935_v44  ;;  %4206 = vmatprep.mubr.msk.f32.mxu0 %vm343_vm0, %v5658_v39 }
 0x205   : > { %v2039_v28 = vsel %vm1910_vm3, %v1845_v10, %v1975_v58  ;;  %v1847_v57 = vmul.f32 %v1585_v32, %v6936_v37  ;;  %v4113_v8 = vpop.f32.mrb[48].mxu1  ;;  %4207 = vmatmul.mubr.msk.f32.gmra.mrb[42].mxu0 %vm343_vm0, %v5663_v34  ;;  %v5679_v59 = vadd.f32 %v2040_v55, %v6931_v20 }
 0x206   : > { %vm1913_vm4 = vcmp.ge.f32.partialorder %v1848_v50, 0.0  ;;  %v1978_v38 = vmul.f32 %v5564_v60, %v1848_v50  ;;  %v1600_v36 = vadd.f32 %v4113_v8, %v5561_v42  ;;  %v1594_v40 = vpop.f32.mrb[49].mxu1  ;;  %v5674_v29 = vadd.f32 %v2039_v28, %v6932_v21  ;;  %v6940_v8 = vld [vmem:[#allocation46_spill] sm:$0xff] }
 0x207   : > { %vm1912_vm5 = vcmp.ge.f32.partialorder %v1847_v57, 0.0  ;;  %v1977_v63 = vmul.f32 %v5564_v60, %v1847_v57  ;;  %v1595_v10 = vadd.f32 %v5561_v42, %v1594_v40  ;;  %6938 = vst [vmem:[#allocation20_spill] sm:$0xff] %v5679_v59  ;;  %v6943_v40 = vld [vmem:[#allocation47_spill] sm:$0xff] }
 0x208   : > { %6937 = vst [vmem:[#allocation19_spill] sm:$0xff] %v5674_v29  ;;  %v2042_v46 = vsel %vm1913_vm4, %v1848_v50, %v1978_v38  ;;  %v1850_v58 = vmul.f32 %v1600_v36, %v6939_v26  ;;  %4209 = vmatprep.mubr.msk.f32.mxu0 %vm343_vm0, %v5674_v29 }
 0x209   : > { %v2041_v32 = vsel %vm1912_vm5, %v1847_v57, %v1977_v63  ;;  %v1849_v39 = vmul.f32 %v1595_v10, %v6940_v8  ;;  %v4116_v34 = vpop.f32.mrb[50].mxu1  ;;  %4210 = vmatmul.mubr.msk.f32.gmra.mrb[44].mxu0 %vm343_vm0, %v5679_v59  ;;  %v5695_v38 = vadd.f32 %v2042_v46, %v6935_v44 }
 0x20a   : > { %vm1915_vm6 = vcmp.ge.f32.partialorder %v1850_v58, 0.0  ;;  %v1980_v21 = vmul.f32 %v5564_v60, %v1850_v58  ;;  %v1610_v28 = vadd.f32 %v4116_v34, %v5561_v42  ;;  %v1604_v20 = vpop.f32.mrb[51].mxu1  ;;  %v5690_v55 = vadd.f32 %v2041_v32, %v6936_v37  ;;  %v6944_v34 = vld [vmem:[#allocation48_spill] sm:$0xff] }
 0x20b   : > { %vm1914_vm7 = vcmp.ge.f32.partialorder %v1849_v39, 0.0  ;;  %v1979_v50 = vmul.f32 %v5564_v60, %v1849_v39  ;;  %v1605_v57 = vadd.f32 %v5561_v42, %v1604_v20  ;;  %6942 = vst [vmem:[#allocation22_spill] sm:$0xff] %v5695_v38  ;;  %v6947_v20 = vld [vmem:[#allocation49_spill] sm:$0xff] }
 0x20c   : > { %6941 = vst [vmem:[#allocation21_spill] sm:$0xff] %v5690_v55  ;;  %v2044_v36 = vsel %vm1915_vm6, %v1850_v58, %v1980_v21  ;;  %v1852_v63 = vmul.f32 %v1610_v28, %v6943_v40  ;;  %4212 = vmatprep.mubr.msk.f32.mxu0 %vm343_vm0, %v5690_v55 }
 0x20d   : > { %v2043_v10 = vsel %vm1914_vm7, %v1849_v39, %v1979_v50  ;;  %v1851_v29 = vmul.f32 %v1605_v57, %v6944_v34  ;;  %v4119_v59 = vpop.f32.mrb[52].mxu1  ;;  %4213 = vmatmul.mubr.msk.f32.gmra.mrb[46].mxu0 %vm343_vm0, %v5695_v38  ;;  %v5711_v21 = vadd.f32 %v2044_v36, %v6939_v26 }
 0x20e   : > { %vm1917_vm8 = vcmp.ge.f32.partialorder %v1852_v63, 0.0  ;;  %v1982_v37 = vmul.f32 %v5564_v60, %v1852_v63  ;;  %v1620_v32 = vadd.f32 %v4119_v59, %v5561_v42  ;;  %v1614_v44 = vpop.f32.mrb[53].mxu1  ;;  %v5706_v46 = vadd.f32 %v2043_v10, %v6940_v8  ;;  %v6948_v59 = vld [vmem:[#allocation50_spill] sm:$0xff] }
 0x20f   : > { %vm1916_vm9 = vcmp.ge.f32.partialorder %v1851_v29, 0.0  ;;  %v1981_v58 = vmul.f32 %v5564_v60, %v1851_v29  ;;  %v1615_v39 = vadd.f32 %v5561_v42, %v1614_v44  ;;  %6946 = vst [vmem:[#allocation24_spill] sm:$0xff] %v5711_v21  ;;  %v6951_v44 = vld [vmem:[#allocation51_spill] sm:$0xff] }
 0x210   : > { %6945 = vst [vmem:[#allocation23_spill] sm:$0xff] %v5706_v46  ;;  %v2046_v28 = vsel %vm1917_vm8, %v1852_v63, %v1982_v37  ;;  %v1854_v50 = vmul.f32 %v1620_v32, %v6947_v20  ;;  %4215 = vmatprep.mubr.msk.f32.mxu0 %vm343_vm0, %v5706_v46 }
 0x211   : > { %v2045_v57 = vsel %vm1916_vm9, %v1851_v29, %v1981_v58  ;;  %v1853_v55 = vmul.f32 %v1615_v39, %v6948_v59  ;;  %v4122_v38 = vpop.f32.mrb[54].mxu1  ;;  %4216 = vmatmul.mubr.msk.f32.gmra.mrb[48].mxu0 %vm343_vm0, %v5711_v21  ;;  %v5727_v37 = vadd.f32 %v2046_v28, %v6943_v40 }
 0x212   : > { %vm1919_vm10 = vcmp.ge.f32.partialorder %v1854_v50, 0.0  ;;  %v1984_v8 = vmul.f32 %v5564_v60, %v1854_v50  ;;  %v1630_v10 = vadd.f32 %v4122_v38, %v5561_v42  ;;  %v1624_v26 = vpop.f32.mrb[55].mxu1  ;;  %v5722_v36 = vadd.f32 %v2045_v57, %v6944_v34  ;;  %v6952_v38 = vld [vmem:[#allocation52_spill] sm:$0xff] }
 0x213   : > { %vm1918_vm11 = vcmp.ge.f32.partialorder %v1853_v55, 0.0  ;;  %v1983_v63 = vmul.f32 %v5564_v60, %v1853_v55  ;;  %v1625_v29 = vadd.f32 %v5561_v42, %v1624_v26  ;;  %6950 = vst [vmem:[#allocation26_spill] sm:$0xff] %v5727_v37  ;;  %v6953_v26 = vld [vmem:[#allocation53_spill] sm:$0xff] }
 0x214   : > { %6949 = vst [vmem:[#allocation25_spill] sm:$0xff] %v5722_v36  ;;  %v2048_v32 = vsel %vm1919_vm10, %v1854_v50, %v1984_v8  ;;  %v1856_v58 = vmul.f32 %v1630_v10, %v6951_v44  ;;  %4218 = vmatprep.mubr.msk.f32.mxu0 %vm343_vm0, %v5722_v36 }
 0x215   : > { %v2047_v39 = vsel %vm1918_vm11, %v1853_v55, %v1983_v63  ;;  %v1855_v46 = vmul.f32 %v1625_v29, %v6952_v38  ;;  %v4125_v21 = vpop.f32.mrb[56].mxu1  ;;  %4219 = vmatmul.mubr.msk.f32.gmra.mrb[50].mxu0 %vm343_vm0, %v5727_v37  ;;  %v5743_v8 = vadd.f32 %v2048_v32, %v6947_v20 }
 0x216   : > { %vm1921_vm12 = vcmp.ge.f32.partialorder %v1856_v58, 0.0  ;;  %v1986_v34 = vmul.f32 %v5564_v60, %v1856_v58  ;;  %v1640_v57 = vadd.f32 %v4125_v21, %v5561_v42  ;;  %v1634_v40 = vpop.f32.mrb[57].mxu1  ;;  %v5738_v28 = vadd.f32 %v2047_v39, %v6948_v59  ;;  %v6954_v21 = vld [vmem:[#allocation54_spill] sm:$0xff] }
 0x217   : > { %vm1920_vm13 = vcmp.ge.f32.partialorder %v1855_v46, 0.0  ;;  %v1985_v50 = vmul.f32 %v5564_v60, %v1855_v46  ;;  %v1635_v55 = vadd.f32 %v5561_v42, %v1634_v40 }
 0x218   : > { %v2050_v10 = vsel %vm1921_vm12, %v1856_v58, %v1986_v34  ;;  %v1858_v63 = vmul.f32 %v1640_v57, %v6953_v26  ;;  %4221 = vmatprep.mubr.msk.f32.mxu0 %vm343_vm0, %v5738_v28 }
 0x219   : > { %v2049_v29 = vsel %vm1920_vm13, %v1855_v46, %v1985_v50  ;;  %v1857_v36 = vmul.f32 %v1635_v55, %v6954_v21  ;;  %v4128_v37 = vpop.f32.mrb[58].mxu1  ;;  %4222 = vmatmul.mubr.msk.f32.gmra.mrb[52].mxu0 %vm343_vm0, %v5743_v8  ;;  %v5759_v34 = vadd.f32 %v2050_v10, %v6951_v44 }
 0x21a   : > { %vm1923_vm14 = vcmp.ge.f32.partialorder %v1858_v63, 0.0  ;;  %v1988_v59 = vmul.f32 %v5564_v60, %v1858_v63  ;;  %v1650_v39 = vadd.f32 %v4128_v37, %v5561_v42  ;;  %v1644_v20 = vpop.f32.mrb[59].mxu1  ;;  %v5754_v32 = vadd.f32 %v2049_v29, %v6952_v38 }
 0x21b   : > { %vm1922_vm15 = vcmp.ge.f32.partialorder %v1857_v36, 0.0  ;;  %v1987_v58 = vmul.f32 %v5564_v60, %v1857_v36  ;;  %v1645_v46 = vadd.f32 %v5561_v42, %v1644_v20 }
 0x21c   : > { %v2052_v57 = vsel %vm1923_vm14, %v1858_v63, %v1988_v59  ;;  %v1860_v40 = vmul.f32 %v1650_v39, %v5221_v30  ;;  %4224 = vmatprep.mubr.msk.f32.mxu0 %vm343_vm0, %v5754_v32 }
 0x21d   : > { %v2051_v50 = vsel %vm1922_vm15, %v1857_v36, %v1987_v58  ;;  %v1859_v37 = vmul.f32 %v1645_v46, %v5229_v14  ;;  %v4131_v55 = vpop.f32.mrb[60].mxu1  ;;  %4225 = vmatmul.mubr.msk.f32.gmra.mrb[54].mxu0 %vm343_vm0, %v5759_v34  ;;  %v5775_v59 = vadd.f32 %v2052_v57, %v6953_v26 }
 0x21e   : > { %vm1925_vm1 = vcmp.ge.f32.partialorder %v1860_v40, 0.0  ;;  %v1990_v38 = vmul.f32 %v5564_v60, %v1860_v40  ;;  %v1660_v29 = vadd.f32 %v4131_v55, %v5561_v42  ;;  %v1654_v44 = vpop.f32.mrb[61].mxu1  ;;  %v5770_v10 = vadd.f32 %v2051_v50, %v6954_v21 }
 0x21f   : > { %vm1924_vm2 = vcmp.ge.f32.partialorder %v1859_v37, 0.0  ;;  %v1989_v63 = vmul.f32 %v5564_v60, %v1859_v37  ;;  %v1655_v36 = vadd.f32 %v5561_v42, %v1654_v44 }
 0x220   : > { %v2054_v39 = vsel %vm1925_vm1, %v1860_v40, %v1990_v38  ;;  %v1862_v20 = vmul.f32 %v1660_v29, %v5246_v53  ;;  %4227 = vmatprep.mubr.msk.f32.mxu0 %vm343_vm0, %v5770_v10 }
 0x221   : > { %v2053_v58 = vsel %vm1924_vm2, %v1859_v37, %v1989_v63  ;;  %v1861_v46 = vmul.f32 %v1655_v36, %v5254_v52  ;;  %v4134_v55 = vpop.f32.mrb[62].mxu1  ;;  %4228 = vmatmul.mubr.msk.f32.gmra.mrb[56].mxu0 %vm343_vm0, %v5775_v59  ;;  %v5791_v38 = vadd.f32 %v2054_v39, %v5221_v30 }
 0x222   : > { %vm1927_vm3 = vcmp.ge.f32.partialorder %v1862_v20, 0.0  ;;  %v1992_v21 = vmul.f32 %v5564_v60, %v1862_v20  ;;  %v1670_v50 = vadd.f32 %v4134_v55, %v5561_v42  ;;  %v1664_v26 = vpop.f32.mrb[63].mxu1  ;;  %v5786_v57 = vadd.f32 %v2053_v58, %v5229_v14 }
 0x223   : > { %vm1926_vm4 = vcmp.ge.f32.partialorder %v1861_v46, 0.0  ;;  %v1991_v40 = vmul.f32 %v5564_v60, %v1861_v46  ;;  %v1665_v37 = vadd.f32 %v5561_v42, %v1664_v26 }
 0x224   : > { %v2056_v29 = vsel %vm1927_vm3, %v1862_v20, %v1992_v21  ;;  %v1864_v44 = vmul.f32 %v1670_v50, %v5272_v62  ;;  %4230 = vmatprep.mubr.msk.f32.mxu0 %vm343_vm0, %v5786_v57 }
 0x225   : > { %v2055_v63 = vsel %vm1926_vm4, %v1861_v46, %v1991_v40  ;;  %v1863_v36 = vmul.f32 %v1665_v37, %v5280_v22  ;;  %v4137_v55 = vpop.f32.mrb[64].mxu1  ;;  %4231 = vmatmul.mubr.msk.f32.gmra.mrb[58].mxu0 %vm343_vm0, %v5791_v38  ;;  %v5807_v21 = vadd.f32 %v2056_v29, %v5246_v53 }
 0x226   : > { %vm1929_vm5 = vcmp.ge.f32.partialorder %v1864_v44, 0.0  ;;  %v1994_v14 = vmul.f32 %v5564_v60, %v1864_v44  ;;  %v1680_v58 = vadd.f32 %v4137_v55, %v5561_v42  ;;  %v1674_v30 = vpop.f32.mrb[65].mxu1  ;;  %v5802_v39 = vadd.f32 %v2055_v63, %v5254_v52 }
 0x227   : > { %vm1928_vm6 = vcmp.ge.f32.partialorder %v1863_v36, 0.0  ;;  %v1993_v20 = vmul.f32 %v5564_v60, %v1863_v36  ;;  %v1675_v46 = vadd.f32 %v5561_v42, %v1674_v30 }
 0x228   : > { %v2058_v50 = vsel %vm1929_vm5, %v1864_v44, %v1994_v14  ;;  %v1866_v26 = vmul.f32 %v1680_v58, %v5298_v4  ;;  %4233 = vmatprep.mubr.msk.f32.mxu0 %vm343_vm0, %v5802_v39 }
 0x229   : > { %v2057_v40 = vsel %vm1928_vm6, %v1863_v36, %v1993_v20  ;;  %v1865_v37 = vmul.f32 %v1675_v46, %v5284_v5  ;;  %v4140_v55 = vpop.f32.mrb[66].mxu1  ;;  %4234 = vmatmul.mubr.msk.f32.gmra.mrb[60].mxu0 %vm343_vm0, %v5807_v21  ;;  %v5823_v14 = vadd.f32 %v2058_v50, %v5272_v62 }
 0x22a   : > { %vm1931_vm7 = vcmp.ge.f32.partialorder %v1866_v26, 0.0  ;;  %v1996_v52 = vmul.f32 %v5564_v60, %v1866_v26  ;;  %v1690_v63 = vadd.f32 %v4140_v55, %v5561_v42  ;;  %v1684_v53 = vpop.f32.mrb[67].mxu1  ;;  %v5818_v29 = vadd.f32 %v2057_v40, %v5280_v22 }
 0x22b   : > { %vm1930_vm8 = vcmp.ge.f32.partialorder %v1865_v37, 0.0  ;;  %v1995_v44 = vmul.f32 %v5564_v60, %v1865_v37  ;;  %v1685_v36 = vadd.f32 %v5561_v42, %v1684_v53 }
 0x22c   : > { %v2060_v58 = vsel %vm1931_vm7, %v1866_v26, %v1996_v52  ;;  %v1868_v30 = vmul.f32 %v1690_v63, %v5318_v45  ;;  %4236 = vmatprep.mubr.msk.f32.mxu0 %vm343_vm0, %v5818_v29 }
 0x22d   : > { %v2059_v20 = vsel %vm1930_vm8, %v1865_v37, %v1995_v44  ;;  %v1867_v46 = vmul.f32 %v1685_v36, %v5307_v9  ;;  %v4143_v55 = vpop.f32.mrb[68].mxu1  ;;  %4237 = vmatmul.mubr.msk.f32.gmra.mrb[62].mxu0 %vm343_vm0, %v5823_v14  ;;  %v5839_v52 = vadd.f32 %v2060_v58, %v5298_v4 }
 0x22e   : > { %vm1933_vm9 = vcmp.ge.f32.partialorder %v1868_v30, 0.0  ;;  %v1998_v22 = vmul.f32 %v5564_v60, %v1868_v30  ;;  %v1700_v40 = vadd.f32 %v4143_v55, %v5561_v42  ;;  %v1694_v62 = vpop.f32.mrb[69].mxu1  ;;  %v5834_v50 = vadd.f32 %v2059_v20, %v5284_v5 }
 0x22f   : > { %vm1932_vm10 = vcmp.ge.f32.partialorder %v1867_v46, 0.0  ;;  %v1997_v26 = vmul.f32 %v5564_v60, %v1867_v46  ;;  %v1695_v37 = vadd.f32 %v5561_v42, %v1694_v62 }
 0x230   : > { %v2062_v63 = vsel %vm1933_vm9, %v1868_v30, %v1998_v22  ;;  %v1870_v53 = vmul.f32 %v1700_v40, %v5335_v25  ;;  %4239 = vmatprep.mubr.msk.f32.mxu0 %vm343_vm0, %v5834_v50 }
 0x231   : > { %v2061_v44 = vsel %vm1932_vm10, %v1867_v46, %v1997_v26  ;;  %v1869_v36 = vmul.f32 %v1695_v37, %v5323_v2  ;;  %v4146_v55 = vpop.f32.mrb[70].mxu1  ;;  %4240 = vmatmul.mubr.msk.f32.gmra.mrb[64].mxu0 %vm343_vm0, %v5839_v52  ;;  %v5855_v22 = vadd.f32 %v2062_v63, %v5318_v45 }
 0x232   : > { %vm1935_vm11 = vcmp.ge.f32.partialorder %v1870_v53, 0.0  ;;  %v2000_v5 = vmul.f32 %v5564_v60, %v1870_v53  ;;  %v1710_v20 = vadd.f32 %v4146_v55, %v5561_v42  ;;  %v1704_v4 = vpop.f32.mrb[71].mxu1  ;;  %v5850_v58 = vadd.f32 %v2061_v44, %v5307_v9 }
 0x233   : > { %vm1934_vm12 = vcmp.ge.f32.partialorder %v1869_v36, 0.0  ;;  %v1999_v30 = vmul.f32 %v5564_v60, %v1869_v36  ;;  %v1705_v46 = vadd.f32 %v5561_v42, %v1704_v4 }
 0x234   : > { %v2064_v40 = vsel %vm1935_vm11, %v1870_v53, %v2000_v5  ;;  %v1872_v62 = vmul.f32 %v1710_v20, %v5352_v61  ;;  %4242 = vmatprep.mubr.msk.f32.mxu0 %vm343_vm0, %v5850_v58 }
 0x235   : > { %v2063_v26 = vsel %vm1934_vm12, %v1869_v36, %v1999_v30  ;;  %v1871_v37 = vmul.f32 %v1705_v46, %v5341_v6  ;;  %v4149_v55 = vpop.f32.mrb[72].mxu1  ;;  %4243 = vmatmul.mubr.msk.f32.gmra.mrb[66].mxu0 %vm343_vm0, %v5855_v22  ;;  %v5871_v5 = vadd.f32 %v2064_v40, %v5335_v25 }
 0x236   : > { %vm1937_vm13 = vcmp.ge.f32.partialorder %v1872_v62, 0.0  ;;  %v2002_v9 = vmul.f32 %v5564_v60, %v1872_v62  ;;  %v1720_v44 = vadd.f32 %v4149_v55, %v5561_v42  ;;  %v1714_v45 = vpop.f32.mrb[73].mxu1  ;;  %v5866_v63 = vadd.f32 %v2063_v26, %v5323_v2 }
 0x237   : > { %vm1936_vm14 = vcmp.ge.f32.partialorder %v1871_v37, 0.0  ;;  %v2001_v53 = vmul.f32 %v5564_v60, %v1871_v37  ;;  %v1715_v36 = vadd.f32 %v5561_v42, %v1714_v45 }
 0x238   : > { %v2066_v20 = vsel %vm1937_vm13, %v1872_v62, %v2002_v9  ;;  %v1874_v4 = vmul.f32 %v1720_v44, %v5371_v3  ;;  %4245 = vmatprep.mubr.msk.f32.mxu0 %vm343_vm0, %v5866_v63 }
 0x239   : > { %v2065_v30 = vsel %vm1936_vm14, %v1871_v37, %v2001_v53  ;;  %v1873_v46 = vmul.f32 %v1715_v36, %v5361_v13  ;;  %v4152_v55 = vpop.f32.mrb[74].mxu1  ;;  %4246 = vmatmul.mubr.msk.f32.gmra.mrb[68].mxu0 %vm343_vm0, %v5871_v5  ;;  %v5887_v9 = vadd.f32 %v2066_v20, %v5352_v61 }
 0x23a   : > { %vm1939_vm15 = vcmp.ge.f32.partialorder %v1874_v4, 0.0  ;;  %v2004_v2 = vmul.f32 %v5564_v60, %v1874_v4  ;;  %v1730_v26 = vadd.f32 %v4152_v55, %v5561_v42  ;;  %v1724_v25 = vpop.f32.mrb[75].mxu1  ;;  %v5882_v40 = vadd.f32 %v2065_v30, %v5341_v6 }
 0x23b   : > { %vm1938_vm1 = vcmp.ge.f32.partialorder %v1873_v46, 0.0  ;;  %v2003_v62 = vmul.f32 %v5564_v60, %v1873_v46  ;;  %v1725_v37 = vadd.f32 %v5561_v42, %v1724_v25 }
 0x23c   : > { %v2068_v44 = vsel %vm1939_vm15, %v1874_v4, %v2004_v2  ;;  %v1876_v45 = vmul.f32 %v1730_v26, %v5390_v48  ;;  %4248 = vmatprep.mubr.msk.f32.mxu0 %vm343_vm0, %v5882_v40 }
 0x23d   : > { %v2067_v53 = vsel %vm1938_vm1, %v1873_v46, %v2003_v62  ;;  %v1875_v36 = vmul.f32 %v1725_v37, %v5379_v17  ;;  %v4155_v55 = vpop.f32.mrb[76].mxu1  ;;  %4249 = vmatmul.mubr.msk.f32.gmra.mrb[70].mxu0 %vm343_vm0, %v5887_v9  ;;  %v5903_v2 = vadd.f32 %v2068_v44, %v5371_v3 }
 0x23e   : > { %vm1941_vm2 = vcmp.ge.f32.partialorder %v1876_v45, 0.0  ;;  %v2006_v6 = vmul.f32 %v5564_v60, %v1876_v45  ;;  %v1740_v30 = vadd.f32 %v4155_v55, %v5561_v42  ;;  %v1734_v61 = vpop.f32.mrb[77].mxu1  ;;  %v5898_v20 = vadd.f32 %v2067_v53, %v5361_v13 }
 0x23f   : > { %vm1940_vm3 = vcmp.ge.f32.partialorder %v1875_v36, 0.0  ;;  %v2005_v4 = vmul.f32 %v5564_v60, %v1875_v36  ;;  %v1735_v46 = vadd.f32 %v5561_v42, %v1734_v61 }
 0x240   : > { %v2070_v26 = vsel %vm1941_vm2, %v1876_v45, %v2006_v6  ;;  %v1878_v25 = vmul.f32 %v1740_v30, %v5413_v19  ;;  %4251 = vmatprep.mubr.msk.f32.mxu0 %vm343_vm0, %v5898_v20 }
 0x241   : > { %v2069_v62 = vsel %vm1940_vm3, %v1875_v36, %v2005_v4  ;;  %v1877_v37 = vmul.f32 %v1735_v46, %v5395_v11  ;;  %v4158_v55 = vpop.f32.mrb[78].mxu1  ;;  %4252 = vmatmul.mubr.msk.f32.gmra.mrb[72].mxu0 %vm343_vm0, %v5903_v2  ;;  %v5919_v6 = vadd.f32 %v2070_v26, %v5390_v48 }
 0x242   : > { %vm1943_vm4 = vcmp.ge.f32.partialorder %v1878_v25, 0.0  ;;  %v2008_v13 = vmul.f32 %v5564_v60, %v1878_v25  ;;  %v1750_v53 = vadd.f32 %v4158_v55, %v5561_v42  ;;  %v1744_v3 = vpop.f32.mrb[79].mxu1  ;;  %v5914_v44 = vadd.f32 %v2069_v62, %v5379_v17 }
 0x243   : > { %vm1942_vm5 = vcmp.ge.f32.partialorder %v1877_v37, 0.0  ;;  %v2007_v45 = vmul.f32 %v5564_v60, %v1877_v37  ;;  %v1745_v36 = vadd.f32 %v5561_v42, %v1744_v3 }
 0x244   : > { %v2072_v30 = vsel %vm1943_vm4, %v1878_v25, %v2008_v13  ;;  %v1880_v61 = vmul.f32 %v1750_v53, %v5430_v47  ;;  %4254 = vmatprep.mubr.msk.f32.mxu0 %vm343_vm0, %v5914_v44 }
 0x245   : > { %v2071_v4 = vsel %vm1942_vm5, %v1877_v37, %v2007_v45  ;;  %v1879_v46 = vmul.f32 %v1745_v36, %v5419_v31  ;;  %v4161_v55 = vpop.f32.mrb[80].mxu1  ;;  %4255 = vmatmul.mubr.msk.f32.gmra.mrb[74].mxu0 %vm343_vm0, %v5919_v6  ;;  %v5935_v13 = vadd.f32 %v2072_v30, %v5413_v19 }
 0x246   : > { %vm1945_vm6 = vcmp.ge.f32.partialorder %v1880_v61, 0.0  ;;  %v2010_v17 = vmul.f32 %v5564_v60, %v1880_v61  ;;  %v1760_v62 = vadd.f32 %v4161_v55, %v5561_v42  ;;  %v1754_v48 = vpop.f32.mrb[81].mxu1  ;;  %v5930_v26 = vadd.f32 %v2071_v4, %v5395_v11 }
 0x247   : > { %vm1944_vm7 = vcmp.ge.f32.partialorder %v1879_v46, 0.0  ;;  %v2009_v25 = vmul.f32 %v5564_v60, %v1879_v46  ;;  %v1755_v37 = vadd.f32 %v5561_v42, %v1754_v48 }
 0x248   : > { %v2074_v53 = vsel %vm1945_vm6, %v1880_v61, %v2010_v17  ;;  %v1882_v3 = vmul.f32 %v1760_v62, %v5449_v49  ;;  %4257 = vmatprep.mubr.msk.f32.mxu0 %vm343_vm0, %v5930_v26 }
 0x249   : > { %v2073_v45 = vsel %vm1944_vm7, %v1879_v46, %v2009_v25  ;;  %v1881_v36 = vmul.f32 %v1755_v37, %v5439_v12  ;;  %v4164_v55 = vpop.f32.mrb[82].mxu1  ;;  %4258 = vmatmul.mubr.msk.f32.gmra.mrb[76].mxu0 %vm343_vm0, %v5935_v13  ;;  %v5951_v17 = vadd.f32 %v2074_v53, %v5430_v47 }
 0x24a   : > { %vm1947_vm8 = vcmp.ge.f32.partialorder %v1882_v3, 0.0  ;;  %v2012_v11 = vmul.f32 %v5564_v60, %v1882_v3  ;;  %v1770_v4 = vadd.f32 %v4164_v55, %v5561_v42  ;;  %v1764_v19 = vpop.f32.mrb[83].mxu1  ;;  %v5946_v30 = vadd.f32 %v2073_v45, %v5419_v31 }
 0x24b   : > { %vm1946_vm9 = vcmp.ge.f32.partialorder %v1881_v36, 0.0  ;;  %v2011_v61 = vmul.f32 %v5564_v60, %v1881_v36  ;;  %v1765_v46 = vadd.f32 %v5561_v42, %v1764_v19 }
 0x24c   : > { %v2076_v62 = vsel %vm1947_vm8, %v1882_v3, %v2012_v11  ;;  %v1884_v48 = vmul.f32 %v1770_v4, %v5468_v33  ;;  %4260 = vmatprep.mubr.msk.f32.mxu0 %vm343_vm0, %v5946_v30 }
 0x24d   : > { %v2075_v25 = vsel %vm1946_vm9, %v1881_v36, %v2011_v61  ;;  %v1883_v37 = vmul.f32 %v1765_v46, %v5457_v51  ;;  %v4167_v55 = vpop.f32.mrb[84].mxu1  ;;  %4261 = vmatmul.mubr.msk.f32.gmra.mrb[78].mxu0 %vm343_vm0, %v5951_v17  ;;  %v5967_v11 = vadd.f32 %v2076_v62, %v5449_v49 }
 0x24e   : > { %vm1949_vm10 = vcmp.ge.f32.partialorder %v1884_v48, 0.0  ;;  %v2014_v31 = vmul.f32 %v5564_v60, %v1884_v48  ;;  %v1780_v45 = vadd.f32 %v4167_v55, %v5561_v42  ;;  %v1774_v47 = vpop.f32.mrb[85].mxu1  ;;  %v5962_v53 = vadd.f32 %v2075_v25, %v5439_v12 }
 0x24f   : > { %vm1948_vm11 = vcmp.ge.f32.partialorder %v1883_v37, 0.0  ;;  %v2013_v3 = vmul.f32 %v5564_v60, %v1883_v37  ;;  %v1775_v36 = vadd.f32 %v5561_v42, %v1774_v47 }
 0x250   : > { %v2078_v4 = vsel %vm1949_vm10, %v1884_v48, %v2014_v31  ;;  %v1886_v19 = vmul.f32 %v1780_v45, %v5485_v0  ;;  %4263 = vmatprep.mubr.msk.f32.mxu0 %vm343_vm0, %v5962_v53 }
 0x251   : > { %v2077_v61 = vsel %vm1948_vm11, %v1883_v37, %v2013_v3  ;;  %v1885_v46 = vmul.f32 %v1775_v36, %v5473_v54  ;;  %v4170_v55 = vpop.f32.mrb[86].mxu1  ;;  %4264 = vmatmul.mubr.msk.f32.gmra.mrb[80].mxu0 %vm343_vm0, %v5967_v11  ;;  %v5983_v31 = vadd.f32 %v2078_v4, %v5468_v33 }
 0x252   : > { %vm1951_vm12 = vcmp.ge.f32.partialorder %v1886_v19, 0.0  ;;  %v2016_v12 = vmul.f32 %v5564_v60, %v1886_v19  ;;  %v1790_v25 = vadd.f32 %v4170_v55, %v5561_v42  ;;  %v1784_v49 = vpop.f32.mrb[87].mxu1  ;;  %v5978_v62 = vadd.f32 %v2077_v61, %v5457_v51 }
 0x253   : > { %vm1950_vm13 = vcmp.ge.f32.partialorder %v1885_v46, 0.0  ;;  %v2015_v48 = vmul.f32 %v5564_v60, %v1885_v46  ;;  %v1785_v37 = vadd.f32 %v5561_v42, %v1784_v49 }
 0x254   : > { %v2080_v45 = vsel %vm1951_vm12, %v1886_v19, %v2016_v12  ;;  %v1888_v47 = vmul.f32 %v1790_v25, %v5502_v41  ;;  %4266 = vmatprep.mubr.msk.f32.mxu0 %vm343_vm0, %v5978_v62 }
 0x255   : > { %v2079_v3 = vsel %vm1950_vm13, %v1885_v46, %v2015_v48  ;;  %v1887_v36 = vmul.f32 %v1785_v37, %v5491_v56  ;;  %v4173_v55 = vpop.f32.mrb[88].mxu1  ;;  %4267 = vmatmul.mubr.msk.f32.gmra.mrb[82].mxu0 %vm343_vm0, %v5983_v31  ;;  %v5999_v12 = vadd.f32 %v2080_v45, %v5485_v0 }
 0x256   : > { %vm1953_vm14 = vcmp.ge.f32.partialorder %v1888_v47, 0.0  ;;  %v2018_v51 = vmul.f32 %v5564_v60, %v1888_v47  ;;  %v1800_v61 = vadd.f32 %v4173_v55, %v5561_v42  ;;  %v1794_v33 = vpop.f32.mrb[89].mxu1  ;;  %v5994_v4 = vadd.f32 %v2079_v3, %v5473_v54 }
 0x257   : > { %vm1952_vm15 = vcmp.ge.f32.partialorder %v1887_v36, 0.0  ;;  %v2017_v19 = vmul.f32 %v5564_v60, %v1887_v36  ;;  %v1795_v46 = vadd.f32 %v5561_v42, %v1794_v33 }
 0x258   : > { %v2082_v25 = vsel %vm1953_vm14, %v1888_v47, %v2018_v51  ;;  %v1890_v49 = vmul.f32 %v1800_v61, %v5518_v15  ;;  %4269 = vmatprep.mubr.msk.f32.mxu0 %vm343_vm0, %v5994_v4 }
 0x259   : > { %v2081_v48 = vsel %vm1952_vm15, %v1887_v36, %v2017_v19  ;;  %v1889_v37 = vmul.f32 %v1795_v46, %v5509_v7  ;;  %v4176_v55 = vpop.f32.mrb[90].mxu1  ;;  %4270 = vmatmul.mubr.msk.f32.gmra.mrb[84].mxu0 %vm343_vm0, %v5999_v12  ;;  %v6015_v51 = vadd.f32 %v2082_v25, %v5502_v41 }
 0x25a   : > { %vm1955_vm1 = vcmp.ge.f32.partialorder %v1890_v49, 0.0  ;;  %v2020_v54 = vmul.f32 %v5564_v60, %v1890_v49  ;;  %v1810_v3 = vadd.f32 %v4176_v55, %v5561_v42  ;;  %v1804_v0 = vpop.f32.mrb[91].mxu1  ;;  %v6010_v45 = vadd.f32 %v2081_v48, %v5491_v56 }
 0x25b   : > { %vm1954_vm2 = vcmp.ge.f32.partialorder %v1889_v37, 0.0  ;;  %v2019_v47 = vmul.f32 %v5564_v60, %v1889_v37  ;;  %v1805_v36 = vadd.f32 %v5561_v42, %v1804_v0  ;;  %6956 = vst [vmem:[#allocation28_spill] sm:$0xff] %v6015_v51 }
 0x25c   : > { %6955 = vst [vmem:[#allocation27_spill] sm:$0xff] %v6010_v45  ;;  %v2084_v61 = vsel %vm1955_vm1, %v1890_v49, %v2020_v54  ;;  %v1892_v33 = vmul.f32 %v1810_v3, %v5531_v35  ;;  %4272 = vmatprep.mubr.msk.f32.mxu0 %vm343_vm0, %v6010_v45 }
 0x25d   : > { %v2083_v19 = vsel %vm1954_vm2, %v1889_v37, %v2019_v47  ;;  %v1891_v46 = vmul.f32 %v1805_v36, %v5525_v23  ;;  %v4179_v55 = vpop.f32.mrb[92].mxu1  ;;  %4273 = vmatmul.mubr.msk.f32.gmra.mrb[86].mxu0 %vm343_vm0, %v6015_v51  ;;  %v6031_v54 = vadd.f32 %v2084_v61, %v5518_v15 }
 0x25e   : > { %vm1957_vm3 = vcmp.ge.f32.partialorder %v1892_v33, 0.0  ;;  %v2022_v56 = vmul.f32 %v5564_v60, %v1892_v33  ;;  %v1820_v48 = vadd.f32 %v4179_v55, %v5561_v42  ;;  %v1814_v41 = vpop.f32.mrb[93].mxu1  ;;  %v6026_v25 = vadd.f32 %v2083_v19, %v5509_v7 }
 0x25f   : > { %vm1956_vm4 = vcmp.ge.f32.partialorder %v1891_v46, 0.0  ;;  %v2021_v49 = vmul.f32 %v5564_v60, %v1891_v46  ;;  %v1815_v37 = vadd.f32 %v5561_v42, %v1814_v41  ;;  %6958 = vst [vmem:[#allocation30_spill] sm:$0xff] %v6031_v54 }
 0x260   : > { %6957 = vst [vmem:[#allocation29_spill] sm:$0xff] %v6026_v25  ;;  %v2086_v3 = vsel %vm1957_vm3, %v1892_v33, %v2022_v56  ;;  %v1894_v0 = vmul.f32 %v1820_v48, %v5542_v27  ;;  %4275 = vmatprep.mubr.msk.f32.mxu0 %vm343_vm0, %v6026_v25 }
 0x261   : > { %v2085_v47 = vsel %vm1956_vm4, %v1891_v46, %v2021_v49  ;;  %v1893_v36 = vmul.f32 %v1815_v37, %v5537_v24  ;;  %v4182_v55 = vpop.f32.mrb[94].mxu1  ;;  %4276 = vmatmul.mubr.msk.f32.gmra.mrb[88].mxu0 %vm343_vm0, %v6031_v54  ;;  %v6047_v56 = vadd.f32 %v2086_v3, %v5531_v35 }
 0x262   : > { %vm1959_vm5 = vcmp.ge.f32.partialorder %v1894_v0, 0.0  ;;  %v2024_v7 = vmul.f32 %v5564_v60, %v1894_v0  ;;  %v1830_v19 = vadd.f32 %v4182_v55, %v5561_v42  ;;  %v1824_v15 = vpop.f32.mrb[95].mxu1  ;;  %v6042_v61 = vadd.f32 %v2085_v47, %v5525_v23 }
 0x263   : > { %vm1958_vm6 = vcmp.ge.f32.partialorder %v1893_v36, 0.0  ;;  %v2023_v33 = vmul.f32 %v5564_v60, %v1893_v36  ;;  %v1825_v46 = vadd.f32 %v5561_v42, %v1824_v15  ;;  %6960 = vst [vmem:[#allocation31_spill] sm:$0xff] %v6047_v56 }
 0x264   : > { %6959 = vst [vmem:[#allocation32_spill] sm:$0xff] %v6042_v61  ;;  %v2088_v48 = vsel %vm1959_vm5, %v1894_v0, %v2024_v7  ;;  %v1896_v41 = vmul.f32 %v1830_v19, %v5552_v43  ;;  %4278 = vmatprep.mubr.msk.f32.mxu0 %vm343_vm0, %v6042_v61  ;;  %v6083_v7 = vstv %s3763_s16 }
 0x265   : > { %v2087_v49 = vsel %vm1958_vm6, %v1893_v36, %v2023_v33  ;;  %v1895_v37 = vmul.f32 %v1825_v46, %v5547_v1  ;;  %4279 = vmatmul.mubr.msk.f32.gmra.mrb[90].mxu0 %vm343_vm0, %v6047_v56  ;;  %v6061_v3 = vadd.f32 %v2088_v48, %v5542_v27  ;;  %v6080_v27 = vld [vmem:[%s6698_s2 + $0x2] ss:$0 sm:$0xff] }
 0x266   : > { %vm1961_vm7 = vcmp.ge.f32.partialorder %v1896_v41, 0.0  ;;  %v2026_v23 = vmul.f32 %v5564_v60, %v1896_v41  ;;  %v6057_v42 = vadd.f32 %v2087_v49, %v5537_v24 }
 0x267   : > { %vm1960_vm8 = vcmp.ge.f32.partialorder %v1895_v37, 0.0  ;;  %v2025_v35 = vmul.f32 %v5564_v60, %v1895_v37  ;;  %6962 = vst [vmem:[#allocation34_spill] sm:$0xff] %v6061_v3 }
 0x268   : > { %6961 = vst [vmem:[#allocation33_spill] sm:$0xff] %v6057_v42  ;;  %v2090_v0 = vsel %vm1961_vm7, %v1896_v41, %v2026_v23  ;;  %4281 = vmatprep.mubr.msk.f32.mxu0 %vm343_vm0, %v6057_v42  ;;  %v6965_v23 = vld [vmem:[#allocation10_spill] sm:$0xff] }
 0x269   : > { %v2089_v47 = vsel %vm1960_vm8, %v1895_v37, %v2025_v35  ;;  %4282 = vmatmul.mubr.msk.f32.gmra.mrb[92].mxu0 %vm343_vm0, %v6061_v3  ;;  %v6071_v24 = vadd.f32 %v2090_v0, %v5552_v43 }
 0x26a   : > { %v6068_v36 = vadd.f32 %v2089_v47, %v5547_v1  ;;  %v6096_v47 = vld [vmem:[%s6700_s4] ss:$0 sm:$0xff] }
 0x26b   : > { %6964 = vst [vmem:[#allocation36_spill] sm:$0xff] %v6071_v24 }
 0x26c   : > { %6963 = vst [vmem:[#allocation35_spill] sm:$0xff] %v6068_v36  ;;  %4284 = vmatprep.mubr.msk.f32.mxu0 %vm343_vm0, %v6068_v36 }
 0x26d   : > { %4285 = vmatmul.mubr.msk.f32.gmra.mrb[94].mxu0 %vm343_vm0, %v6071_v24 }
 0x2c4   : > { %v4193_v60 = vpop.f32.mrb[32].mxu0 }
 0x2c5   : > { %v2432_v55 = vadd.f32 %v4193_v60, %v6080_v27  ;;  %v2426_v1 = vpop.f32.mrb[33].mxu0  ;;  %v6966_v60 = vld [vmem:[#allocation9_spill] sm:$0xff] }
 0x2c6   : > { %v2427_v43 = vadd.f32 %v6080_v27, %v2426_v1 }
 0x2c7   : > { %v2746_v19 = vmul.f32 %v2432_v55, %v5581_v16 }
 0x2c8   : > { %v2745_v15 = vmul.f32 %v2427_v43, %v5578_v18  ;;  %v4196_v33 = vpop.f32.mrb[34].mxu0 }
 0x2c9   : > { %v2876_v46 = vmul.f32 %v6083_v7, %v2746_v19  ;;  %v2442_v48 = vadd.f32 %v4196_v33, %v6080_v27  ;;  %v2436_v41 = vpop.f32.mrb[35].mxu0  ;;  %vm2811_vm9 = vcmp.ge.f32.partialorder %v2746_v19, 0.0 }
 0x2ca   : > { %vm2810_vm10 = vcmp.ge.f32.partialorder %v2745_v15, 0.0  ;;  %v2875_v49 = vmul.f32 %v6083_v7, %v2745_v15  ;;  %v2437_v37 = vadd.f32 %v6080_v27, %v2436_v41 }
 0x2cb   : > { %v2748_v35 = vmul.f32 %v2442_v48, %v6965_v23  ;;  %v2940_v0 = vsel %vm2811_vm9, %v2746_v19, %v2876_v46 }
 0x2cc   : > { %v2747_v55 = vmul.f32 %v2437_v37, %v6966_v60  ;;  %v4199_v1 = vpop.f32.mrb[36].mxu0  ;;  %v3004_v43 = vadd.f32 %v2940_v0, %v5581_v16  ;;  %v2939_v33 = vsel %vm2810_vm10, %v2745_v15, %v2875_v49  ;;  %v6967_v37 = vld [vmem:[#allocation12_spill] sm:$0xff]  ;;  %v6968_v15 = vld [vmem:[#allocation11_spill] sm:$0xff] }
 0x2cd   : > { %v2878_v36 = vmul.f32 %v6083_v7, %v2748_v35  ;;  %v2452_v24 = vadd.f32 %v4199_v1, %v6080_v27  ;;  %v2446_v42 = vpop.f32.mrb[37].mxu0  ;;  %vm2813_vm11 = vcmp.ge.f32.partialorder %v2748_v35, 0.0  ;;  %v3003_v48 = vadd.f32 %v2939_v33, %v5578_v18 }
 0x2ce   : > { %vm2812_vm12 = vcmp.ge.f32.partialorder %v2747_v55, 0.0  ;;  %v2877_v19 = vmul.f32 %v6083_v7, %v2747_v55  ;;  %v2447_v46 = vadd.f32 %v6080_v27, %v2446_v42  ;;  %v3075_v41 = vmul.f32 %v6096_v47, %v3004_v43 }
 0x2cf   : > { %v2750_v3 = vmul.f32 %v2452_v24, %v6967_v37  ;;  %v2942_v61 = vsel %vm2813_vm11, %v2748_v35, %v2878_v36  ;;  %v3074_v16 = vmul.f32 %v6096_v47, %v3003_v48  ;;  %v6969_v48 = vld [vmem:[#allocation14_spill] sm:$0xff] }
 0x2d0   : > { %v2749_v49 = vmul.f32 %v2447_v46, %v6968_v15  ;;  %v4202_v0 = vpop.f32.mrb[38].mxu0  ;;  %v3141_v1 = vsel %vm343_vm0, %v3075_v41, 0.0  ;;  %v3006_v56 = vadd.f32 %v2942_v61, %v6965_v23  ;;  %v2941_v18 = vsel %vm2812_vm12, %v2747_v55, %v2877_v19  ;;  %v6970_v55 = vld [vmem:[#allocation13_spill] sm:$0xff] }
 0x2d1   : > { %vm2815_vm13 = vcmp.ge.f32.partialorder %v2750_v3, 0.0  ;;  %v2880_v33 = vmul.f32 %v6083_v7, %v2750_v3  ;;  %v2462_v42 = vadd.f32 %v4202_v0, %v6080_v27  ;;  %3142 = vadd.xlane.f32.xlu0 %v3141_v1  ;;  %v2456_v43 = vpop.f32.mrb[39].mxu0  ;;  %v3138_v41 = vsel %vm343_vm0, %v3074_v16, 0.0 }
 0x2d2   : > { %vm2814_vm14 = vcmp.ge.f32.partialorder %v2749_v49, 0.0  ;;  %v2879_v36 = vmul.f32 %v6083_v7, %v2749_v49  ;;  %v2457_v24 = vadd.f32 %v6080_v27, %v2456_v43  ;;  %v3077_v35 = vmul.f32 %v6096_v47, %v3006_v56 }
 0x2d3   : > { %v2752_v46 = vmul.f32 %v2462_v42, %v6969_v48  ;;  %v3005_v61 = vadd.f32 %v2941_v18, %v6966_v60  ;;  %v2944_v23 = vsel %vm2815_vm13, %v2750_v3, %v2880_v33 }
 0x2d4   : > { %v2751_v19 = vmul.f32 %v2457_v24, %v6970_v55  ;;  %v4205_v25 = vpop.f32.mrb[40].mxu0  ;;  %v3147_v0 = vsel %vm343_vm0, %v3077_v35, 0.0  ;;  %v2943_v1 = vsel %vm2814_vm14, %v2749_v49, %v2879_v36  ;;  %v3008_v54 = vadd.f32 %v2944_v23, %v6967_v37  ;;  %v6971_v49 = vld [vmem:[#allocation16_spill] sm:$0xff] }
 0x2d5   : > { %vm2817_vm15 = vcmp.ge.f32.partialorder %v2752_v46, 0.0  ;;  %v2882_v43 = vmul.f32 %v6083_v7, %v2752_v46  ;;  %v2472_v56 = vadd.f32 %v4205_v25, %v6080_v27  ;;  %3148 = vadd.xlane.f32.xlu1 %v3147_v0  ;;  %v2466_v42 = vpop.f32.mrb[41].mxu0  ;;  %3139 = vadd.xlane.f32.xlu0 %v3138_v41  ;;  %v3076_v16 = vmul.f32 %v6096_v47, %v3005_v61  ;;  %v6972_v25 = vld [vmem:[#allocation15_spill] sm:$0xff] }
 0x2d6   : > { %vm2816_vm1 = vcmp.ge.f32.partialorder %v2751_v19, 0.0  ;;  %v2881_v3 = vmul.f32 %v6083_v7, %v2751_v19  ;;  %v2467_v60 = vadd.f32 %v6080_v27, %v2466_v42  ;;  %v3007_v18 = vadd.f32 %v2943_v1, %v6968_v15 }
 0x2d7   : > { %v2754_v33 = vmul.f32 %v2472_v56, %v6971_v49  ;;  %v3144_v37 = vsel %vm343_vm0, %v3076_v16, 0.0  ;;  %v3079_v36 = vmul.f32 %v6096_v47, %v3008_v54  ;;  %v2946_v24 = vsel %vm2817_vm15, %v2752_v46, %v2882_v43  ;;  %v6973_v43 = vld [vmem:[#allocation18_spill] sm:$0xff] }
 0x2d8   : > { %v2753_v35 = vmul.f32 %v2467_v60, %v6972_v25  ;;  %v4208_v23 = vpop.f32.mrb[42].mxu0  ;;  %v3078_v41 = vmul.f32 %v6096_v47, %v3007_v18  ;;  %v2945_v61 = vsel %vm2816_vm1, %v2751_v19, %v2881_v3  ;;  %v3010_v0 = vadd.f32 %v2946_v24, %v6969_v48  ;;  %v6974_v60 = vld [vmem:[#allocation17_spill] sm:$0xff] }
 0x2d9   : > { %vm2819_vm2 = vcmp.ge.f32.partialorder %v2754_v33, 0.0  ;;  %v2884_v42 = vmul.f32 %v6083_v7, %v2754_v33  ;;  %v2482_v15 = vadd.f32 %v4208_v23, %v6080_v27  ;;  %v2476_v1 = vpop.f32.mrb[43].mxu0  ;;  %3145 = vadd.xlane.f32.xlu1 %v3144_v37  ;;  %v3009_v19 = vadd.f32 %v2945_v61, %v6970_v55 }
 0x2da   : > { %vm2818_vm3 = vcmp.ge.f32.partialorder %v2753_v35, 0.0  ;;  %v2883_v56 = vmul.f32 %v6083_v7, %v2753_v35  ;;  %v2477_v54 = vadd.f32 %v6080_v27, %v2476_v1  ;;  %v3150_v46 = vsel %vm343_vm0, %v3078_v41, 0.0 }
 0x2db   : > { %v2756_v16 = vmul.f32 %v2482_v15, %v6973_v43  ;;  %3151 = vadd.xlane.f32.xlu0 %v3150_v46  ;;  %v3081_v48 = vmul.f32 %v6096_v47, %v3010_v0  ;;  %v2948_v3 = vsel %vm2819_vm2, %v2754_v33, %v2884_v42  ;;  %v3153_v37 = vsel %vm343_vm0, %v3079_v36, 0.0  ;;  %v6975_v0 = vld [vmem:[#allocation20_spill] sm:$0xff] }
 0x2dc   : > { %v2755_v18 = vmul.f32 %v2477_v54, %v6974_v60  ;;  %v4211_v24 = vpop.f32.mrb[44].mxu0  ;;  %v2947_v23 = vsel %vm2818_vm3, %v2753_v35, %v2883_v56  ;;  %v3012_v45 = vadd.f32 %v2948_v3, %v6971_v49  ;;  %v3080_v55 = vmul.f32 %v6096_v47, %v3009_v19  ;;  %v6976_v56 = vld [vmem:[#allocation19_spill] sm:$0xff] }
 0x2dd   : > { %vm2821_vm4 = vcmp.ge.f32.partialorder %v2756_v16, 0.0  ;;  %v2886_v1 = vmul.f32 %v6083_v7, %v2756_v16  ;;  %v2492_v41 = vadd.f32 %v4211_v24, %v6080_v27  ;;  %v2486_v15 = vpop.f32.mrb[45].mxu0  ;;  %3154 = vadd.xlane.f32.xlu1 %v3153_v37  ;;  %v3159_v49 = vsel %vm343_vm0, %v3081_v48, 0.0 }
 0x2de   : > { %vm2820_vm5 = vcmp.ge.f32.partialorder %v2755_v18, 0.0  ;;  %v2885_v33 = vmul.f32 %v6083_v7, %v2755_v18  ;;  %v2487_v61 = vadd.f32 %v6080_v27, %v2486_v15  ;;  %v3156_v36 = vsel %vm343_vm0, %v3080_v55, 0.0  ;;  %v6977_v55 = vld [vmem:[#allocation22_spill] sm:$0xff] }
 0x2df   : > { %v2758_v42 = vmul.f32 %v2492_v41, %v6975_v0  ;;  %v3011_v35 = vadd.f32 %v2947_v23, %v6972_v25  ;;  %3157 = vadd.xlane.f32.xlu0 %v3156_v36  ;;  %v3083_v3 = vmul.f32 %v6096_v47, %v3012_v45  ;;  %v2950_v24 = vsel %vm2821_vm4, %v2756_v16, %v2886_v1  ;;  %v6978_v1 = vld [vmem:[#allocation21_spill] sm:$0xff] }
 0x2e0   : > { %v2757_v54 = vmul.f32 %v2487_v61, %v6976_v56  ;;  %v4214_v46 = vpop.f32.mrb[46].mxu0  ;;  %v2949_v19 = vsel %vm2820_vm5, %v2755_v18, %v2885_v33  ;;  %v3014_v18 = vadd.f32 %v2950_v24, %v6973_v43 }
 0x2e1   : > { %vm2823_vm6 = vcmp.ge.f32.partialorder %v2758_v42, 0.0  ;;  %v2888_v37 = vmul.f32 %v6083_v7, %v2758_v42  ;;  %v2502_v41 = vadd.f32 %v4214_v46, %v6080_v27  ;;  %v2496_v15 = vpop.f32.mrb[47].mxu0  ;;  %3160 = vadd.xlane.f32.xlu1 %v3159_v49  ;;  %v3082_v48 = vmul.f32 %v6096_v47, %v3011_v35 }
 0x2e2   : > { %vm2822_vm7 = vcmp.ge.f32.partialorder %v2757_v54, 0.0  ;;  %v2887_v25 = vmul.f32 %v6083_v7, %v2757_v54  ;;  %v2497_v23 = vadd.f32 %v6080_v27, %v2496_v15  ;;  %v3013_v16 = vadd.f32 %v2949_v19, %v6974_v60 }
 0x2e3   : > { %v2760_v61 = vmul.f32 %v2502_v41, %v6977_v55  ;;  %v3162_v45 = vsel %vm343_vm0, %v3082_v48, 0.0  ;;  %v3165_v49 = vsel %vm343_vm0, %v3083_v3, 0.0  ;;  %v2952_v46 = vsel %vm2823_vm6, %v2758_v42, %v2888_v37  ;;  %v6979_v3 = vld [vmem:[#allocation24_spill] sm:$0xff] }
 0x2e4   : > { %v2759_v33 = vmul.f32 %v2497_v23, %v6978_v1  ;;  %3163 = vadd.xlane.f32.xlu0 %v3162_v45  ;;  %v4217_v36 = vpop.f32.mrb[48].mxu0  ;;  %v2951_v35 = vsel %vm2822_vm7, %v2757_v54, %v2887_v25  ;;  %v3084_v60 = vmul.f32 %v6096_v47, %v3013_v16  ;;  %v3085_v24 = vmul.f32 %v6096_v47, %v3014_v18  ;;  %v6980_v25 = vld [vmem:[#allocation23_spill] sm:$0xff] }
 0x2e5   : > { %vm2825_vm8 = vcmp.ge.f32.partialorder %v2760_v61, 0.0  ;;  %v2890_v15 = vmul.f32 %v6083_v7, %v2760_v61  ;;  %v2512_v41 = vadd.f32 %v4217_v36, %v6080_v27  ;;  %v2506_v51 = vpop.f32.mrb[49].mxu0  ;;  %3166 = vadd.xlane.f32.xlu1 %v3165_v49  ;;  %v3015_v37 = vadd.f32 %v2951_v35, %v6976_v56 }
 0x2e6   : > { %vm2824_vm9 = vcmp.ge.f32.partialorder %v2759_v33, 0.0  ;;  %v2889_v43 = vmul.f32 %v6083_v7, %v2759_v33  ;;  %v2507_v19 = vadd.f32 %v6080_v27, %v2506_v51  ;;  %v3168_v42 = vsel %vm343_vm0, %v3084_v60, 0.0  ;;  %v6981_v60 = vld [vmem:[#allocation26_spill] sm:$0xff] }
 0x2e7   : > { %v2762_v54 = vmul.f32 %v2512_v41, %v6979_v3  ;;  %v3016_v48 = vadd.f32 %v2952_v46, %v6975_v0  ;;  %v3171_v16 = vsel %vm343_vm0, %v3085_v24, 0.0  ;;  %v2954_v49 = vsel %vm2825_vm8, %v2760_v61, %v2890_v15 }
 0x2e8   : > { %v2761_v23 = vmul.f32 %v2507_v19, %v6980_v25  ;;  %3169 = vadd.xlane.f32.xlu0 %v3168_v42  ;;  %v4220_v45 = vpop.f32.mrb[50].mxu0  ;;  %v2953_v36 = vsel %vm2824_vm9, %v2759_v33, %v2889_v43  ;;  %v3086_v56 = vmul.f32 %v6096_v47, %v3015_v37  ;;  %v3018_v43 = vadd.f32 %v2954_v49, %v6977_v55  ;;  %v6982_v19 = vld [vmem:[#allocation25_spill] sm:$0xff] }
 0x2e9   : > { %vm2827_vm10 = vcmp.ge.f32.partialorder %v2762_v54, 0.0  ;;  %v2892_v51 = vmul.f32 %v6083_v7, %v2762_v54  ;;  %v2522_v18 = vadd.f32 %v4220_v45, %v6080_v27  ;;  %v2516_v41 = vpop.f32.mrb[51].mxu0  ;;  %3172 = vadd.xlane.f32.xlu1 %v3171_v16  ;;  %v3087_v46 = vmul.f32 %v6096_v47, %v3016_v48 }
 0x2ea   : > { %vm2826_vm11 = vcmp.ge.f32.partialorder %v2761_v23, 0.0  ;;  %v2891_v0 = vmul.f32 %v6083_v7, %v2761_v23  ;;  %v2517_v35 = vadd.f32 %v6080_v27, %v2516_v41  ;;  %v3174_v61 = vsel %vm343_vm0, %v3086_v56, 0.0 }
 0x2eb   : > { %v2764_v33 = vmul.f32 %v2522_v18, %v6981_v60  ;;  %v3017_v15 = vadd.f32 %v2953_v36, %v6978_v1  ;;  %v3177_v37 = vsel %vm343_vm0, %v3087_v46, 0.0  ;;  %v2956_v16 = vsel %vm2827_vm10, %v2762_v54, %v2892_v51 }
 0x2ec   : > { %v2763_v24 = vmul.f32 %v2517_v35, %v6982_v19  ;;  %3175 = vadd.xlane.f32.xlu0 %v3174_v61  ;;  %v4223_v42 = vpop.f32.mrb[52].mxu0  ;;  %v2955_v45 = vsel %vm2826_vm11, %v2761_v23, %v2891_v0  ;;  %v3089_v49 = vmul.f32 %v6096_v47, %v3018_v43  ;;  %v3020_v56 = vadd.f32 %v2956_v16, %v6979_v3 }
 0x2ed   : > { %vm2829_vm12 = vcmp.ge.f32.partialorder %v2764_v33, 0.0  ;;  %v2894_v48 = vmul.f32 %v6083_v7, %v2764_v33  ;;  %v2532_v18 = vadd.f32 %v4223_v42, %v6080_v27  ;;  %v2526_v41 = vpop.f32.mrb[53].mxu0  ;;  %3178 = vadd.xlane.f32.xlu1 %v3177_v37  ;;  %v3088_v1 = vmul.f32 %v6096_v47, %v3017_v15 }
 0x2ee   : > { %vm2828_vm13 = vcmp.ge.f32.partialorder %v2763_v24, 0.0  ;;  %v2893_v55 = vmul.f32 %v6083_v7, %v2763_v24  ;;  %v2527_v36 = vadd.f32 %v6080_v27, %v2526_v41  ;;  %v3019_v51 = vadd.f32 %v2955_v45, %v6980_v25 }
 0x2ef   : > { %v2766_v23 = vmul.f32 %v2532_v18, %v5743_v8  ;;  %v3180_v54 = vsel %vm343_vm0, %v3088_v1, 0.0  ;;  %v3183_v46 = vsel %vm343_vm0, %v3089_v49, 0.0  ;;  %v2958_v15 = vsel %vm2829_vm12, %v2764_v33, %v2894_v48 }
 0x2f0   : > { %v2765_v0 = vmul.f32 %v2527_v36, %v5738_v28  ;;  %3181 = vadd.xlane.f32.xlu0 %v3180_v54  ;;  %v4226_v35 = vpop.f32.mrb[54].mxu0  ;;  %v2957_v61 = vsel %vm2828_vm13, %v2763_v24, %v2893_v55  ;;  %v3090_v25 = vmul.f32 %v6096_v47, %v3019_v51  ;;  %v3091_v16 = vmul.f32 %v6096_v47, %v3020_v56 }
 0x2f1   : > { %vm2831_vm14 = vcmp.ge.f32.partialorder %v2766_v23, 0.0  ;;  %v2896_v43 = vmul.f32 %v6083_v7, %v2766_v23  ;;  %v2542_v42 = vadd.f32 %v4226_v35, %v6080_v27  ;;  %v2536_v37 = vpop.f32.mrb[55].mxu0  ;;  %3184 = vadd.xlane.f32.xlu1 %v3183_v46  ;;  %v3021_v48 = vadd.f32 %v2957_v61, %v6982_v19 }
 0x2f2   : > { %vm2830_vm15 = vcmp.ge.f32.partialorder %v2765_v0, 0.0  ;;  %v2895_v3 = vmul.f32 %v6083_v7, %v2765_v0  ;;  %v2537_v45 = vadd.f32 %v6080_v27, %v2536_v37  ;;  %v3186_v33 = vsel %vm343_vm0, %v3090_v25, 0.0 }
 0x2f3   : > { %v2768_v24 = vmul.f32 %v2542_v42, %v5759_v34  ;;  %v3022_v18 = vadd.f32 %v2958_v15, %v6981_v60  ;;  %v3189_v55 = vsel %vm343_vm0, %v3091_v16, 0.0  ;;  %v2960_v49 = vsel %vm2831_vm14, %v2766_v23, %v2896_v43 }
 0x2f4   : > { %v2767_v41 = vmul.f32 %v2537_v45, %v5754_v32  ;;  %3187 = vadd.xlane.f32.xlu0 %v3186_v33  ;;  %v4229_v1 = vpop.f32.mrb[56].mxu0  ;;  %v2959_v36 = vsel %vm2830_vm15, %v2765_v0, %v2895_v3  ;;  %v3092_v19 = vmul.f32 %v6096_v47, %v3021_v48  ;;  %v3024_v15 = vadd.f32 %v2960_v49, %v5743_v8 }
 0x2f5   : > { %vm2833_vm1 = vcmp.ge.f32.partialorder %v2768_v24, 0.0  ;;  %v2898_v54 = vmul.f32 %v6083_v7, %v2768_v24  ;;  %v2552_v51 = vadd.f32 %v4229_v1, %v6080_v27  ;;  %v2546_v56 = vpop.f32.mrb[57].mxu0  ;;  %3190 = vadd.xlane.f32.xlu1 %v3189_v55  ;;  %v3093_v46 = vmul.f32 %v6096_v47, %v3022_v18 }
 0x2f6   : > { %vm2832_vm2 = vcmp.ge.f32.partialorder %v2767_v41, 0.0  ;;  %v2897_v60 = vmul.f32 %v6083_v7, %v2767_v41  ;;  %v2547_v35 = vadd.f32 %v6080_v27, %v2546_v56  ;;  %v3192_v23 = vsel %vm343_vm0, %v3092_v19, 0.0 }
 0x2f7   : > { %v2770_v0 = vmul.f32 %v2552_v51, %v5775_v59  ;;  %v3023_v61 = vadd.f32 %v2959_v36, %v5738_v28  ;;  %v3195_v37 = vsel %vm343_vm0, %v3093_v46, 0.0  ;;  %v2962_v3 = vsel %vm2833_vm1, %v2768_v24, %v2898_v54 }
 0x2f8   : > { %v2769_v43 = vmul.f32 %v2547_v35, %v5770_v10  ;;  %3193 = vadd.xlane.f32.xlu0 %v3192_v23  ;;  %v4232_v42 = vpop.f32.mrb[58].mxu0  ;;  %v2961_v25 = vsel %vm2832_vm2, %v2767_v41, %v2897_v60  ;;  %v3095_v18 = vmul.f32 %v6096_v47, %v3024_v15  ;;  %v3026_v55 = vadd.f32 %v2962_v3, %v5759_v34 }
 0x2f9   : > { %vm2835_vm3 = vcmp.ge.f32.partialorder %v2770_v0, 0.0  ;;  %v2900_v45 = vmul.f32 %v6083_v7, %v2770_v0  ;;  %v2562_v16 = vadd.f32 %v4232_v42, %v6080_v27  ;;  %v2556_v33 = vpop.f32.mrb[59].mxu0  ;;  %3196 = vadd.xlane.f32.xlu1 %v3195_v37  ;;  %v3094_v28 = vmul.f32 %v6096_v47, %v3023_v61 }
 0x2fa   : > { %vm2834_vm4 = vcmp.ge.f32.partialorder %v2769_v43, 0.0  ;;  %v2899_v8 = vmul.f32 %v6083_v7, %v2769_v43  ;;  %v2557_v48 = vadd.f32 %v6080_v27, %v2556_v33  ;;  %v3025_v1 = vadd.f32 %v2961_v25, %v5754_v32 }
 0x2fb   : > { %v2772_v41 = vmul.f32 %v2562_v16, %v5791_v38  ;;  %v3198_v24 = vsel %vm343_vm0, %v3094_v28, 0.0  ;;  %v3201_v54 = vsel %vm343_vm0, %v3095_v18, 0.0  ;;  %v2964_v56 = vsel %vm2835_vm3, %v2770_v0, %v2900_v45 }
 0x2fc   : > { %v2771_v36 = vmul.f32 %v2557_v48, %v5786_v57  ;;  %3199 = vadd.xlane.f32.xlu0 %v3198_v24  ;;  %v4235_v49 = vpop.f32.mrb[60].mxu0  ;;  %v2963_v51 = vsel %vm2834_vm4, %v2769_v43, %v2899_v8  ;;  %v3096_v32 = vmul.f32 %v6096_v47, %v3025_v1  ;;  %v3097_v23 = vmul.f32 %v6096_v47, %v3026_v55 }
 0x2fd   : > { %vm2837_vm5 = vcmp.ge.f32.partialorder %v2772_v41, 0.0  ;;  %v2902_v19 = vmul.f32 %v6083_v7, %v2772_v41  ;;  %v2572_v60 = vadd.f32 %v4235_v49, %v6080_v27  ;;  %v2566_v35 = vpop.f32.mrb[61].mxu0  ;;  %3202 = vadd.xlane.f32.xlu1 %v3201_v54  ;;  %v3027_v15 = vadd.f32 %v2963_v51, %v5770_v10 }
 0x2fe   : > { %vm2836_vm6 = vcmp.ge.f32.partialorder %v2771_v36, 0.0  ;;  %v2901_v34 = vmul.f32 %v6083_v7, %v2771_v36  ;;  %v2567_v46 = vadd.f32 %v6080_v27, %v2566_v35  ;;  %v3204_v0 = vsel %vm343_vm0, %v3096_v32, 0.0 }
 0x2ff   : > { %v2774_v61 = vmul.f32 %v2572_v60, %v5807_v21  ;;  %v3028_v43 = vadd.f32 %v2964_v56, %v5775_v59  ;;  %v3207_v25 = vsel %vm343_vm0, %v3097_v23, 0.0  ;;  %v2966_v45 = vsel %vm2837_vm5, %v2772_v41, %v2902_v19 }
 0x300   : > { %v2773_v42 = vmul.f32 %v2567_v46, %v5802_v39  ;;  %3205 = vadd.xlane.f32.xlu0 %v3204_v0  ;;  %v4238_v37 = vpop.f32.mrb[62].mxu0  ;;  %v2965_v3 = vsel %vm2836_vm6, %v2771_v36, %v2901_v34  ;;  %v3098_v10 = vmul.f32 %v6096_v47, %v3027_v15  ;;  %v3030_v1 = vadd.f32 %v2966_v45, %v5791_v38 }
 0x301   : > { %vm2839_vm7 = vcmp.ge.f32.partialorder %v2774_v61, 0.0  ;;  %v2904_v16 = vmul.f32 %v6083_v7, %v2774_v61  ;;  %v2582_v33 = vadd.f32 %v4238_v37, %v6080_v27  ;;  %v2576_v28 = vpop.f32.mrb[63].mxu0  ;;  %3208 = vadd.xlane.f32.xlu1 %v3207_v25  ;;  %v3099_v48 = vmul.f32 %v6096_v47, %v3028_v43 }
 0x302   : > { %vm2838_vm8 = vcmp.ge.f32.partialorder %v2773_v42, 0.0  ;;  %v2903_v59 = vmul.f32 %v6083_v7, %v2773_v42  ;;  %v2577_v8 = vadd.f32 %v6080_v27, %v2576_v28  ;;  %v3210_v41 = vsel %vm343_vm0, %v3098_v10, 0.0 }
 0x303   : > { %v2776_v18 = vmul.f32 %v2582_v33, %v5823_v14  ;;  %v3029_v24 = vadd.f32 %v2965_v3, %v5786_v57  ;;  %v3213_v49 = vsel %vm343_vm0, %v3099_v48, 0.0  ;;  %v2968_v51 = vsel %vm2839_vm7, %v2774_v61, %v2904_v16 }
 0x304   : > { %v2775_v55 = vmul.f32 %v2577_v8, %v5818_v29  ;;  %3211 = vadd.xlane.f32.xlu0 %v3210_v41  ;;  %v4241_v36 = vpop.f32.mrb[64].mxu0  ;;  %v2967_v54 = vsel %vm2838_vm8, %v2773_v42, %v2903_v59  ;;  %v3101_v32 = vmul.f32 %v6096_v47, %v3030_v1  ;;  %v3032_v61 = vadd.f32 %v2968_v51, %v5807_v21 }
 0x305   : > { %vm2841_vm9 = vcmp.ge.f32.partialorder %v2776_v18, 0.0  ;;  %v2906_v56 = vmul.f32 %v6083_v7, %v2776_v18  ;;  %v2592_v19 = vadd.f32 %v4241_v36, %v6080_v27  ;;  %v2586_v60 = vpop.f32.mrb[65].mxu0  ;;  %3214 = vadd.xlane.f32.xlu1 %v3213_v49  ;;  %v3100_v57 = vmul.f32 %v6096_v47, %v3029_v24 }
 0x306   : > { %vm2840_vm10 = vcmp.ge.f32.partialorder %v2775_v55, 0.0  ;;  %v2905_v38 = vmul.f32 %v6083_v7, %v2775_v55  ;;  %v2587_v35 = vadd.f32 %v6080_v27, %v2586_v60  ;;  %v3031_v23 = vadd.f32 %v2967_v54, %v5802_v39 }
 0x307   : > { %v2778_v34 = vmul.f32 %v2592_v19, %v5839_v52  ;;  %v3216_v46 = vsel %vm343_vm0, %v3100_v57, 0.0  ;;  %v3219_v43 = vsel %vm343_vm0, %v3101_v32, 0.0  ;;  %v2970_v37 = vsel %vm2841_vm9, %v2776_v18, %v2906_v56 }
 0x308   : > { %v2777_v0 = vmul.f32 %v2587_v35, %v5834_v50  ;;  %3217 = vadd.xlane.f32.xlu0 %v3216_v46  ;;  %v4244_v15 = vpop.f32.mrb[66].mxu0  ;;  %v2969_v42 = vsel %vm2840_vm10, %v2775_v55, %v2905_v38  ;;  %v3102_v39 = vmul.f32 %v6096_v47, %v3031_v23  ;;  %v3103_v33 = vmul.f32 %v6096_v47, %v3032_v61 }
 0x309   : > { %vm2843_vm11 = vcmp.ge.f32.partialorder %v2778_v34, 0.0  ;;  %v2908_v25 = vmul.f32 %v6083_v7, %v2778_v34  ;;  %v2602_v3 = vadd.f32 %v4244_v15, %v6080_v27  ;;  %v2596_v45 = vpop.f32.mrb[67].mxu0  ;;  %3220 = vadd.xlane.f32.xlu1 %v3219_v43  ;;  %v3033_v59 = vadd.f32 %v2969_v42, %v5818_v29 }
 0x30a   : > { %vm2842_vm12 = vcmp.ge.f32.partialorder %v2777_v0, 0.0  ;;  %v2907_v21 = vmul.f32 %v6083_v7, %v2777_v0  ;;  %v2597_v16 = vadd.f32 %v6080_v27, %v2596_v45  ;;  %v3222_v10 = vsel %vm343_vm0, %v3102_v39, 0.0 }
 0x30b   : > { %v2780_v28 = vmul.f32 %v2602_v3, %v5855_v22  ;;  %v3034_v8 = vadd.f32 %v2970_v37, %v5823_v14  ;;  %v3225_v41 = vsel %vm343_vm0, %v3103_v33, 0.0  ;;  %v2972_v1 = vsel %vm2843_vm11, %v2778_v34, %v2908_v25 }
 0x30c   : > { %v2779_v48 = vmul.f32 %v2597_v16, %v5850_v58  ;;  %3223 = vadd.xlane.f32.xlu0 %v3222_v10  ;;  %v4247_v18 = vpop.f32.mrb[68].mxu0  ;;  %v2971_v24 = vsel %vm2842_vm12, %v2777_v0, %v2907_v21  ;;  %v3104_v29 = vmul.f32 %v6096_v47, %v3033_v59  ;;  %v3036_v57 = vadd.f32 %v2972_v1, %v5839_v52 }
 0x30d   : > { %vm2845_vm13 = vcmp.ge.f32.partialorder %v2780_v28, 0.0  ;;  %v2910_v55 = vmul.f32 %v6083_v7, %v2780_v28  ;;  %v2612_v36 = vadd.f32 %v4247_v18, %v6080_v27  ;;  %v2606_v49 = vpop.f32.mrb[69].mxu0  ;;  %3226 = vadd.xlane.f32.xlu1 %v3225_v41  ;;  %v3105_v51 = vmul.f32 %v6096_v47, %v3034_v8 }
 0x30e   : > { %vm2844_vm14 = vcmp.ge.f32.partialorder %v2779_v48, 0.0  ;;  %v2909_v14 = vmul.f32 %v6083_v7, %v2779_v48  ;;  %v2607_v54 = vadd.f32 %v6080_v27, %v2606_v49  ;;  %v3228_v19 = vsel %vm343_vm0, %v3104_v29, 0.0 }
 0x30f   : > { %v2782_v56 = vmul.f32 %v2612_v36, %v5871_v5  ;;  %v3035_v60 = vadd.f32 %v2971_v24, %v5834_v50  ;;  %v3231_v32 = vsel %vm343_vm0, %v3105_v51, 0.0  ;;  %v2974_v46 = vsel %vm2845_vm13, %v2780_v28, %v2910_v55 }
 0x310   : > { %v2781_v38 = vmul.f32 %v2607_v54, %v5866_v63  ;;  %3229 = vadd.xlane.f32.xlu0 %v3228_v19  ;;  %v4250_v35 = vpop.f32.mrb[70].mxu0  ;;  %v2973_v34 = vsel %vm2844_vm14, %v2779_v48, %v2909_v14  ;;  %v3107_v43 = vmul.f32 %v6096_v47, %v3036_v57  ;;  %v3038_v3 = vadd.f32 %v2974_v46, %v5855_v22 }
 0x311   : > { %vm2847_vm15 = vcmp.ge.f32.partialorder %v2782_v56, 0.0  ;;  %v2912_v23 = vmul.f32 %v6083_v7, %v2782_v56  ;;  %v2622_v61 = vadd.f32 %v4250_v35, %v6080_v27  ;;  %v2616_v0 = vpop.f32.mrb[71].mxu0  ;;  %3232 = vadd.xlane.f32.xlu1 %v3231_v32  ;;  %v3106_v50 = vmul.f32 %v6096_v47, %v3035_v60 }
 0x312   : > { %vm2846_vm1 = vcmp.ge.f32.partialorder %v2781_v38, 0.0  ;;  %v2911_v52 = vmul.f32 %v6083_v7, %v2781_v38  ;;  %v2617_v15 = vadd.f32 %v6080_v27, %v2616_v0  ;;  %v3037_v25 = vadd.f32 %v2973_v34, %v5850_v58 }
 0x313   : > { %v2784_v42 = vmul.f32 %v2622_v61, %v5887_v9  ;;  %v3234_v37 = vsel %vm343_vm0, %v3106_v50, 0.0  ;;  %v3237_v21 = vsel %vm343_vm0, %v3107_v43, 0.0  ;;  %v2976_v33 = vsel %vm2847_vm15, %v2782_v56, %v2912_v23 }
 0x314   : > { %v2783_v45 = vmul.f32 %v2617_v15, %v5882_v40  ;;  %3235 = vadd.xlane.f32.xlu0 %v3234_v37  ;;  %v4253_v39 = vpop.f32.mrb[72].mxu0  ;;  %v2975_v16 = vsel %vm2846_vm1, %v2781_v38, %v2911_v52  ;;  %v3108_v58 = vmul.f32 %v6096_v47, %v3037_v25  ;;  %v3109_v48 = vmul.f32 %v6096_v47, %v3038_v3 }
 0x315   : > { %vm2849_vm2 = vcmp.ge.f32.partialorder %v2784_v42, 0.0  ;;  %v2914_v28 = vmul.f32 %v6083_v7, %v2784_v42  ;;  %v2632_v10 = vadd.f32 %v4253_v39, %v6080_v27  ;;  %v2626_v59 = vpop.f32.mrb[73].mxu0  ;;  %3238 = vadd.xlane.f32.xlu1 %v3237_v21  ;;  %v3039_v24 = vadd.f32 %v2975_v16, %v5866_v63 }
 0x316   : > { %vm2848_vm3 = vcmp.ge.f32.partialorder %v2783_v45, 0.0  ;;  %v2913_v22 = vmul.f32 %v6083_v7, %v2783_v45  ;;  %v2627_v8 = vadd.f32 %v6080_v27, %v2626_v59  ;;  %v3240_v41 = vsel %vm343_vm0, %v3108_v58, 0.0 }
 0x317   : > { %v2786_v18 = vmul.f32 %v2632_v10, %v5903_v2  ;;  %v3040_v1 = vadd.f32 %v2976_v33, %v5871_v5  ;;  %v3243_v49 = vsel %vm343_vm0, %v3109_v48, 0.0  ;;  %v2978_v14 = vsel %vm2849_vm2, %v2784_v42, %v2914_v28 }
 0x318   : > { %v2785_v55 = vmul.f32 %v2627_v8, %v5898_v20  ;;  %3241 = vadd.xlane.f32.xlu0 %v3240_v41  ;;  %v4256_v36 = vpop.f32.mrb[74].mxu0  ;;  %v2977_v29 = vsel %vm2848_vm3, %v2783_v45, %v2913_v22  ;;  %v3110_v63 = vmul.f32 %v6096_v47, %v3039_v24  ;;  %v3042_v32 = vadd.f32 %v2978_v14, %v5887_v9 }
 0x319   : > { %vm2851_vm4 = vcmp.ge.f32.partialorder %v2786_v18, 0.0  ;;  %v2916_v54 = vmul.f32 %v6083_v7, %v2786_v18  ;;  %v2642_v51 = vadd.f32 %v4256_v36, %v6080_v27  ;;  %v2636_v56 = vpop.f32.mrb[75].mxu0  ;;  %3244 = vadd.xlane.f32.xlu1 %v3243_v49  ;;  %v3111_v60 = vmul.f32 %v6096_v47, %v3040_v1 }
 0x31a   : > { %vm2850_vm5 = vcmp.ge.f32.partialorder %v2785_v55, 0.0  ;;  %v2915_v5 = vmul.f32 %v6083_v7, %v2785_v55  ;;  %v2637_v19 = vadd.f32 %v6080_v27, %v2636_v56  ;;  %v3246_v38 = vsel %vm343_vm0, %v3110_v63, 0.0 }
 0x31b   : > { %v2788_v57 = vmul.f32 %v2642_v51, %v5919_v6  ;;  %v3041_v35 = vadd.f32 %v2977_v29, %v5882_v40  ;;  %v3249_v23 = vsel %vm343_vm0, %v3111_v60, 0.0  ;;  %v2980_v0 = vsel %vm2851_vm4, %v2786_v18, %v2916_v54 }
 0x31c   : > { %v2787_v34 = vmul.f32 %v2637_v19, %v5914_v44  ;;  %3247 = vadd.xlane.f32.xlu0 %v3246_v38  ;;  %v4259_v46 = vpop.f32.mrb[76].mxu0  ;;  %v2979_v61 = vsel %vm2850_vm5, %v2785_v55, %v2915_v5  ;;  %v3113_v42 = vmul.f32 %v6096_v47, %v3042_v32  ;;  %v3044_v45 = vadd.f32 %v2980_v0, %v5903_v2 }
 0x31d   : > { %vm2853_vm6 = vcmp.ge.f32.partialorder %v2788_v57, 0.0  ;;  %v2918_v50 = vmul.f32 %v6083_v7, %v2788_v57  ;;  %v2652_v52 = vadd.f32 %v4259_v46, %v6080_v27  ;;  %v2646_v15 = vpop.f32.mrb[77].mxu0  ;;  %3250 = vadd.xlane.f32.xlu1 %v3249_v23  ;;  %v3112_v40 = vmul.f32 %v6096_v47, %v3041_v35 }
 0x31e   : > { %vm2852_vm7 = vcmp.ge.f32.partialorder %v2787_v34, 0.0  ;;  %v2917_v9 = vmul.f32 %v6083_v7, %v2787_v34  ;;  %v2647_v43 = vadd.f32 %v6080_v27, %v2646_v15  ;;  %v3043_v3 = vadd.f32 %v2979_v61, %v5898_v20 }
 0x31f   : > { %v2790_v37 = vmul.f32 %v2652_v52, %v5935_v13  ;;  %v3252_v25 = vsel %vm343_vm0, %v3112_v40, 0.0  ;;  %v3255_v16 = vsel %vm343_vm0, %v3113_v42, 0.0  ;;  %v2982_v28 = vsel %vm2853_vm6, %v2788_v57, %v2918_v50 }
 0x320   : > { %v2789_v39 = vmul.f32 %v2647_v43, %v5930_v26  ;;  %3253 = vadd.xlane.f32.xlu0 %v3252_v25  ;;  %v4262_v21 = vpop.f32.mrb[78].mxu0  ;;  %v2981_v33 = vsel %vm2852_vm7, %v2787_v34, %v2917_v9  ;;  %v3114_v20 = vmul.f32 %v6096_v47, %v3043_v3  ;;  %v3115_v8 = vmul.f32 %v6096_v47, %v3044_v45 }
 0x321   : > { %vm2855_vm8 = vcmp.ge.f32.partialorder %v2790_v37, 0.0  ;;  %v2920_v10 = vmul.f32 %v6083_v7, %v2790_v37  ;;  %v2662_v59 = vadd.f32 %v4262_v21, %v6080_v27  ;;  %v2656_v58 = vpop.f32.mrb[79].mxu0  ;;  %3256 = vadd.xlane.f32.xlu1 %v3255_v16  ;;  %v3045_v41 = vadd.f32 %v2981_v33, %v5914_v44 }
 0x322   : > { %vm2854_vm9 = vcmp.ge.f32.partialorder %v2789_v39, 0.0  ;;  %v2919_v2 = vmul.f32 %v6083_v7, %v2789_v39  ;;  %v2657_v22 = vadd.f32 %v6080_v27, %v2656_v58  ;;  %v3258_v18 = vsel %vm343_vm0, %v3114_v20, 0.0 }
 0x323   : > { %v2792_v48 = vmul.f32 %v2662_v59, %v5951_v17  ;;  %v3046_v24 = vadd.f32 %v2982_v28, %v5919_v6  ;;  %v3261_v36 = vsel %vm343_vm0, %v3115_v8, 0.0  ;;  %v2984_v29 = vsel %vm2855_vm8, %v2790_v37, %v2920_v10 }
 0x324   : > { %v2791_v1 = vmul.f32 %v2657_v22, %v5946_v30  ;;  %3259 = vadd.xlane.f32.xlu0 %v3258_v18  ;;  %v4265_v55 = vpop.f32.mrb[80].mxu0  ;;  %v2983_v49 = vsel %vm2854_vm9, %v2789_v39, %v2919_v2  ;;  %v3116_v44 = vmul.f32 %v6096_v47, %v3045_v41  ;;  %v3048_v57 = vadd.f32 %v2984_v29, %v5935_v13  ;;  %v6420_v41 = vld [vmem:[%s6698_s2 + $0x2] ss:$0 sm:$0xff] }
 0x325   : > { %vm2857_vm10 = vcmp.ge.f32.partialorder %v2792_v48, 0.0  ;;  %v2922_v14 = vmul.f32 %v6083_v7, %v2792_v48  ;;  %v2672_v54 = vadd.f32 %v4265_v55, %v6080_v27  ;;  %v2666_v51 = vpop.f32.mrb[81].mxu0  ;;  %3262 = vadd.xlane.f32.xlu1 %v3261_v36  ;;  %v3117_v63 = vmul.f32 %v6096_v47, %v3046_v24 }
 0x326   : > { %vm2856_vm11 = vcmp.ge.f32.partialorder %v2791_v1, 0.0  ;;  %v2921_v6 = vmul.f32 %v6083_v7, %v2791_v1  ;;  %v2667_v56 = vadd.f32 %v6080_v27, %v2666_v51  ;;  %v3264_v19 = vsel %vm343_vm0, %v3116_v44, 0.0  ;;  %v6984_v44 = vld [vmem:[#allocation27_spill] sm:$0xff] }
 0x327   : > { %v2794_v5 = vmul.f32 %v2672_v54, %v5967_v11  ;;  %v3047_v60 = vadd.f32 %v2983_v49, %v5930_v26  ;;  %v3267_v32 = vsel %vm343_vm0, %v3117_v63, 0.0  ;;  %v2986_v46 = vsel %vm2857_vm10, %v2792_v48, %v2922_v14  ;;  %v6983_v49 = vld [vmem:[#allocation28_spill] sm:$0xff] }
 0x328   : > { %v2793_v38 = vmul.f32 %v2667_v56, %v5962_v53  ;;  %3265 = vadd.xlane.f32.xlu0 %v3264_v19  ;;  %v4268_v35 = vpop.f32.mrb[82].mxu0  ;;  %v2985_v34 = vsel %vm2856_vm11, %v2791_v1, %v2921_v6  ;;  %v3119_v52 = vmul.f32 %v6096_v47, %v3048_v57  ;;  %v3050_v43 = vadd.f32 %v2986_v46, %v5951_v17 }
 0x329   : > { %vm2859_vm12 = vcmp.ge.f32.partialorder %v2794_v5, 0.0  ;;  %v2924_v23 = vmul.f32 %v6083_v7, %v2794_v5  ;;  %v2682_v61 = vadd.f32 %v4268_v35, %v6080_v27  ;;  %v2676_v0 = vpop.f32.mrb[83].mxu0  ;;  %3268 = vadd.xlane.f32.xlu1 %v3267_v32  ;;  %v3118_v26 = vmul.f32 %v6096_v47, %v3047_v60 }
 0x32a   : > { %vm2858_vm13 = vcmp.ge.f32.partialorder %v2793_v38, 0.0  ;;  %v2923_v13 = vmul.f32 %v6083_v7, %v2793_v38  ;;  %v2677_v50 = vadd.f32 %v6080_v27, %v2676_v0  ;;  %v3049_v9 = vadd.f32 %v2985_v34, %v5946_v30  ;;  %v6985_v34 = vld [vmem:[#allocation30_spill] sm:$0xff] }
 0x32b   : > { %v2796_v15 = vmul.f32 %v2682_v61, %v5983_v31  ;;  %v3270_v40 = vsel %vm343_vm0, %v3118_v26, 0.0  ;;  %v3273_v25 = vsel %vm343_vm0, %v3119_v52, 0.0  ;;  %v2988_v45 = vsel %vm2859_vm12, %v2794_v5, %v2924_v23  ;;  %v6986_v26 = vld [vmem:[#allocation29_spill] sm:$0xff] }
 0x32c   : > { %v2795_v42 = vmul.f32 %v2677_v50, %v5978_v62  ;;  %3271 = vadd.xlane.f32.xlu0 %v3270_v40  ;;  %v4271_v37 = vpop.f32.mrb[84].mxu0  ;;  %v2987_v3 = vsel %vm2858_vm13, %v2793_v38, %v2923_v13  ;;  %v3120_v30 = vmul.f32 %v6096_v47, %v3049_v9  ;;  %v3121_v28 = vmul.f32 %v6096_v47, %v3050_v43 }
 0x32d   : > { %vm2861_vm14 = vcmp.ge.f32.partialorder %v2796_v15, 0.0  ;;  %v2926_v39 = vmul.f32 %v6083_v7, %v2796_v15  ;;  %v2692_v21 = vadd.f32 %v4271_v37, %v6080_v27  ;;  %v2686_v16 = vpop.f32.mrb[85].mxu0  ;;  %3274 = vadd.xlane.f32.xlu1 %v3273_v25  ;;  %v3051_v58 = vadd.f32 %v2987_v3, %v5962_v53  ;;  %v6987_v3 = vld [vmem:[#allocation31_spill] sm:$0xff] }
 0x32e   : > { %vm2860_vm15 = vcmp.ge.f32.partialorder %v2795_v42, 0.0  ;;  %v2925_v17 = vmul.f32 %v6083_v7, %v2795_v42  ;;  %v2687_v33 = vadd.f32 %v6080_v27, %v2686_v16  ;;  %v3276_v59 = vsel %vm343_vm0, %v3120_v30, 0.0  ;;  %v6988_v30 = vld [vmem:[#allocation32_spill] sm:$0xff] }
 0x32f   : > { %v2798_v10 = vmul.f32 %v2692_v21, %v5999_v12  ;;  %v3052_v20 = vadd.f32 %v2988_v45, %v5967_v11  ;;  %v3279_v8 = vsel %vm343_vm0, %v3121_v28, 0.0  ;;  %v2990_v18 = vsel %vm2861_vm14, %v2796_v15, %v2926_v39 }
 0x330   : > { %v2797_v2 = vmul.f32 %v2687_v33, %v5994_v4  ;;  %3277 = vadd.xlane.f32.xlu0 %v3276_v59  ;;  %v4274_v22 = vpop.f32.mrb[86].mxu0  ;;  %v2989_v48 = vsel %vm2860_vm15, %v2795_v42, %v2925_v17  ;;  %v3122_v24 = vmul.f32 %v6096_v47, %v3051_v58  ;;  %v3054_v51 = vadd.f32 %v2990_v18, %v5983_v31 }
 0x331   : > { %vm2863_vm1 = vcmp.ge.f32.partialorder %v2798_v10, 0.0  ;;  %v2928_v27 = vmul.f32 %v6083_v7, %v2798_v10  ;;  %v2702_v53 = vadd.f32 %v6420_v41, %v4274_v22  ;;  %v2696_v11 = vpop.f32.mrb[87].mxu0  ;;  %3280 = vadd.xlane.f32.xlu1 %v3279_v8  ;;  %v3123_v36 = vmul.f32 %v6096_v47, %v3052_v20 }
 0x332   : > { %vm2862_vm2 = vcmp.ge.f32.partialorder %v2797_v2, 0.0  ;;  %v2927_v1 = vmul.f32 %v6083_v7, %v2797_v2  ;;  %v2697_v55 = vadd.f32 %v6420_v41, %v2696_v11  ;;  %v3282_v14 = vsel %vm343_vm0, %v3122_v24, 0.0 }
 0x333   : > { %v2800_v29 = vmul.f32 %v2702_v53, %v6983_v49  ;;  %v3053_v54 = vadd.f32 %v2989_v48, %v5978_v62  ;;  %v3285_v63 = vsel %vm343_vm0, %v3123_v36, 0.0  ;;  %v2992_v19 = vsel %vm2863_vm1, %v2798_v10, %v2928_v27  ;;  %v6439_v62 = vld [vmem:[%s6700_s4] ss:$0 sm:$0xff]  ;;  %v6989_v27 = vld [vmem:[#allocation34_spill] sm:$0xff] }
 0x334   : > { %v2799_v6 = vmul.f32 %v2697_v55, %v6984_v44  ;;  %3283 = vadd.xlane.f32.xlu0 %v3282_v14  ;;  %v4277_v56 = vpop.f32.mrb[88].mxu0  ;;  %v2991_v5 = vsel %vm2862_vm2, %v2797_v2, %v2927_v1  ;;  %v3125_v32 = vmul.f32 %v6439_v62, %v3054_v51  ;;  %v3056_v0 = vadd.f32 %v2992_v19, %v5999_v12  ;;  %v6990_v55 = vld [vmem:[#allocation33_spill] sm:$0xff] }
 0x335   : > { %vm2865_vm3 = vcmp.ge.f32.partialorder %v2800_v29, 0.0  ;;  %v2930_v47 = vmul.f32 %v6083_v7, %v2800_v29  ;;  %v2712_v60 = vadd.f32 %v6420_v41, %v4277_v56  ;;  %v2706_v57 = vpop.f32.mrb[89].mxu0  ;;  %3286 = vadd.xlane.f32.xlu1 %v3285_v63  ;;  %v3124_v31 = vmul.f32 %v6439_v62, %v3053_v54 }
 0x336   : > { %vm2864_vm4 = vcmp.ge.f32.partialorder %v2799_v6, 0.0  ;;  %v2929_v38 = vmul.f32 %v6083_v7, %v2799_v6  ;;  %v2707_v35 = vadd.f32 %v6420_v41, %v2706_v57  ;;  %v3055_v61 = vadd.f32 %v2991_v5, %v5994_v4 }
 0x337   : > { %v2802_v46 = vmul.f32 %v2712_v60, %v6985_v34  ;;  %v3288_v23 = vsel %vm343_vm0, %v3124_v31, 0.0  ;;  %v3291_v52 = vsel %vm343_vm0, %v3125_v32, 0.0  ;;  %v2994_v40 = vsel %vm2865_vm3, %v2800_v29, %v2930_v47  ;;  %v6991_v47 = vld [vmem:[#allocation36_spill] sm:$0xff] }
 0x338   : > { %v2801_v13 = vmul.f32 %v2707_v35, %v6986_v26  ;;  %3289 = vadd.xlane.f32.xlu0 %v3288_v23  ;;  %v4280_v50 = vpop.f32.mrb[90].mxu0  ;;  %v2993_v15 = vsel %vm2864_vm4, %v2799_v6, %v2929_v38  ;;  %v3126_v4 = vmul.f32 %v6439_v62, %v3055_v61  ;;  %v3127_v25 = vmul.f32 %v6439_v62, %v3056_v0  ;;  %v6992_v35 = vld [vmem:[#allocation35_spill] sm:$0xff] }
 0x339   : > { %vm2867_vm5 = vcmp.ge.f32.partialorder %v2802_v46, 0.0  ;;  %v2932_v9 = vmul.f32 %v6083_v7, %v2802_v46  ;;  %v2722_v43 = vadd.f32 %v6420_v41, %v4280_v50  ;;  %v2716_v42 = vpop.f32.mrb[91].mxu0  ;;  %3292 = vadd.xlane.f32.xlu1 %v3291_v52  ;;  %v3057_v21 = vadd.f32 %v2993_v15, %v6984_v44 }
 0x33a   : > { %vm2866_vm6 = vcmp.ge.f32.partialorder %v2801_v13, 0.0  ;;  %v2931_v12 = vmul.f32 %v6083_v7, %v2801_v13  ;;  %v2717_v37 = vadd.f32 %v6420_v41, %v2716_v42  ;;  %v3294_v39 = vsel %vm343_vm0, %v3126_v4, 0.0 }
 0x33b   : > { %v2804_v45 = vmul.f32 %v2722_v43, %v6987_v3  ;;  %v3058_v16 = vadd.f32 %v2994_v40, %v6983_v49  ;;  %v3297_v28 = vsel %vm343_vm0, %v3127_v25, 0.0  ;;  %v2996_v59 = vsel %vm2867_vm5, %v2802_v46, %v2932_v9 }
 0x33c   : > { %v2803_v17 = vmul.f32 %v2717_v37, %v6988_v30  ;;  %3295 = vadd.xlane.f32.xlu0 %v3294_v39  ;;  %v4283_v33 = vpop.f32.mrb[92].mxu0  ;;  %v2995_v10 = vsel %vm2866_vm6, %v2801_v13, %v2931_v12  ;;  %v3128_v22 = vmul.f32 %v6439_v62, %v3057_v21  ;;  %v3060_v1 = vadd.f32 %v2996_v59, %v6985_v34 }
 0x33d   : > { %vm2869_vm7 = vcmp.ge.f32.partialorder %v2804_v45, 0.0  ;;  %v2934_v58 = vmul.f32 %v6083_v7, %v2804_v45  ;;  %v2732_v20 = vadd.f32 %v6420_v41, %v4283_v33  ;;  %v2726_v2 = vpop.f32.mrb[93].mxu0  ;;  %3298 = vadd.xlane.f32.xlu1 %v3297_v28  ;;  %v3129_v18 = vmul.f32 %v6439_v62, %v3058_v16 }
 0x33e   : > { %vm2868_vm8 = vcmp.ge.f32.partialorder %v2803_v17, 0.0  ;;  %v2933_v8 = vmul.f32 %v6083_v7, %v2803_v17  ;;  %v2727_v48 = vadd.f32 %v6420_v41, %v2726_v2  ;;  %v3300_v11 = vsel %vm343_vm0, %v3128_v22, 0.0 }
 0x33f   : > { %v2806_v53 = vmul.f32 %v2732_v20, %v6989_v27  ;;  %v3059_v24 = vadd.f32 %v2995_v10, %v6986_v26  ;;  %v3303_v29 = vsel %vm343_vm0, %v3129_v18, 0.0  ;;  %v2998_v54 = vsel %vm2869_vm7, %v2804_v45, %v2934_v58 }
 0x340   : > { %v2805_v36 = vmul.f32 %v2727_v48, %v6990_v55  ;;  %3301 = vadd.xlane.f32.xlu0 %v3300_v11  ;;  %v4286_v49 = vpop.f32.mrb[94].mxu0  ;;  %v2997_v14 = vsel %vm2868_vm8, %v2803_v17, %v2933_v8  ;;  %v3131_v19 = vmul.f32 %v6439_v62, %v3060_v1  ;;  %v3062_v38 = vadd.f32 %v2998_v54, %v6987_v3 }
 0x341   : > { %vm2871_vm9 = vcmp.ge.f32.partialorder %v2806_v53, 0.0  ;;  %v2936_v51 = vmul.f32 %v6083_v7, %v2806_v53  ;;  %v2742_v44 = vadd.f32 %v6420_v41, %v4286_v49  ;;  %v2736_v6 = vpop.f32.mrb[95].mxu0  ;;  %3304 = vadd.xlane.f32.xlu1 %v3303_v29  ;;  %v3130_v56 = vmul.f32 %v6439_v62, %v3059_v24 }
 0x342   : > { %vm2870_vm10 = vcmp.ge.f32.partialorder %v2805_v36, 0.0  ;;  %v2935_v63 = vmul.f32 %v6083_v7, %v2805_v36  ;;  %v2737_v5 = vadd.f32 %v6420_v41, %v2736_v6  ;;  %v3061_v31 = vadd.f32 %v2997_v14, %v6988_v30 }
 0x343   : > { %v2808_v60 = vmul.f32 %v2742_v44, %v6991_v47  ;;  %v3306_v57 = vsel %vm343_vm0, %v3130_v56, 0.0  ;;  %v3309_v34 = vsel %vm343_vm0, %v3131_v19, 0.0  ;;  %v3000_v23 = vsel %vm2871_vm9, %v2806_v53, %v2936_v51 }
 0x344   : > { %v2807_v32 = vmul.f32 %v2737_v5, %v6992_v35  ;;  %3307 = vadd.xlane.f32.xlu0 %v3306_v57  ;;  %v2999_v46 = vsel %vm2870_vm10, %v2805_v36, %v2935_v63  ;;  %v3132_v61 = vmul.f32 %v6439_v62, %v3061_v31  ;;  %v3133_v0 = vmul.f32 %v6439_v62, %v3062_v38 }
 0x345   : > { %vm2873_vm11 = vcmp.ge.f32.partialorder %v2808_v60, 0.0  ;;  %v2938_v41 = vmul.f32 %v6083_v7, %v2808_v60  ;;  %3310 = vadd.xlane.f32.xlu1 %v3309_v34  ;;  %v3063_v13 = vadd.f32 %v2999_v46, %v6990_v55  ;;  %v3064_v50 = vadd.f32 %v3000_v23, %v6989_v27 }
 0x346   : > { %vm2872_vm12 = vcmp.ge.f32.partialorder %v2807_v32, 0.0  ;;  %v2937_v26 = vmul.f32 %v6083_v7, %v2807_v32  ;;  %v3312_v52 = vsel %vm343_vm0, %v3132_v61, 0.0  ;;  %v3315_v15 = vsel %vm343_vm0, %v3133_v0, 0.0 }
 0x347   : > { %v3002_v40 = vsel %vm2873_vm11, %v2808_v60, %v2938_v41  ;;  %v3134_v9 = vmul.f32 %v6439_v62, %v3063_v13  ;;  %v3135_v43 = vmul.f32 %v6439_v62, %v3064_v50  ;;  %v6512_v21 = vstv %s3330_s12 }
 0x348   : > { %3313 = vadd.xlane.f32.xlu0 %v3312_v52  ;;  %v3001_v42 = vsel %vm2872_vm12, %v2807_v32, %v2937_v26  ;;  %v3066_v4 = vadd.f32 %v3002_v40, %v6991_v47 }
 0x349   : > { %3316 = vadd.xlane.f32.xlu1 %v3315_v15  ;;  %v3065_v7 = vadd.f32 %v3001_v42, %v6992_v35  ;;  %v3318_v12 = vsel %vm343_vm0, %v3134_v9, 0.0  ;;  %v3321_v25 = vsel %vm343_vm0, %v3135_v43, 0.0 }
 0x34a   : > { %v3137_v3 = vmul.f32 %v6439_v62, %v3066_v4 }
 0x34b   : > { %v3136_v37 = vmul.f32 %v6439_v62, %v3065_v7 }
 0x34c   : > { %3319 = vadd.xlane.f32.xlu0 %v3318_v12  ;;  %v3327_v39 = vsel %vm343_vm0, %v3137_v3, 0.0 }
 0x34d   : > { %3322 = vadd.xlane.f32.xlu1 %v3321_v25  ;;  %v3324_v45 = vsel %vm343_vm0, %v3136_v37, 0.0 }
 0x350   : > { %3325 = vadd.xlane.f32.xlu0 %v3324_v45 }
 0x351   : > { %3328 = vadd.xlane.f32.xlu1 %v3327_v39 }
 0x35e   : > { %v3143_v16 = vpop.xlane.xlu0 %3142 }
 0x35f   : > { %v3333_v30 = vadd.f32 %v6512_v21, %v3143_v16 }
 0x361   : > { %3397 = vst [vmem:[%s6515_s15 + $0x8] sm:$0xff] %v3333_v30 }
 0x362   : > { %v3149_v62 = vpop.xlane.xlu1 %3148  ;;  %v3140_v17 = vpop.xlane.xlu0 %3139 }
 0x363   : > { %v3335_v33 = vadd.f32 %v6512_v21, %v3149_v62  ;;  %v3332_v28 = vadd.f32 %v6512_v21, %v3140_v17 }
 0x365   : > { %3399 = vst [vmem:[%s6515_s15 + $0x18] sm:$0xff] %v3335_v33  ;;  %3396 = vst [vmem:[%s6515_s15] sm:$0xff] %v3332_v28 }
 0x366   : > { %v3146_v10 = vpop.xlane.xlu1 %3145 }
 0x367   : > { %v3334_v59 = vadd.f32 %v6512_v21, %v3146_v10 }
 0x368   : > { %v3152_v58 = vpop.xlane.xlu0 %3151 }
 0x369   : > { %3398 = vst [vmem:[%s6515_s15 + $0x10] sm:$0xff] %v3334_v59  ;;  %v3336_v20 = vadd.f32 %v6512_v21, %v3152_v58 }
 0x36a   : > { %v3155_v2 = vpop.xlane.xlu1 %3154 }
 0x36b   : > { %3400 = vst [vmem:[%s6515_s15 + $0x20] sm:$0xff] %v3336_v20  ;;  %v3337_v22 = vadd.f32 %v6512_v21, %v3155_v2 }
 0x36c   : > { %v3158_v8 = vpop.xlane.xlu0 %3157 }
 0x36d   : > { %3401 = vst [vmem:[%s6515_s15 + $0x28] sm:$0xff] %v3337_v22  ;;  %v3338_v48 = vadd.f32 %v6512_v21, %v3158_v8 }
 0x36e   : > { %v3161_v18 = vpop.xlane.xlu1 %3160 }
 0x36f   : > { %v3339_v27 = vadd.f32 %v6512_v21, %v3161_v18  ;;  %3402 = vst [vmem:[%s6515_s15 + $0x30] sm:$0xff] %v3338_v48 }
 0x371   : > { %3403 = vst [vmem:[%s6515_s15 + $0x38] sm:$0xff] %v3339_v27  ;;  %v3164_v53 = vpop.xlane.xlu0 %3163 }
 0x372   : > { %v3340_v11 = vadd.f32 %v6512_v21, %v3164_v53  ;;  %v3167_v24 = vpop.xlane.xlu1 %3166 }
 0x373   : > { %v3341_v1 = vadd.f32 %v6512_v21, %v3167_v24 }
 0x374   : > { %3404 = vst [vmem:[%s6515_s15 + $0x40] sm:$0xff] %v3340_v11 }
 0x375   : > { %3405 = vst [vmem:[%s6515_s15 + $0x48] sm:$0xff] %v3341_v1  ;;  %v3170_v55 = vpop.xlane.xlu0 %3169 }
 0x376   : > { %v3342_v36 = vadd.f32 %v6512_v21, %v3170_v55  ;;  %v3173_v49 = vpop.xlane.xlu1 %3172 }
 0x377   : > { %v3343_v29 = vadd.f32 %v6512_v21, %v3173_v49 }
 0x378   : > { %3406 = vst [vmem:[%s6515_s15 + $0x50] sm:$0xff] %v3342_v36 }
 0x379   : > { %3407 = vst [vmem:[%s6515_s15 + $0x58] sm:$0xff] %v3343_v29  ;;  %v3176_v14 = vpop.xlane.xlu0 %3175 }
 0x37a   : > { %v3344_v54 = vadd.f32 %v6512_v21, %v3176_v14  ;;  %v3179_v51 = vpop.xlane.xlu1 %3178 }
 0x37b   : > { %v3345_v44 = vadd.f32 %v6512_v21, %v3179_v51 }
 0x37c   : > { %3408 = vst [vmem:[%s6515_s15 + $0x60] sm:$0xff] %v3344_v54 }
 0x37d   : > { %3409 = vst [vmem:[%s6515_s15 + $0x68] sm:$0xff] %v3345_v44  ;;  %v3182_v6 = vpop.xlane.xlu0 %3181 }
 0x37e   : > { %v3346_v56 = vadd.f32 %v6512_v21, %v3182_v6  ;;  %v3185_v63 = vpop.xlane.xlu1 %3184 }
 0x37f   : > { %v3347_v5 = vadd.f32 %v6512_v21, %v3185_v63 }
 0x380   : > { %3410 = vst [vmem:[%s6515_s15 + $0x70] sm:$0xff] %v3346_v56 }
 0x381   : > { %3411 = vst [vmem:[%s6515_s15 + $0x78] sm:$0xff] %v3347_v5  ;;  %v3188_v19 = vpop.xlane.xlu0 %3187 }
 0x382   : > { %v3348_v47 = vadd.f32 %v6512_v21, %v3188_v19  ;;  %v3191_v60 = vpop.xlane.xlu1 %3190 }
 0x383   : > { %v3349_v57 = vadd.f32 %v6512_v21, %v3191_v60 }
 0x384   : > { %3412 = vst [vmem:[%s6515_s15 + $0x80] sm:$0xff] %v3348_v47 }
 0x385   : > { %3413 = vst [vmem:[%s6515_s15 + $0x88] sm:$0xff] %v3349_v57  ;;  %v3194_v31 = vpop.xlane.xlu0 %3193 }
 0x386   : > { %v3350_v38 = vadd.f32 %v6512_v21, %v3194_v31  ;;  %v3197_v35 = vpop.xlane.xlu1 %3196 }
 0x387   : > { %v3351_v32 = vadd.f32 %v6512_v21, %v3197_v35 }
 0x388   : > { %3414 = vst [vmem:[%s6515_s15 + $0x90] sm:$0xff] %v3350_v38 }
 0x389   : > { %3415 = vst [vmem:[%s6515_s15 + $0x98] sm:$0xff] %v3351_v32  ;;  %v3200_v34 = vpop.xlane.xlu0 %3199 }
 0x38a   : > { %v3352_v46 = vadd.f32 %v6512_v21, %v3200_v34  ;;  %v3203_v23 = vpop.xlane.xlu1 %3202 }
 0x38b   : > { %v3353_v41 = vadd.f32 %v6512_v21, %v3203_v23 }
 0x38c   : > { %3416 = vst [vmem:[%s6515_s15 + $0xa0] sm:$0xff] %v3352_v46 }
 0x38d   : > { %3417 = vst [vmem:[%s6515_s15 + $0xa8] sm:$0xff] %v3353_v41  ;;  %v3206_v61 = vpop.xlane.xlu0 %3205 }
 0x38e   : > { %v3354_v0 = vadd.f32 %v6512_v21, %v3206_v61  ;;  %v3209_v26 = vpop.xlane.xlu1 %3208 }
 0x38f   : > { %v3355_v13 = vadd.f32 %v6512_v21, %v3209_v26 }
 0x390   : > { %3418 = vst [vmem:[%s6515_s15 + $0xb0] sm:$0xff] %v3354_v0 }
 0x391   : > { %3419 = vst [vmem:[%s6515_s15 + $0xb8] sm:$0xff] %v3355_v13  ;;  %v3212_v50 = vpop.xlane.xlu0 %3211 }
 0x392   : > { %v3356_v52 = vadd.f32 %v6512_v21, %v3212_v50  ;;  %v3215_v15 = vpop.xlane.xlu1 %3214 }
 0x393   : > { %v3357_v40 = vadd.f32 %v6512_v21, %v3215_v15 }
 0x394   : > { %3420 = vst [vmem:[%s6515_s15 + $0xc0] sm:$0xff] %v3356_v52 }
 0x395   : > { %3421 = vst [vmem:[%s6515_s15 + $0xc8] sm:$0xff] %v3357_v40  ;;  %v3218_v9 = vpop.xlane.xlu0 %3217 }
 0x396   : > { %v3358_v43 = vadd.f32 %v6512_v21, %v3218_v9  ;;  %v3221_v42 = vpop.xlane.xlu1 %3220 }
 0x397   : > { %v3359_v4 = vadd.f32 %v6512_v21, %v3221_v42 }
 0x398   : > { %3422 = vst [vmem:[%s6515_s15 + $0xd0] sm:$0xff] %v3358_v43 }
 0x399   : > { %3423 = vst [vmem:[%s6515_s15 + $0xd8] sm:$0xff] %v3359_v4  ;;  %v3224_v7 = vpop.xlane.xlu0 %3223 }
 0x39a   : > { %v3360_v12 = vadd.f32 %v6512_v21, %v3224_v7  ;;  %v3227_v37 = vpop.xlane.xlu1 %3226 }
 0x39b   : > { %v3361_v25 = vadd.f32 %v6512_v21, %v3227_v37 }
 0x39c   : > { %3424 = vst [vmem:[%s6515_s15 + $0xe0] sm:$0xff] %v3360_v12 }
 0x39d   : > { %3425 = vst [vmem:[%s6515_s15 + $0xe8] sm:$0xff] %v3361_v25  ;;  %v3230_v3 = vpop.xlane.xlu0 %3229 }
 0x39e   : > { %v3362_v45 = vadd.f32 %v6512_v21, %v3230_v3  ;;  %v3233_v39 = vpop.xlane.xlu1 %3232 }
 0x39f   : > { %v3363_v16 = vadd.f32 %v6512_v21, %v3233_v39 }
 0x3a0   : > { %3426 = vst [vmem:[%s6515_s15 + $0xf0] sm:$0xff] %v3362_v45 }
 0x3a1   : > { %3427 = vst [vmem:[%s6515_s15 + $0xf8] sm:$0xff] %v3363_v16  ;;  %v3236_v30 = vpop.xlane.xlu0 %3235 }
 0x3a2   : > { %v3364_v62 = vadd.f32 %v6512_v21, %v3236_v30  ;;  %v3239_v17 = vpop.xlane.xlu1 %3238 }
 0x3a3   : > { %v3365_v33 = vadd.f32 %v6512_v21, %v3239_v17 }
 0x3a4   : > { %3428 = vst [vmem:[%s6515_s15 + $0x100] sm:$0xff] %v3364_v62 }
 0x3a5   : > { %3429 = vst [vmem:[%s6515_s15 + $0x108] sm:$0xff] %v3365_v33  ;;  %v3242_v28 = vpop.xlane.xlu0 %3241 }
 0x3a6   : > { %v3366_v10 = vadd.f32 %v6512_v21, %v3242_v28  ;;  %v3245_v59 = vpop.xlane.xlu1 %3244 }
 0x3a7   : > { %v3367_v58 = vadd.f32 %v6512_v21, %v3245_v59 }
 0x3a8   : > { %3430 = vst [vmem:[%s6515_s15 + $0x110] sm:$0xff] %v3366_v10 }
 0x3a9   : > { %3431 = vst [vmem:[%s6515_s15 + $0x118] sm:$0xff] %v3367_v58  ;;  %v3248_v20 = vpop.xlane.xlu0 %3247 }
 0x3aa   : > { %v3368_v2 = vadd.f32 %v6512_v21, %v3248_v20  ;;  %v3251_v22 = vpop.xlane.xlu1 %3250 }
 0x3ab   : > { %v3369_v8 = vadd.f32 %v6512_v21, %v3251_v22 }
 0x3ac   : > { %3432 = vst [vmem:[%s6515_s15 + $0x120] sm:$0xff] %v3368_v2 }
 0x3ad   : > { %3433 = vst [vmem:[%s6515_s15 + $0x128] sm:$0xff] %v3369_v8  ;;  %v3254_v48 = vpop.xlane.xlu0 %3253 }
 0x3ae   : > { %v3370_v18 = vadd.f32 %v6512_v21, %v3254_v48  ;;  %v3257_v27 = vpop.xlane.xlu1 %3256 }
 0x3af   : > { %v3371_v53 = vadd.f32 %v6512_v21, %v3257_v27 }
 0x3b0   : > { %3434 = vst [vmem:[%s6515_s15 + $0x130] sm:$0xff] %v3370_v18 }
 0x3b1   : > { %3435 = vst [vmem:[%s6515_s15 + $0x138] sm:$0xff] %v3371_v53  ;;  %v3260_v11 = vpop.xlane.xlu0 %3259 }
 0x3b2   : > { %v3372_v24 = vadd.f32 %v6512_v21, %v3260_v11  ;;  %v3263_v1 = vpop.xlane.xlu1 %3262 }
 0x3b3   : > { %v3373_v55 = vadd.f32 %v6512_v21, %v3263_v1 }
 0x3b4   : > { %3436 = vst [vmem:[%s6515_s15 + $0x140] sm:$0xff] %v3372_v24 }
 0x3b5   : > { %3437 = vst [vmem:[%s6515_s15 + $0x148] sm:$0xff] %v3373_v55  ;;  %v3266_v36 = vpop.xlane.xlu0 %3265 }
 0x3b6   : > { %v3374_v49 = vadd.f32 %v6512_v21, %v3266_v36  ;;  %v3269_v29 = vpop.xlane.xlu1 %3268 }
 0x3b7   : > { %v3375_v14 = vadd.f32 %v6512_v21, %v3269_v29 }
 0x3b8   : > { %3438 = vst [vmem:[%s6515_s15 + $0x150] sm:$0xff] %v3374_v49 }
 0x3b9   : > { %3439 = vst [vmem:[%s6515_s15 + $0x158] sm:$0xff] %v3375_v14  ;;  %v3272_v54 = vpop.xlane.xlu0 %3271 }
 0x3ba   : > { %v3376_v51 = vadd.f32 %v6512_v21, %v3272_v54  ;;  %v3275_v44 = vpop.xlane.xlu1 %3274 }
 0x3bb   : > { %v3377_v6 = vadd.f32 %v6512_v21, %v3275_v44 }
 0x3bc   : > { %3440 = vst [vmem:[%s6515_s15 + $0x160] sm:$0xff] %v3376_v51 }
 0x3bd   : > { %3441 = vst [vmem:[%s6515_s15 + $0x168] sm:$0xff] %v3377_v6  ;;  %v3278_v56 = vpop.xlane.xlu0 %3277 }
 0x3be   : > { %v3378_v63 = vadd.f32 %v6512_v21, %v3278_v56  ;;  %v3281_v5 = vpop.xlane.xlu1 %3280 }
 0x3bf   : > { %v3379_v19 = vadd.f32 %v6512_v21, %v3281_v5 }
 0x3c0   : > { %3442 = vst [vmem:[%s6515_s15 + $0x170] sm:$0xff] %v3378_v63 }
 0x3c1   : > { %3443 = vst [vmem:[%s6515_s15 + $0x178] sm:$0xff] %v3379_v19  ;;  %v3284_v47 = vpop.xlane.xlu0 %3283 }
 0x3c2   : > { %v3380_v60 = vadd.f32 %v6512_v21, %v3284_v47  ;;  %v3287_v57 = vpop.xlane.xlu1 %3286 }
 0x3c3   : > { %v3381_v31 = vadd.f32 %v6512_v21, %v3287_v57 }
 0x3c4   : > { %3444 = vst [vmem:[%s6515_s15 + $0x180] sm:$0xff] %v3380_v60 }
 0x3c5   : > { %3445 = vst [vmem:[%s6515_s15 + $0x188] sm:$0xff] %v3381_v31  ;;  %v3290_v38 = vpop.xlane.xlu0 %3289 }
 0x3c6   : > { %v3382_v35 = vadd.f32 %v6512_v21, %v3290_v38  ;;  %v3293_v32 = vpop.xlane.xlu1 %3292 }
 0x3c7   : > { %v3383_v34 = vadd.f32 %v6512_v21, %v3293_v32 }
 0x3c8   : > { %3446 = vst [vmem:[%s6515_s15 + $0x190] sm:$0xff] %v3382_v35 }
 0x3c9   : > { %3447 = vst [vmem:[%s6515_s15 + $0x198] sm:$0xff] %v3383_v34  ;;  %v3296_v46 = vpop.xlane.xlu0 %3295 }
 0x3ca   : > { %v3384_v23 = vadd.f32 %v6512_v21, %v3296_v46  ;;  %v3299_v41 = vpop.xlane.xlu1 %3298 }
 0x3cb   : > { %v3385_v61 = vadd.f32 %v6512_v21, %v3299_v41 }
 0x3cc   : > { %3448 = vst [vmem:[%s6515_s15 + $0x1a0] sm:$0xff] %v3384_v23 }
 0x3cd   : > { %3449 = vst [vmem:[%s6515_s15 + $0x1a8] sm:$0xff] %v3385_v61  ;;  %v3302_v0 = vpop.xlane.xlu0 %3301 }
 0x3ce   : > { %v3386_v26 = vadd.f32 %v6512_v21, %v3302_v0  ;;  %v3305_v13 = vpop.xlane.xlu1 %3304 }
 0x3cf   : > { %v3387_v50 = vadd.f32 %v6512_v21, %v3305_v13 }
 0x3d0   : > { %3450 = vst [vmem:[%s6515_s15 + $0x1b0] sm:$0xff] %v3386_v26 }
 0x3d1   : > { %3451 = vst [vmem:[%s6515_s15 + $0x1b8] sm:$0xff] %v3387_v50  ;;  %v3308_v52 = vpop.xlane.xlu0 %3307 }
 0x3d2   : > { %v3388_v15 = vadd.f32 %v6512_v21, %v3308_v52  ;;  %v3311_v40 = vpop.xlane.xlu1 %3310 }
 0x3d3   : > { %v3389_v9 = vadd.f32 %v6512_v21, %v3311_v40 }
 0x3d4   : > { %3452 = vst [vmem:[%s6515_s15 + $0x1c0] sm:$0xff] %v3388_v15 }
 0x3d5   : > { %3453 = vst [vmem:[%s6515_s15 + $0x1c8] sm:$0xff] %v3389_v9  ;;  %v3314_v43 = vpop.xlane.xlu0 %3313 }
 0x3d6   : > { %v3390_v42 = vadd.f32 %v6512_v21, %v3314_v43  ;;  %v3317_v4 = vpop.xlane.xlu1 %3316 }
 0x3d7   : > { %v3391_v7 = vadd.f32 %v6512_v21, %v3317_v4 }
 0x3d8   : > { %3454 = vst [vmem:[%s6515_s15 + $0x1d0] sm:$0xff] %v3390_v42 }
 0x3d9   : > { %3455 = vst [vmem:[%s6515_s15 + $0x1d8] sm:$0xff] %v3391_v7  ;;  %v3320_v12 = vpop.xlane.xlu0 %3319 }
 0x3da   : > { %v3392_v37 = vadd.f32 %v6512_v21, %v3320_v12  ;;  %v3323_v25 = vpop.xlane.xlu1 %3322 }
 0x3db   : > { %v3393_v3 = vadd.f32 %v6512_v21, %v3323_v25 }
 0x3dc   : > { %3456 = vst [vmem:[%s6515_s15 + $0x1e0] sm:$0xff] %v3392_v37 }
 0x3dd   : > { %3457 = vst [vmem:[%s6515_s15 + $0x1e8] sm:$0xff] %v3393_v3  ;;  %v3326_v45 = vpop.xlane.xlu0 %3325 }
 0x3de   : > { %v3394_v39 = vadd.f32 %v6512_v21, %v3326_v45  ;;  %v3329_v16 = vpop.xlane.xlu1 %3328 }
 0x3df   : > { %v3395_v30 = vadd.f32 %v6512_v21, %v3329_v16 }
 0x3e0   : > { %3458 = vst [vmem:[%s6515_s15 + $0x1f0] sm:$0xff] %v3394_v39 }
 0x3e1   : > { %3459 = vst [vmem:[%s6515_s15 + $0x1f8] sm:$0xff] %v3395_v30 }
 0x3e2   : > { %4406 = shalt.err (!%p4403_p2)
}
 0x3e3   : > { %s4407_s30 = scalar_lea.hbm %s6646_s20, 8192  ;;  %s4411_s12 = scalar_lea.hbm %s6702_s6, 16384 }
 0x3e4   : > { %p4408_p3 = scmp.ne.s32.totalorder %s6646_s20, %s4407_s30  ;;  %p4412_p8 = scmp.lt.u32.totalorder %s6646_s20, %s6702_s6 }
 0x3e5   : > { %p4413_p9 = scmp.lt.u32.totalorder %s4411_s12, %s4407_s30  ;;  %p4415_p11 = scmp.lt.u32.totalorder %s4407_s30, %s6646_s20 }
 0x3e6   : > { %p4409_p4 = pnand %p4408_p3, %p4541_p5 }
 0x3e7   : > { %p4414_p10 = por %p4413_p9, %p4412_p8 }
 0x3e8   : > { %p4410_p7 = pneg %p4409_p4 }
 0x3e9   : > { %p4416_p12 = por %p4415_p11, %p4414_p10 }
 0x3eb   : > { %p4417_p13 = pnand %p4416_p12, %p4410_p7 }
 0x3ed   : > { %4420 = shalt.err (!%p4417_p13)
}
 0x3ee   : > { %s4463_s15 = smov 128   ;;  %s4464_s17 = smov 8  }
 0x3ef   : > { %4319 = dma.vmem_to_hbm [thread:$0]  (%p4541_p5), %s6648_s18, 8192, %s6646_s20, %s6655_s5, %s4463_s15, %s4463_s15, %s4464_s17  }
 0x3f0 PF: > { %p4331_p0 = scmp.ge.s32.totalorder %s4459_s26, 2  ;;  %s3489_s19 = sand.u32 1, %s4447_s23  }
 0x3f1   : > { %s3490_s16 = scalar_lea.sflag [#allocation4], %s3489_s19 }
 0x3f2   : > { %p4326_p1 = pnand %p4331_p0, %p4545_p6 }
 0x3f4   : > { %4442 = dma.done.wait (!%p4326_p1), %s3490_s16, 8192  }
 0x3f5   : > { %4444 = vsyncadd (!%p4326_p1), %s3490_s16, 4294959104  ;;  %p18_p2 = scmp.ge.s32.totalorder %s4528_s28, 4   ;;  %s6993_s23 = smov %s4451_s24 }
 0x3f6   : > { %s6994_s24 = smov %s4455_s25  ;;  %s6995_s25 = smov %s4539_s7 }
 0x3f7   : > { %s6996_s26 = smov %s4528_s28  ;;  %20 = sbr.rel (!%p18_p2) target bundleno = 6 (0x6), region = 88 }
 0x3fe   :  { %3495 = vsyncpa [#allocation4], 1 }
 0x3ff   :  { %3497 = vsyncpa [#allocation4 + $0x1], 1 }
 0x400   :  { %3498 = vsyncpa [#allocation5], 1 }
 0x401   :  { %3500 = vsyncpa [#allocation5 + $0x1], 1 }

</bundles_post_ra>
